<compile_context>
chip_gen: v5e
topology: v5e:2x2
jax: 0.10.0
libtpu: 0.0.40
codegen_flags: <defaults>
</compile_context>

<pallas_src>
import functools

import numpy as np
import jax
import jax.numpy as jnp
from jax.experimental import pallas as pl
from jax.experimental.pallas import tpu as pltpu


# ----------------------------- configuration ------------------------------
CFG = dict(
    version="Fourier",
    mode_select="low",
    modes=4,
    seq_len=16,
    label_len=8,
    pred_len=8,
    enc_in=4,
    dec_in=4,
    c_out=4,
    d_model=32,
    n_heads=8,          # FourierBlock hard-codes 8 "heads" in its weight tensor
    d_ff=64,
    e_layers=2,
    d_layers=1,
    moving_avg=5,
    dropout=0.0,        # dropout disabled -> identity (deterministic forward)
    activation="relu",
    embed="timeF",
    num_time_features=3,
    cross_activation="tanh",
)


# ------------------------------ small helpers ------------------------------
def _mm(a, b):
    return jnp.dot(a, b, preferred_element_type=jnp.float32)


def get_frequency_modes(seq_len, modes, mode_select_method="low"):
    modes = min(modes, seq_len // 2)
    index = list(range(0, modes))      # 'low' -> first `modes` frequencies
    index.sort()
    return index


# ------------------------- precomputed static matrices ----------------------
def _dft_matrices(L, index):
    """Real forward-DFT selection [M,L] and inverse-DFT [L,M] matrices matching
    rfft(select) / irfft(zero-padded half spectrum, n=L)."""
    M = len(index)
    t = np.arange(L, dtype=np.float64)
    fr = np.zeros((M, L), np.float32)
    fi = np.zeros((M, L), np.float32)
    icrt = np.zeros((L, M), np.float32)
    icit = np.zeros((L, M), np.float32)
    for mi, m in enumerate(index):
        ang = 2.0 * np.pi * m * t / L
        fr[mi, :] = np.cos(ang)
        fi[mi, :] = -np.sin(ang)
        scale = (1.0 / L) if (m == 0 or 2 * m == L) else (2.0 / L)
        icrt[:, mi] = scale * np.cos(ang)
        icit[:, mi] = -scale * np.sin(ang)
    return fr, fi, icrt, icit


def _moving_avg_matrix(L, kernel):
    """Banded matrix equal to Autoformer's replicate-padded stride-1 moving average."""
    pad = (kernel - 1) // 2
    ma = np.zeros((L, L), np.float32)
    for t in range(L):
        for j in range(kernel):
            s = min(max(t + j - pad, 0), L - 1)
            ma[t, s] += 1.0 / kernel
    return ma


def _circ_shift_matrix(L, shift):
    """(R @ x)[t] = x[(t + shift) mod L]  (circular shift over time)."""
    r = np.zeros((L, L), np.float32)
    for t in range(L):
        r[t, (t + shift) % L] = 1.0
    return r


def _sel_matrix(L, D):
    """Sel_a [L, D] so that the torch `.view(B,L,-1)` of the [D,L] attention output is
    out_attn[:, a*L:(a+1)*L] = Sel_a @ out_fb  (k = D//L blocks)."""
    k = D // L
    sel = np.zeros((k, L, D), np.float32)
    for a in range(k):
        for l in range(L):
            sel[a, l, k * l + a] = 1.0
    return sel


def _mode_mix_consts(M, D):
    """0/1 mode mask [M, 2MD] and block-sum matrix [2MD, 2D] for the all-modes-at-once
    complex block-diagonal frequency mixing."""
    msk = np.zeros((M, 2 * M * D), np.float32)
    sb = np.zeros((2 * M * D, 2 * D), np.float32)
    eye = np.eye(D, dtype=np.float32)
    for m in range(M):
        msk[m, m * D:(m + 1) * D] = 1.0
        msk[m, M * D + m * D:M * D + (m + 1) * D] = 1.0
        sb[m * D:(m + 1) * D, :D] = eye
        sb[M * D + m * D:M * D + (m + 1) * D, D:] = eye
    return msk, sb


def _wide_fourier_weights(w_complex, H, E):
    """[H,E,E,M] complex weights -> wide real matrix [D, 2*M*D]:
    columns m*D..(m+1)*D hold the real head-block-diagonal weight of mode m,
    columns M*D+m*D.. hold the imaginary one."""
    w = np.asarray(w_complex)
    M = w.shape[-1]
    D = H * E
    wide = np.zeros((D, 2 * M * D), np.float32)
    for m in range(M):
        for h in range(H):
            blk = w[h, :, :, m]
            wide[h * E:(h + 1) * E, m * D + h * E:m * D + (h + 1) * E] = blk.real
            wide[h * E:(h + 1) * E, M * D + m * D + h * E:M * D + m * D + (h + 1) * E] = blk.imag
    return wide


def _cross_key_consts(fr_kv, fi_kv, H, E, Mkv):
    """Precomputed matrices so that kfr_e = (TILE_FRK @ kc) * BMASKT is the per-head
    expanded key spectrum [H*Mkv, D] (zero outside the own head block)."""
    D = H * E
    HM = H * Mkv
    tile = np.zeros((Mkv, HM), np.float32)
    for h in range(H):
        for y in range(Mkv):
            tile[y, h * Mkv + y] = 1.0
    tile_frk = (tile.T @ fr_kv).astype(np.float32)   # [HM, Lkv]
    tile_fik = (tile.T @ fi_kv).astype(np.float32)
    bmaskT = np.zeros((HM, D), np.float32)
    for h in range(H):
        bmaskT[h * Mkv:(h + 1) * Mkv, h * E:(h + 1) * E] = 1.0
    return tile_frk, tile_fik, bmaskT


def _decomp_init_mats(L1, L_dec, label_len, ma_e):
    """seasonal_init = SEAS @ x_enc ; trend_init = TREND @ x_enc  (both [L_dec, L1])."""
    p_lab = np.zeros((L_dec, L1), np.float32)
    for t in range(label_len):
        p_lab[t, L1 - label_len + t] = 1.0
    p_mean = np.zeros((L_dec, L1), np.float32)
    p_mean[label_len:, :] = 1.0 / L1
    sea_e = np.eye(L1, dtype=np.float32) - ma_e
    seas_init = (p_lab @ sea_e).astype(np.float32)
    trend_init = (p_lab @ ma_e + p_mean).astype(np.float32)
    return seas_init, trend_init


# ------------------------------ the fused kernel ------------------------------
def _fedformer_kernel(*refs, names, M, D, E, H, k_enc, k_dec, L1, L_dec, pred_len,
                      n_enc_layers, n_dec_layers, activation):
    r = dict(zip(names, refs))
    o_ref = refs[len(names)]

    def act(v):
        if activation == "relu":
            return jnp.maximum(v, 0.0)
        return jax.nn.gelu(v, approximate=False)

    def my_layernorm(x, g, b):
        mu = jnp.mean(x, axis=-1, keepdims=True)
        var = jnp.mean((x - mu) ** 2, axis=-1, keepdims=True)
        xh = (x - mu) * jax.lax.rsqrt(var + 1e-5) * g + b
        return xh - jnp.mean(xh, axis=0, keepdims=True)

    def circ_conv3(x, rprev, rnext, wp, wc, wn):
        # circular kernel-3 conv over time as shift-matrix matmuls (exact torch semantics)
        return _mm(_mm(rprev, x), wp) + _mm(x, wc) + _mm(_mm(rnext, x), wn)

    modemask = r["modemask"][...]          # [M, 2MD]
    sumblk2 = r["sumblk2"][...]            # [2MD, 2D]

    def mode_mix(xre, xim, wwide):
        # all-modes-at-once complex block-diagonal mixing: yr/yi [M, D]
        a_re = _mm(_mm(xre, wwide) * modemask, sumblk2)   # [M, 2D]
        a_im = _mm(_mm(xim, wwide) * modemask, sumblk2)
        yr = a_re[:, :D] - a_im[:, D:]
        yi = a_re[:, D:] + a_im[:, :D]
        return yr, yi

    def scramble_out_proj(out_fbt, sel_ref, wo, bo, L, kf):
        # torch `.view(B, L, -1)` of the contiguous [H*E, L] attention output, fused with
        # the out projection:  attn = sum_a Sel_a @ out_fb @ Wo[a*L:(a+1)*L]  + bo
        out_fb = out_fbt.T                                 # [D, L]
        attn = bo
        for a in range(kf):
            attn = attn + _mm(_mm(sel_ref[a], out_fb), wo[a * L:(a + 1) * L, :])
        return attn

    def fourier_self_attn(x, wq, bq, wwide, wo, bo, fr, fi, icrt, icit, sel_ref, L, kf):
        # AutoCorrelationLayer(q-proj -> FourierBlock -> view scramble -> out-proj).
        # (k/v projections are dead code w.r.t. the FourierBlock output and skipped.)
        q = _mm(x, wq) + bq                                # [L, D]
        xre = _mm(fr, q)                                   # [M, D]  Re(rfft) selected modes
        xim = _mm(fi, q)                                   # [M, D]  Im(rfft)
        yr, yi = mode_mix(xre, xim, wwide)
        out_fbt = _mm(icrt, yr) + _mm(icit, yi)            # [L, D]  irfft (transposed)
        return scramble_out_proj(out_fbt, sel_ref, wo, bo, L, kf)

    def complex_tanh(re, im):
        # tanh(a+ib) = (tanh 2a + i sin 2b sech 2a) / (1 + cos 2b sech 2a)  (stable form)
        p = 2.0 * re
        t = 2.0 * im
        e = jnp.exp(-jnp.abs(p))
        e2 = e * e
        d0 = 1.0 + e2
        tanh_p = jnp.where(p >= 0.0, 1.0, -1.0) * (1.0 - e2) / d0
        sech_p = (2.0 * e) / d0
        den = 1.0 + jnp.cos(t) * sech_p
        return tanh_p / den, (jnp.sin(t) * sech_p) / den

    # -------------------------------- encoder --------------------------------
    xe = r["x_enc"][0]                                     # [L1, N]
    enc = circ_conv3(xe, r["rprev_e"][...], r["rnext_e"][...],
                     r["e_wp"][...], r["e_wc"][...], r["e_wn"][...]) \
        + _mm(r["x_mark_enc"][0], r["e_wt"][...])          # DataEmbedding_wo_pos

    sea_e = r["sea_e"][...]                                # I - MA  (seasonal extractor)
    fr_e = r["fr_e"][...]; fi_e = r["fi_e"][...]
    icrt_e = r["icrt_e"][...]; icit_e = r["icit_e"][...]
    for li in range(n_enc_layers):
        attn = fourier_self_attn(enc, r["enc_wq"][li], r["enc_bq"][li], r["enc_wwide"][li],
                                 r["enc_wo"][li], r["enc_bo"][li],
                                 fr_e, fi_e, icrt_e, icit_e, r["sel_e"], L1, k_enc)
        x = _mm(sea_e, enc + attn)                         # decomp1 -> seasonal
        y = _mm(act(_mm(x, r["enc_w1"][li])), r["enc_w2"][li])
        enc = _mm(sea_e, x + y)                            # decomp2 -> seasonal
    enc = my_layernorm(enc, r["enc_g"][...], r["enc_b"][...])   # Encoder norm (my_Layernorm)

    # ------------------------------ decoder init -----------------------------
    seasonal_init = _mm(r["seas_init"][...], xe)           # [L_dec, N]
    trend_total = _mm(r["trend_init"][...], xe)            # [L_dec, c_out]
    rprev_d = r["rprev_d"][...]; rnext_d = r["rnext_d"][...]
    xd = circ_conv3(seasonal_init, rprev_d, rnext_d,
                    r["d_wp"][...], r["d_wc"][...], r["d_wn"][...]) \
        + _mm(r["x_mark_dec"][0], r["d_wt"][...])

    ma_d = r["ma_d"][...]
    fr_d = r["fr_d"][...]; fi_d = r["fi_d"][...]
    icrt_d = r["icrt_d"][...]; icit_d = r["icit_d"][...]
    icrtq = r["icrtq"][...]; icitq = r["icitq"][...]
    tile_frk = r["tile_frk"][...]; tile_fik = r["tile_fik"][...]; bmaskT = r["bmaskT"][...]

    x_cur = xd
    for li in range(n_dec_layers):
        # --- self attention + decomp1 ---
        attn = fourier_self_attn(x_cur, r["ds_wq"][li], r["ds_bq"][li], r["ds_wwide"][li],
                                 r["ds_wo"][li], r["ds_bo"][li],
                                 fr_d, fi_d, icrt_d, icit_d, r["sel_d"], L_dec, k_dec)
        x = x_cur + attn
        mm1 = _mm(ma_d, x)
        x1 = x - mm1

        # --- FourierCrossAttention (real/imag arithmetic, no complex dtype) ---
        qc = _mm(x1, r["c_wq"][li]) + r["c_bq"][li]        # [L_dec, D]
        kc = _mm(enc, r["c_wk"][li]) + r["c_bk"][li]       # [L1, D]
        qfr = _mm(fr_d, qc)                                # [M, D]
        qfi = _mm(fi_d, qc)
        kfr_e = _mm(tile_frk, kc) * bmaskT                 # [H*M, D] per-head key spectrum
        kfi_e = _mm(tile_fik, kc) * bmaskT
        kfr_b = kfr_e.T                                    # [D, H*M]
        kfi_b = kfi_e.T
        xqk_re = _mm(qfr, kfr_b) - _mm(qfi, kfi_b)         # [M, H*M]  (q_ft * k_ft, no conj)
        xqk_im = _mm(qfr, kfi_b) + _mm(qfi, kfr_b)
        tre, tim = complex_tanh(xqk_re, xqk_im)            # elementwise complex tanh
        xqkv_re = _mm(tre, kfr_e) - _mm(tim, kfi_e)        # [M, D]
        xqkv_im = _mm(tre, kfi_e) + _mm(tim, kfr_e)
        ycr, yci = mode_mix(xqkv_re, xqkv_im, r["c_wwide"][li])
        out_fbt_c = _mm(icrtq, ycr) + _mm(icitq, yci)      # irfft (incl. 1/(D*D) scaling)
        cattn = scramble_out_proj(out_fbt_c, r["sel_d"], r["c_wo"][li], r["c_bo"][li],
                                  L_dec, k_dec)

        # --- decomp2, FFN, decomp3 ---
        x2 = x1 + cattn
        mm2 = _mm(ma_d, x2)
        xs = x2 - mm2
        y = _mm(act(_mm(xs, r["d_w1"][li])), r["d_w2"][li])
        x3 = xs + y
        mm3 = _mm(ma_d, x3)
        x_cur = x3 - mm3

        # --- residual trend + circular k=3 projection (d_model -> c_out) ---
        tsum = mm1 + mm2 + mm3
        rtrend = circ_conv3(tsum, rprev_d, rnext_d,
                            r["t_wp"][li], r["t_wc"][li], r["t_wn"][li])
        trend_total = trend_total + rtrend

    # --- decoder norm + seasonal projection + epilogue (trend + seasonal, slice) ---
    xh = my_layernorm(x_cur, r["d_g"][...], r["d_b"][...])
    seas = _mm(xh, r["proj_w"][...]) + r["proj_b"][...]    # [L_dec, c_out]
    final = trend_total + seas
    o_ref[0] = final[L_dec - pred_len:, :]


# ------------------------------ kernel wrapper -----------------------------
def _const_spec(a):
    zeros = (0,) * a.ndim
    return pl.BlockSpec(tuple(a.shape), lambda b, _z=zeros: _z)


def _batch_spec(a):
    tail = (0,) * (a.ndim - 1)
    return pl.BlockSpec((1,) + tuple(a.shape[1:]), lambda b, _t=tail: (b,) + _t)


def fedformer_forward(kp, history_data, future_data, cfg):
    D = cfg["d_model"]; H = cfg["n_heads"]; E = D // H
    L1 = cfg["seq_len"]
    L_dec = cfg["seq_len"] // 2 + cfg["pred_len"]
    label_len, pred_len = cfg["label_len"], cfg["pred_len"]
    c_out = cfg["c_out"]
    M = len(get_frequency_modes(L1, cfg["modes"], cfg["mode_select"]))

    # data_transformation_4_xformer (tiny slices/concat in XLA)
    x_enc = history_data[..., 0].astype(jnp.float32)           # [B, L1, N]
    x_mark_enc = history_data[:, :, 0, 1:].astype(jnp.float32)
    x_mark_dec = jnp.concatenate(
        [x_mark_enc[:, -label_len:, :], future_data[:, :, 0, 1:].astype(jnp.float32)],
        axis=1)
    B = x_enc.shape[0]

    batch_arrays = {"x_enc": x_enc, "x_mark_enc": x_mark_enc, "x_mark_dec": x_mark_dec}
    names = tuple(batch_arrays.keys()) + tuple(sorted(kp.keys()))

    ins, in_specs = [], []
    for nm in names:
        if nm in batch_arrays:
            a = batch_arrays[nm]
            ins.append(a)
            in_specs.append(_batch_spec(a))
        else:
            a = kp[nm]
            ins.append(a)
            in_specs.append(_const_spec(a))

    kern = functools.partial(
        _fedformer_kernel, names=names, M=M, D=D, E=E, H=H,
        k_enc=D // L1, k_dec=D // L_dec, L1=L1, L_dec=L_dec, pred_len=pred_len,
        n_enc_layers=cfg["e_layers"], n_dec_layers=cfg["d_layers"],
        activation=cfg["activation"])

    bytes_accessed = int(sum(int(np.prod(a.shape)) * 4 for a in ins)
                         + B * pred_len * c_out * 4)
    cost = pl.CostEstimate(flops=int(4e6) * B, transcendentals=1024 * B,
                           bytes_accessed=bytes_accessed)

    out = pl.pallas_call(
        kern,
        grid=(B,),
        out_shape=jax.ShapeDtypeStruct((B, pred_len, c_out), jnp.float32),
        in_specs=in_specs,
        out_specs=pl.BlockSpec((1, pred_len, c_out), lambda b: (b, 0, 0)),
        compiler_params=pltpu.CompilerParams(dimension_semantics=("parallel",)),
        cost_estimate=cost,
    )(*ins)
    return out[..., None]                                   # [B, pred_len, c_out, 1]


# --------------------------- parameter preparation --------------------------
def prepare_kernel_params(params, cfg):
    D = cfg["d_model"]; H = cfg["n_heads"]; E = D // H
    N = cfg["enc_in"]; c_out = cfg["c_out"]
    L1 = cfg["seq_len"]; L_dec = cfg["seq_len"] // 2 + cfg["pred_len"]
    label_len = cfg["label_len"]
    idx_enc = get_frequency_modes(L1, cfg["modes"], cfg["mode_select"])
    idx_dec = get_frequency_modes(L_dec, cfg["modes"], cfg["mode_select"])
    M = len(idx_enc)
    assert len(idx_dec) == M, "shared mode-mix constants assume equal mode counts"
    assert D % L1 == 0 and D % L_dec == 0, "view-scramble fold assumes L | d_model"

    fr_e, fi_e, icrt_e, icit_e = _dft_matrices(L1, idx_enc)
    fr_d, fi_d, icrt_d, icit_d = _dft_matrices(L_dec, idx_dec)
    ma_e = _moving_avg_matrix(L1, cfg["moving_avg"])
    ma_d = _moving_avg_matrix(L_dec, cfg["moving_avg"])
    seas_init, trend_init = _decomp_init_mats(L1, L_dec, label_len, ma_e)
    modemask, sumblk2 = _mode_mix_consts(M, D)
    tile_frk, tile_fik, bmaskT = _cross_key_consts(fr_e, fi_e, H, E, M)

    consts = {}

    def put(name, arr):
        consts[name] = jnp.asarray(np.asarray(arr), jnp.float32)

    put("rprev_e", _circ_shift_matrix(L1, -1)); put("rnext_e", _circ_shift_matrix(L1, +1))
    put("rprev_d", _circ_shift_matrix(L_dec, -1)); put("rnext_d", _circ_shift_matrix(L_dec, +1))
    put("sea_e", np.eye(L1, dtype=np.float32) - ma_e)
    put("ma_d", ma_d)
    put("fr_e", fr_e); put("fi_e", fi_e); put("icrt_e", icrt_e); put("icit_e", icit_e)
    put("fr_d", fr_d); put("fi_d", fi_d); put("icrt_d", icrt_d); put("icit_d", icit_d)
    put("sel_e", _sel_matrix(L1, D)); put("sel_d", _sel_matrix(L_dec, D))
    put("modemask", modemask); put("sumblk2", sumblk2)
    put("seas_init", seas_init); put("trend_init", trend_init)
    put("tile_frk", tile_frk); put("tile_fik", tile_fik); put("bmaskT", bmaskT)
    put("icrtq", icrt_d / float(D * D)); put("icitq", icit_d / float(D * D))

    def taps(w3, n_in):
        w3 = np.asarray(w3, np.float32)
        return w3[:n_in], w3[n_in:2 * n_in], w3[2 * n_in:]

    e_wp, e_wc, e_wn = taps(params["enc_emb"]["conv_w3"], N)
    put("e_wp", e_wp); put("e_wc", e_wc); put("e_wn", e_wn)
    put("e_wt", params["enc_emb"]["time_w"])
    d_wp, d_wc, d_wn = taps(params["dec_emb"]["conv_w3"], cfg["dec_in"])
    put("d_wp", d_wp); put("d_wc", d_wc); put("d_wn", d_wn)
    put("d_wt", params["dec_emb"]["time_w"])

    def stack(seq):
        return np.stack([np.asarray(s, np.float32) for s in seq], axis=0)

    enc = params["enc_layers"]
    put("enc_wq", stack([lp["attn"]["q_w"] for lp in enc]))
    put("enc_bq", stack([np.asarray(lp["attn"]["q_b"]).reshape(1, D) for lp in enc]))
    put("enc_wwide", stack([_wide_fourier_weights(lp["attn"]["fourier_w"], H, E) for lp in enc]))
    put("enc_wo", stack([lp["attn"]["o_w"] for lp in enc]))
    put("enc_bo", stack([np.asarray(lp["attn"]["o_b"]).reshape(1, D) for lp in enc]))
    put("enc_w1", stack([lp["ffn_w1"] for lp in enc]))
    put("enc_w2", stack([lp["ffn_w2"] for lp in enc]))
    put("enc_g", np.asarray(params["enc_norm"]["g"], np.float32).reshape(1, D))
    put("enc_b", np.asarray(params["enc_norm"]["b"], np.float32).reshape(1, D))

    dec = params["dec_layers"]
    put("ds_wq", stack([lp["self_attn"]["q_w"] for lp in dec]))
    put("ds_bq", stack([np.asarray(lp["self_attn"]["q_b"]).reshape(1, D) for lp in dec]))
    put("ds_wwide", stack([_wide_fourier_weights(lp["self_attn"]["fourier_w"], H, E) for lp in dec]))
    put("ds_wo", stack([lp["self_attn"]["o_w"] for lp in dec]))
    put("ds_bo", stack([np.asarray(lp["self_attn"]["o_b"]).reshape(1, D) for lp in dec]))
    put("c_wq", stack([lp["cross_attn"]["q_w"] for lp in dec]))
    put("c_bq", stack([np.asarray(lp["cross_attn"]["q_b"]).reshape(1, D) for lp in dec]))
    put("c_wk", stack([lp["cross_attn"]["k_w"] for lp in dec]))
    put("c_bk", stack([np.asarray(lp["cross_attn"]["k_b"]).reshape(1, D) for lp in dec]))
    put("c_wwide", stack([_wide_fourier_weights(lp["cross_attn"]["fourier_w"], H, E) for lp in dec]))
    put("c_wo", stack([lp["cross_attn"]["o_w"] for lp in dec]))
    put("c_bo", stack([np.asarray(lp["cross_attn"]["o_b"]).reshape(1, D) for lp in dec]))
    put("d_w1", stack([lp["ffn_w1"] for lp in dec]))
    put("d_w2", stack([lp["ffn_w2"] for lp in dec]))
    put("t_wp", stack([np.asarray(lp["trend_w3"], np.float32)[:D] for lp in dec]))
    put("t_wc", stack([np.asarray(lp["trend_w3"], np.float32)[D:2 * D] for lp in dec]))
    put("t_wn", stack([np.asarray(lp["trend_w3"], np.float32)[2 * D:] for lp in dec]))
    put("d_g", np.asarray(params["dec_norm"]["g"], np.float32).reshape(1, D))
    put("d_b", np.asarray(params["dec_norm"]["b"], np.float32).reshape(1, D))
    put("proj_w", params["dec_proj"]["w"])
    put("proj_b", np.asarray(params["dec_proj"]["b"], np.float32).reshape(1, c_out))
    return consts


# ------------------------------ parameter init ------------------------------
def _uniform(key, shape, scale=0.05):
    return jax.random.uniform(key, shape, jnp.float32, -scale, scale)


def _complex_uniform(key, shape, scale):
    kr, ki = jax.random.split(key)
    re = scale * jax.random.uniform(kr, shape, jnp.float32)
    im = scale * jax.random.uniform(ki, shape, jnp.float32)
    return jax.lax.complex(re, im)


def _init_attn_proj(key, d_model, n_heads, n_modes):
    ks = jax.random.split(key, 9)
    E = d_model // n_heads
    return dict(
        q_w=_uniform(ks[0], (d_model, d_model)), q_b=_uniform(ks[1], (d_model,)),
        k_w=_uniform(ks[2], (d_model, d_model)), k_b=_uniform(ks[3], (d_model,)),
        v_w=_uniform(ks[4], (d_model, d_model)), v_b=_uniform(ks[5], (d_model,)),
        o_w=_uniform(ks[6], (d_model, d_model)), o_b=_uniform(ks[7], (d_model,)),
        fourier_w=_complex_uniform(ks[8], (n_heads, E, E, n_modes),
                                   1.0 / (d_model * d_model)),
    )


def init_params(key, cfg):
    d_model, d_ff, H = cfg["d_model"], cfg["d_ff"], cfg["n_heads"]
    assert d_model % 8 == 0 and H == 8, "FourierBlock hard-codes 8 heads"
    modes_enc = len(get_frequency_modes(cfg["seq_len"], cfg["modes"], cfg["mode_select"]))
    dec_len = cfg["seq_len"] // 2 + cfg["pred_len"]
    modes_dec = len(get_frequency_modes(dec_len, cfg["modes"], cfg["mode_select"]))
    modes_q = len(get_frequency_modes(dec_len, cfg["modes"], cfg["mode_select"]))

    keys = iter(jax.random.split(key, 64))
    params = {}
    params["enc_emb"] = dict(
        conv_w3=_uniform(next(keys), (3 * cfg["enc_in"], d_model)),
        time_w=_uniform(next(keys), (cfg["num_time_features"], d_model)),
    )
    params["dec_emb"] = dict(
        conv_w3=_uniform(next(keys), (3 * cfg["dec_in"], d_model)),
        time_w=_uniform(next(keys), (cfg["num_time_features"], d_model)),
    )
    params["enc_layers"] = []
    for _ in range(cfg["e_layers"]):
        params["enc_layers"].append(dict(
            attn=_init_attn_proj(next(keys), d_model, H, modes_enc),
            ffn_w1=_uniform(next(keys), (d_model, d_ff)),
            ffn_w2=_uniform(next(keys), (d_ff, d_model)),
        ))
    params["enc_norm"] = dict(g=jnp.ones((d_model,), jnp.float32),
                              b=jnp.zeros((d_model,), jnp.float32))
    params["dec_layers"] = []
    for _ in range(cfg["d_layers"]):
        params["dec_layers"].append(dict(
            self_attn=_init_attn_proj(next(keys), d_model, H, modes_dec),
            cross_attn=_init_attn_proj(next(keys), d_model, H, modes_q),
            ffn_w1=_uniform(next(keys), (d_model, d_ff)),
            ffn_w2=_uniform(next(keys), (d_ff, d_model)),
            trend_w3=_uniform(next(keys), (3 * d_model, cfg["c_out"])),
        ))
    params["dec_norm"] = dict(g=jnp.ones((d_model,), jnp.float32),
                              b=jnp.zeros((d_model,), jnp.float32))
    params["dec_proj"] = dict(w=_uniform(next(keys), (d_model, cfg["c_out"])),
                              b=_uniform(next(keys), (cfg["c_out"],)))
    return params


# ---------------------------------- main ------------------------------------
if __name__ == "__main__":
    key = jax.random.PRNGKey(0)
    k_param, k_hist, k_fut = jax.random.split(key, 3)

    B = 2
    L1, L2 = CFG["seq_len"], CFG["pred_len"]
    N, C = CFG["enc_in"], 1 + CFG["num_time_features"]

    history_data = jax.random.normal(k_hist, (B, L1, N, C), dtype=jnp.float32)
    future_data = jax.random.normal(k_fut, (B, L2, N, C), dtype=jnp.float32)

    params = init_params(k_param, CFG)
    kparams = prepare_kernel_params(params, CFG)     # host-side, once

    fwd = jax.jit(functools.partial(fedformer_forward, cfg=CFG))
    out = fwd(kparams, history_data, future_data)
    out = jax.block_until_ready(out)

    assert out.shape == (B, CFG["pred_len"], CFG["c_out"], 1), out.shape
    assert bool(jnp.all(jnp.isfinite(out)))
    print("KERNEL_OK")
</pallas_src>

<mosaic_0001>
module attributes {stable_mosaic.version = 11 : i64} {
  func.func @_fedformer_kernel(%arg0: i32, %arg1: memref<1x16x4xf32, #tpu.memory_space<vmem>>, %arg2: memref<1x16x3xf32, #tpu.memory_space<vmem>>, %arg3: memref<1x16x3xf32, #tpu.memory_space<vmem>>, %arg4: memref<32x32xf32, #tpu.memory_space<vmem>>, %arg5: memref<1x1x32xf32, #tpu.memory_space<vmem>>, %arg6: memref<1x1x32xf32, #tpu.memory_space<vmem>>, %arg7: memref<1x1x32xf32, #tpu.memory_space<vmem>>, %arg8: memref<1x32x32xf32, #tpu.memory_space<vmem>>, %arg9: memref<1x32x32xf32, #tpu.memory_space<vmem>>, %arg10: memref<1x32x32xf32, #tpu.memory_space<vmem>>, %arg11: memref<1x32x256xf32, #tpu.memory_space<vmem>>, %arg12: memref<1x32xf32, #tpu.memory_space<vmem>>, %arg13: memref<1x32xf32, #tpu.memory_space<vmem>>, %arg14: memref<1x32x64xf32, #tpu.memory_space<vmem>>, %arg15: memref<1x64x32xf32, #tpu.memory_space<vmem>>, %arg16: memref<4x32xf32, #tpu.memory_space<vmem>>, %arg17: memref<4x32xf32, #tpu.memory_space<vmem>>, %arg18: memref<4x32xf32, #tpu.memory_space<vmem>>, %arg19: memref<3x32xf32, #tpu.memory_space<vmem>>, %arg20: memref<1x1x32xf32, #tpu.memory_space<vmem>>, %arg21: memref<1x1x32xf32, #tpu.memory_space<vmem>>, %arg22: memref<1x32x32xf32, #tpu.memory_space<vmem>>, %arg23: memref<1x32x32xf32, #tpu.memory_space<vmem>>, %arg24: memref<1x32x256xf32, #tpu.memory_space<vmem>>, %arg25: memref<4x32xf32, #tpu.memory_space<vmem>>, %arg26: memref<4x32xf32, #tpu.memory_space<vmem>>, %arg27: memref<4x32xf32, #tpu.memory_space<vmem>>, %arg28: memref<3x32xf32, #tpu.memory_space<vmem>>, %arg29: memref<1x32xf32, #tpu.memory_space<vmem>>, %arg30: memref<2x1x32xf32, #tpu.memory_space<vmem>>, %arg31: memref<2x1x32xf32, #tpu.memory_space<vmem>>, %arg32: memref<1x32xf32, #tpu.memory_space<vmem>>, %arg33: memref<2x32x64xf32, #tpu.memory_space<vmem>>, %arg34: memref<2x64x32xf32, #tpu.memory_space<vmem>>, %arg35: memref<2x32x32xf32, #tpu.memory_space<vmem>>, %arg36: memref<2x32x32xf32, #tpu.memory_space<vmem>>, %arg37: memref<2x32x256xf32, #tpu.memory_space<vmem>>, %arg38: memref<4x16xf32, #tpu.memory_space<vmem>>, %arg39: memref<4x16xf32, #tpu.memory_space<vmem>>, %arg40: memref<4x16xf32, #tpu.memory_space<vmem>>, %arg41: memref<4x16xf32, #tpu.memory_space<vmem>>, %arg42: memref<16x4xf32, #tpu.memory_space<vmem>>, %arg43: memref<16x4xf32, #tpu.memory_space<vmem>>, %arg44: memref<16x4xf32, #tpu.memory_space<vmem>>, %arg45: memref<16x4xf32, #tpu.memory_space<vmem>>, %arg46: memref<16x4xf32, #tpu.memory_space<vmem>>, %arg47: memref<16x4xf32, #tpu.memory_space<vmem>>, %arg48: memref<16x16xf32, #tpu.memory_space<vmem>>, %arg49: memref<4x256xf32, #tpu.memory_space<vmem>>, %arg50: memref<1x4xf32, #tpu.memory_space<vmem>>, %arg51: memref<32x4xf32, #tpu.memory_space<vmem>>, %arg52: memref<16x16xf32, #tpu.memory_space<vmem>>, %arg53: memref<16x16xf32, #tpu.memory_space<vmem>>, %arg54: memref<16x16xf32, #tpu.memory_space<vmem>>, %arg55: memref<16x16xf32, #tpu.memory_space<vmem>>, %arg56: memref<16x16xf32, #tpu.memory_space<vmem>>, %arg57: memref<16x16xf32, #tpu.memory_space<vmem>>, %arg58: memref<2x16x32xf32, #tpu.memory_space<vmem>>, %arg59: memref<2x16x32xf32, #tpu.memory_space<vmem>>, %arg60: memref<256x64xf32, #tpu.memory_space<vmem>>, %arg61: memref<1x32x4xf32, #tpu.memory_space<vmem>>, %arg62: memref<1x32x4xf32, #tpu.memory_space<vmem>>, %arg63: memref<1x32x4xf32, #tpu.memory_space<vmem>>, %arg64: memref<32x16xf32, #tpu.memory_space<vmem>>, %arg65: memref<32x16xf32, #tpu.memory_space<vmem>>, %arg66: memref<16x16xf32, #tpu.memory_space<vmem>>, %arg67: memref<1x8x4xf32, #tpu.memory_space<vmem>>) attributes {dimension_semantics = [#tpu.dimension_semantics<parallel>], iteration_bounds = array<i64: 2>, scalar_prefetch = 0 : i64, scratch_operands = 0 : i64, tpu.core_type = #tpu.core_type<tc>, window_params = [{transform_indices = @transform_0, window_bounds = array<i64: 1, 16, 4>}, {transform_indices = @transform_1, window_bounds = array<i64: 1, 16, 3>}, {transform_indices = @transform_2, window_bounds = array<i64: 1, 16, 3>}, {pipeline_mode = #tpu.pipeline_mode<synchronous>, transform_indices = @transform_3, window_bounds = array<i64: 32, 32>}, {pipeline_mode = #tpu.pipeline_mode<synchronous>, transform_indices = @transform_4, window_bounds = array<i64: 1, 1, 32>}, {pipeline_mode = #tpu.pipeline_mode<synchronous>, transform_indices = @transform_5, window_bounds = array<i64: 1, 1, 32>}, {pipeline_mode = #tpu.pipeline_mode<synchronous>, transform_indices = @transform_6, window_bounds = array<i64: 1, 1, 32>}, {pipeline_mode = #tpu.pipeline_mode<synchronous>, transform_indices = @transform_7, window_bounds = array<i64: 1, 32, 32>}, {pipeline_mode = #tpu.pipeline_mode<synchronous>, transform_indices = @transform_8, window_bounds = array<i64: 1, 32, 32>}, {pipeline_mode = #tpu.pipeline_mode<synchronous>, transform_indices = @transform_9, window_bounds = array<i64: 1, 32, 32>}, {pipeline_mode = #tpu.pipeline_mode<synchronous>, transform_indices = @transform_10, window_bounds = array<i64: 1, 32, 256>}, {pipeline_mode = #tpu.pipeline_mode<synchronous>, transform_indices = @transform_11, window_bounds = array<i64: 1, 32>}, {pipeline_mode = #tpu.pipeline_mode<synchronous>, transform_indices = @transform_12, window_bounds = array<i64: 1, 32>}, {pipeline_mode = #tpu.pipeline_mode<synchronous>, transform_indices = @transform_13, window_bounds = array<i64: 1, 32, 64>}, {pipeline_mode = #tpu.pipeline_mode<synchronous>, transform_indices = @transform_14, window_bounds = array<i64: 1, 64, 32>}, {pipeline_mode = #tpu.pipeline_mode<synchronous>, transform_indices = @transform_15, window_bounds = array<i64: 4, 32>}, {pipeline_mode = #tpu.pipeline_mode<synchronous>, transform_indices = @transform_16, window_bounds = array<i64: 4, 32>}, {pipeline_mode = #tpu.pipeline_mode<synchronous>, transform_indices = @transform_17, window_bounds = array<i64: 4, 32>}, {pipeline_mode = #tpu.pipeline_mode<synchronous>, transform_indices = @transform_18, window_bounds = array<i64: 3, 32>}, {pipeline_mode = #tpu.pipeline_mode<synchronous>, transform_indices = @transform_19, window_bounds = array<i64: 1, 1, 32>}, {pipeline_mode = #tpu.pipeline_mode<synchronous>, transform_indices = @transform_20, window_bounds = array<i64: 1, 1, 32>}, {pipeline_mode = #tpu.pipeline_mode<synchronous>, transform_indices = @transform_21, window_bounds = array<i64: 1, 32, 32>}, {pipeline_mode = #tpu.pipeline_mode<synchronous>, transform_indices = @transform_22, window_bounds = array<i64: 1, 32, 32>}, {pipeline_mode = #tpu.pipeline_mode<synchronous>, transform_indices = @transform_23, window_bounds = array<i64: 1, 32, 256>}, {pipeline_mode = #tpu.pipeline_mode<synchronous>, transform_indices = @transform_24, window_bounds = array<i64: 4, 32>}, {pipeline_mode = #tpu.pipeline_mode<synchronous>, transform_indices = @transform_25, window_bounds = array<i64: 4, 32>}, {pipeline_mode = #tpu.pipeline_mode<synchronous>, transform_indices = @transform_26, window_bounds = array<i64: 4, 32>}, {pipeline_mode = #tpu.pipeline_mode<synchronous>, transform_indices = @transform_27, window_bounds = array<i64: 3, 32>}, {pipeline_mode = #tpu.pipeline_mode<synchronous>, transform_indices = @transform_28, window_bounds = array<i64: 1, 32>}, {pipeline_mode = #tpu.pipeline_mode<synchronous>, transform_indices = @transform_29, window_bounds = array<i64: 2, 1, 32>}, {pipeline_mode = #tpu.pipeline_mode<synchronous>, transform_indices = @transform_30, window_bounds = array<i64: 2, 1, 32>}, {pipeline_mode = #tpu.pipeline_mode<synchronous>, transform_indices = @transform_31, window_bounds = array<i64: 1, 32>}, {pipeline_mode = #tpu.pipeline_mode<synchronous>, transform_indices = @transform_32, window_bounds = array<i64: 2, 32, 64>}, {pipeline_mode = #tpu.pipeline_mode<synchronous>, transform_indices = @transform_33, window_bounds = array<i64: 2, 64, 32>}, {pipeline_mode = #tpu.pipeline_mode<synchronous>, transform_indices = @transform_34, window_bounds = array<i64: 2, 32, 32>}, {pipeline_mode = #tpu.pipeline_mode<synchronous>, transform_indices = @transform_35, window_bounds = array<i64: 2, 32, 32>}, {pipeline_mode = #tpu.pipeline_mode<synchronous>, transform_indices = @transform_36, window_bounds = array<i64: 2, 32, 256>}, {pipeline_mode = #tpu.pipeline_mode<synchronous>, transform_indices = @transform_37, window_bounds = array<i64: 4, 16>}, {pipeline_mode = #tpu.pipeline_mode<synchronous>, transform_indices = @transform_38, window_bounds = array<i64: 4, 16>}, {pipeline_mode = #tpu.pipeline_mode<synchronous>, transform_indices = @transform_39, window_bounds = array<i64: 4, 16>}, {pipeline_mode = #tpu.pipeline_mode<synchronous>, transform_indices = @transform_40, window_bounds = array<i64: 4, 16>}, {pipeline_mode = #tpu.pipeline_mode<synchronous>, transform_indices = @transform_41, window_bounds = array<i64: 16, 4>}, {pipeline_mode = #tpu.pipeline_mode<synchronous>, transform_indices = @transform_42, window_bounds = array<i64: 16, 4>}, {pipeline_mode = #tpu.pipeline_mode<synchronous>, transform_indices = @transform_43, window_bounds = array<i64: 16, 4>}, {pipeline_mode = #tpu.pipeline_mode<synchronous>, transform_indices = @transform_44, window_bounds = array<i64: 16, 4>}, {pipeline_mode = #tpu.pipeline_mode<synchronous>, transform_indices = @transform_45, window_bounds = array<i64: 16, 4>}, {pipeline_mode = #tpu.pipeline_mode<synchronous>, transform_indices = @transform_46, window_bounds = array<i64: 16, 4>}, {pipeline_mode = #tpu.pipeline_mode<synchronous>, transform_indices = @transform_47, window_bounds = array<i64: 16, 16>}, {pipeline_mode = #tpu.pipeline_mode<synchronous>, transform_indices = @transform_48, window_bounds = array<i64: 4, 256>}, {pipeline_mode = #tpu.pipeline_mode<synchronous>, transform_indices = @transform_49, window_bounds = array<i64: 1, 4>}, {pipeline_mode = #tpu.pipeline_mode<synchronous>, transform_indices = @transform_50, window_bounds = array<i64: 32, 4>}, {pipeline_mode = #tpu.pipeline_mode<synchronous>, transform_indices = @transform_51, window_bounds = array<i64: 16, 16>}, {pipeline_mode = #tpu.pipeline_mode<synchronous>, transform_indices = @transform_52, window_bounds = array<i64: 16, 16>}, {pipeline_mode = #tpu.pipeline_mode<synchronous>, transform_indices = @transform_53, window_bounds = array<i64: 16, 16>}, {pipeline_mode = #tpu.pipeline_mode<synchronous>, transform_indices = @transform_54, window_bounds = array<i64: 16, 16>}, {pipeline_mode = #tpu.pipeline_mode<synchronous>, transform_indices = @transform_55, window_bounds = array<i64: 16, 16>}, {pipeline_mode = #tpu.pipeline_mode<synchronous>, transform_indices = @transform_56, window_bounds = array<i64: 16, 16>}, {pipeline_mode = #tpu.pipeline_mode<synchronous>, transform_indices = @transform_57, window_bounds = array<i64: 2, 16, 32>}, {pipeline_mode = #tpu.pipeline_mode<synchronous>, transform_indices = @transform_58, window_bounds = array<i64: 2, 16, 32>}, {pipeline_mode = #tpu.pipeline_mode<synchronous>, transform_indices = @transform_59, window_bounds = array<i64: 256, 64>}, {pipeline_mode = #tpu.pipeline_mode<synchronous>, transform_indices = @transform_60, window_bounds = array<i64: 1, 32, 4>}, {pipeline_mode = #tpu.pipeline_mode<synchronous>, transform_indices = @transform_61, window_bounds = array<i64: 1, 32, 4>}, {pipeline_mode = #tpu.pipeline_mode<synchronous>, transform_indices = @transform_62, window_bounds = array<i64: 1, 32, 4>}, {pipeline_mode = #tpu.pipeline_mode<synchronous>, transform_indices = @transform_63, window_bounds = array<i64: 32, 16>}, {pipeline_mode = #tpu.pipeline_mode<synchronous>, transform_indices = @transform_64, window_bounds = array<i64: 32, 16>}, {pipeline_mode = #tpu.pipeline_mode<synchronous>, transform_indices = @transform_65, window_bounds = array<i64: 16, 16>}, {transform_indices = @transform_66, window_bounds = array<i64: 1, 8, 4>}]} {
    %c0 = arith.constant 0 : index
    %c0_0 = arith.constant 0 : index
    %0 = vector.load %arg49[%c0, %c0_0] : memref<4x256xf32, #tpu.memory_space<vmem>>, vector<4x256xf32>
    %c0_1 = arith.constant 0 : index
    %c0_2 = arith.constant 0 : index
    %1 = vector.load %arg60[%c0_1, %c0_2] : memref<256x64xf32, #tpu.memory_space<vmem>>, vector<256x64xf32>
    %c0_3 = arith.constant 0 : index
    %c0_4 = arith.constant 0 : index
    %c0_5 = arith.constant 0 : index
    %2 = vector.load %arg1[%c0_3, %c0_4, %c0_5] : memref<1x16x4xf32, #tpu.memory_space<vmem>>, vector<1x16x4xf32>
    %3 = vector.shape_cast %2 : vector<1x16x4xf32> to vector<16x4xf32>
    %c0_6 = arith.constant 0 : index
    %c0_7 = arith.constant 0 : index
    %4 = vector.load %arg55[%c0_6, %c0_7] : memref<16x16xf32, #tpu.memory_space<vmem>>, vector<16x16xf32>
    %c0_8 = arith.constant 0 : index
    %c0_9 = arith.constant 0 : index
    %5 = vector.load %arg53[%c0_8, %c0_9] : memref<16x16xf32, #tpu.memory_space<vmem>>, vector<16x16xf32>
    %c0_10 = arith.constant 0 : index
    %c0_11 = arith.constant 0 : index
    %6 = vector.load %arg27[%c0_10, %c0_11] : memref<4x32xf32, #tpu.memory_space<vmem>>, vector<4x32xf32>
    %c0_12 = arith.constant 0 : index
    %c0_13 = arith.constant 0 : index
    %7 = vector.load %arg25[%c0_12, %c0_13] : memref<4x32xf32, #tpu.memory_space<vmem>>, vector<4x32xf32>
    %c0_14 = arith.constant 0 : index
    %c0_15 = arith.constant 0 : index
    %8 = vector.load %arg26[%c0_14, %c0_15] : memref<4x32xf32, #tpu.memory_space<vmem>>, vector<4x32xf32>
    %cst = arith.constant dense<0.000000e+00> : vector<16x4xf32>
    %9 = tpu.matmul %4, %3, %cst {dimension_numbers = #tpu.dot_dimension_numbers<[1], [0], [0], [1], [0, 0, 1, 1], [], []>} : vector<16x16xf32>, vector<16x4xf32>, vector<16x4xf32> -> vector<16x4xf32>
    %cst_16 = arith.constant dense<0.000000e+00> : vector<16x32xf32>
    %10 = tpu.matmul %9, %6, %cst_16 {dimension_numbers = #tpu.dot_dimension_numbers<[1], [0], [0], [1], [0, 0, 1, 1], [], []>} : vector<16x4xf32>, vector<4x32xf32>, vector<16x32xf32> -> vector<16x32xf32>
    %cst_17 = arith.constant dense<0.000000e+00> : vector<16x32xf32>
    %11 = tpu.matmul %3, %7, %cst_17 {dimension_numbers = #tpu.dot_dimension_numbers<[1], [0], [0], [1], [0, 0, 1, 1], [], []>} : vector<16x4xf32>, vector<4x32xf32>, vector<16x32xf32> -> vector<16x32xf32>
    %12 = arith.addf %10, %11 : vector<16x32xf32>
    %cst_18 = arith.constant dense<0.000000e+00> : vector<16x4xf32>
    %13 = tpu.matmul %5, %3, %cst_18 {dimension_numbers = #tpu.dot_dimension_numbers<[1], [0], [0], [1], [0, 0, 1, 1], [], []>} : vector<16x16xf32>, vector<16x4xf32>, vector<16x4xf32> -> vector<16x4xf32>
    %cst_19 = arith.constant dense<0.000000e+00> : vector<16x32xf32>
    %14 = tpu.matmul %13, %8, %cst_19 {dimension_numbers = #tpu.dot_dimension_numbers<[1], [0], [0], [1], [0, 0, 1, 1], [], []>} : vector<16x4xf32>, vector<4x32xf32>, vector<16x32xf32> -> vector<16x32xf32>
    %15 = arith.addf %12, %14 : vector<16x32xf32>
    %c0_20 = arith.constant 0 : index
    %c0_21 = arith.constant 0 : index
    %c0_22 = arith.constant 0 : index
    %16 = vector.load %arg2[%c0_20, %c0_21, %c0_22] : memref<1x16x3xf32, #tpu.memory_space<vmem>>, vector<1x16x3xf32>
    %17 = vector.shape_cast %16 : vector<1x16x3xf32> to vector<16x3xf32>
    %c0_23 = arith.constant 0 : index
    %c0_24 = arith.constant 0 : index
    %18 = vector.load %arg28[%c0_23, %c0_24] : memref<3x32xf32, #tpu.memory_space<vmem>>, vector<3x32xf32>
    %cst_25 = arith.constant dense<0.000000e+00> : vector<16x32xf32>
    %19 = tpu.matmul %17, %18, %cst_25 {dimension_numbers = #tpu.dot_dimension_numbers<[1], [0], [0], [1], [0, 0, 1, 1], [], []>} : vector<16x3xf32>, vector<3x32xf32>, vector<16x32xf32> -> vector<16x32xf32>
    %20 = arith.addf %15, %19 : vector<16x32xf32>
    %c0_26 = arith.constant 0 : index
    %c0_27 = arith.constant 0 : index
    %21 = vector.load %arg56[%c0_26, %c0_27] : memref<16x16xf32, #tpu.memory_space<vmem>>, vector<16x16xf32>
    %c0_28 = arith.constant 0 : index
    %c0_29 = arith.constant 0 : index
    %22 = vector.load %arg41[%c0_28, %c0_29] : memref<4x16xf32, #tpu.memory_space<vmem>>, vector<4x16xf32>
    %c0_30 = arith.constant 0 : index
    %c0_31 = arith.constant 0 : index
    %23 = vector.load %arg39[%c0_30, %c0_31] : memref<4x16xf32, #tpu.memory_space<vmem>>, vector<4x16xf32>
    %c0_32 = arith.constant 0 : index
    %c0_33 = arith.constant 0 : index
    %24 = vector.load %arg46[%c0_32, %c0_33] : memref<16x4xf32, #tpu.memory_space<vmem>>, vector<16x4xf32>
    %c0_34 = arith.constant 0 : index
    %c0_35 = arith.constant 0 : index
    %25 = vector.load %arg43[%c0_34, %c0_35] : memref<16x4xf32, #tpu.memory_space<vmem>>, vector<16x4xf32>
    %c0_36 = arith.constant 0 : index
    %c0_37 = arith.constant 0 : index
    %c0_38 = arith.constant 0 : index
    %26 = vector.load %arg36[%c0_36, %c0_37, %c0_38] : memref<2x32x32xf32, #tpu.memory_space<vmem>>, vector<1x32x32xf32>
    %27 = vector.shape_cast %26 : vector<1x32x32xf32> to vector<32x32xf32>
    %c0_39 = arith.constant 0 : index
    %c0_40 = arith.constant 0 : index
    %c0_41 = arith.constant 0 : index
    %28 = vector.load %arg31[%c0_39, %c0_40, %c0_41] : memref<2x1x32xf32, #tpu.memory_space<vmem>>, vector<1x1x32xf32>
    %29 = vector.shape_cast %28 : vector<1x1x32xf32> to vector<1x32xf32>
    %c0_42 = arith.constant 0 : index
    %c0_43 = arith.constant 0 : index
    %c0_44 = arith.constant 0 : index
    %30 = vector.load %arg37[%c0_42, %c0_43, %c0_44] : memref<2x32x256xf32, #tpu.memory_space<vmem>>, vector<1x32x256xf32>
    %31 = vector.shape_cast %30 : vector<1x32x256xf32> to vector<32x256xf32>
    %c0_45 = arith.constant 0 : index
    %c0_46 = arith.constant 0 : index
    %c0_47 = arith.constant 0 : index
    %32 = vector.load %arg35[%c0_45, %c0_46, %c0_47] : memref<2x32x32xf32, #tpu.memory_space<vmem>>, vector<1x32x32xf32>
    %33 = vector.shape_cast %32 : vector<1x32x32xf32> to vector<32x32xf32>
    %c0_48 = arith.constant 0 : index
    %c0_49 = arith.constant 0 : index
    %c0_50 = arith.constant 0 : index
    %34 = vector.load %arg30[%c0_48, %c0_49, %c0_50] : memref<2x1x32xf32, #tpu.memory_space<vmem>>, vector<1x1x32xf32>
    %35 = vector.shape_cast %34 : vector<1x1x32xf32> to vector<1x32xf32>
    %cst_51 = arith.constant dense<0.000000e+00> : vector<16x32xf32>
    %36 = tpu.matmul %20, %27, %cst_51 {dimension_numbers = #tpu.dot_dimension_numbers<[1], [0], [0], [1], [0, 0, 1, 1], [], []>} : vector<16x32xf32>, vector<32x32xf32>, vector<16x32xf32> -> vector<16x32xf32>
    %37 = vector.broadcast %29 : vector<1x32xf32> to vector<16x32xf32>
    %38 = arith.addf %36, %37 : vector<16x32xf32>
    %cst_52 = arith.constant dense<0.000000e+00> : vector<4x32xf32>
    %39 = tpu.matmul %22, %38, %cst_52 {dimension_numbers = #tpu.dot_dimension_numbers<[1], [0], [0], [1], [0, 0, 1, 1], [], []>} : vector<4x16xf32>, vector<16x32xf32>, vector<4x32xf32> -> vector<4x32xf32>
    %cst_53 = arith.constant dense<0.000000e+00> : vector<4x32xf32>
    %40 = tpu.matmul %23, %38, %cst_53 {dimension_numbers = #tpu.dot_dimension_numbers<[1], [0], [0], [1], [0, 0, 1, 1], [], []>} : vector<4x16xf32>, vector<16x32xf32>, vector<4x32xf32> -> vector<4x32xf32>
    %cst_54 = arith.constant dense<0.000000e+00> : vector<4x256xf32>
    %41 = tpu.matmul %39, %31, %cst_54 {dimension_numbers = #tpu.dot_dimension_numbers<[1], [0], [0], [1], [0, 0, 1, 1], [], []>} : vector<4x32xf32>, vector<32x256xf32>, vector<4x256xf32> -> vector<4x256xf32>
    %42 = arith.mulf %41, %0 : vector<4x256xf32>
    %cst_55 = arith.constant dense<0.000000e+00> : vector<4x64xf32>
    %43 = tpu.matmul %42, %1, %cst_55 {dimension_numbers = #tpu.dot_dimension_numbers<[1], [0], [0], [1], [0, 0, 1, 1], [], []>} : vector<4x256xf32>, vector<256x64xf32>, vector<4x64xf32> -> vector<4x64xf32>
    %cst_56 = arith.constant dense<0.000000e+00> : vector<4x256xf32>
    %44 = tpu.matmul %40, %31, %cst_56 {dimension_numbers = #tpu.dot_dimension_numbers<[1], [0], [0], [1], [0, 0, 1, 1], [], []>} : vector<4x32xf32>, vector<32x256xf32>, vector<4x256xf32> -> vector<4x256xf32>
    %45 = arith.mulf %44, %0 : vector<4x256xf32>
    %cst_57 = arith.constant dense<0.000000e+00> : vector<4x64xf32>
    %46 = tpu.matmul %45, %1, %cst_57 {dimension_numbers = #tpu.dot_dimension_numbers<[1], [0], [0], [1], [0, 0, 1, 1], [], []>} : vector<4x256xf32>, vector<256x64xf32>, vector<4x64xf32> -> vector<4x64xf32>
    %47 = vector.extract_strided_slice %43 {offsets = [0, 0], sizes = [4, 32], strides = [1, 1]} : vector<4x64xf32> to vector<4x32xf32>
    %48 = vector.extract_strided_slice %46 {offsets = [0, 32], sizes = [4, 32], strides = [1, 1]} : vector<4x64xf32> to vector<4x32xf32>
    %49 = arith.subf %47, %48 : vector<4x32xf32>
    %50 = vector.extract_strided_slice %43 {offsets = [0, 32], sizes = [4, 32], strides = [1, 1]} : vector<4x64xf32> to vector<4x32xf32>
    %51 = vector.extract_strided_slice %46 {offsets = [0, 0], sizes = [4, 32], strides = [1, 1]} : vector<4x64xf32> to vector<4x32xf32>
    %52 = arith.addf %50, %51 : vector<4x32xf32>
    %cst_58 = arith.constant dense<0.000000e+00> : vector<16x32xf32>
    %53 = tpu.matmul %24, %49, %cst_58 {dimension_numbers = #tpu.dot_dimension_numbers<[1], [0], [0], [1], [0, 0, 1, 1], [], []>} : vector<16x4xf32>, vector<4x32xf32>, vector<16x32xf32> -> vector<16x32xf32>
    %cst_59 = arith.constant dense<0.000000e+00> : vector<16x32xf32>
    %54 = tpu.matmul %25, %52, %cst_59 {dimension_numbers = #tpu.dot_dimension_numbers<[1], [0], [0], [1], [0, 0, 1, 1], [], []>} : vector<16x4xf32>, vector<4x32xf32>, vector<16x32xf32> -> vector<16x32xf32>
    %55 = arith.addf %53, %54 : vector<16x32xf32>
    %56 = tpu.transpose %55, [1, 0] : vector<16x32xf32> -> vector<32x16xf32>
    %c0_60 = arith.constant 0 : index
    %c0_61 = arith.constant 0 : index
    %c0_62 = arith.constant 0 : index
    %57 = vector.load %arg59[%c0_60, %c0_61, %c0_62] : memref<2x16x32xf32, #tpu.memory_space<vmem>>, vector<1x16x32xf32>
    %58 = vector.shape_cast %57 : vector<1x16x32xf32> to vector<16x32xf32>
    %cst_63 = arith.constant dense<0.000000e+00> : vector<16x16xf32>
    %59 = tpu.matmul %58, %56, %cst_63 {dimension_numbers = #tpu.dot_dimension_numbers<[1], [0], [0], [1], [0, 0, 1, 1], [], []>} : vector<16x32xf32>, vector<32x16xf32>, vector<16x16xf32> -> vector<16x16xf32>
    %60 = vector.extract_strided_slice %33 {offsets = [0, 0], sizes = [16, 32], strides = [1, 1]} : vector<32x32xf32> to vector<16x32xf32>
    %cst_64 = arith.constant dense<0.000000e+00> : vector<16x32xf32>
    %61 = tpu.matmul %59, %60, %cst_64 {dimension_numbers = #tpu.dot_dimension_numbers<[1], [0], [0], [1], [0, 0, 1, 1], [], []>} : vector<16x16xf32>, vector<16x32xf32>, vector<16x32xf32> -> vector<16x32xf32>
    %62 = vector.broadcast %35 : vector<1x32xf32> to vector<16x32xf32>
    %63 = arith.addf %62, %61 : vector<16x32xf32>
    %c1 = arith.constant 1 : index
    %c0_65 = arith.constant 0 : index
    %c0_66 = arith.constant 0 : index
    %64 = vector.load %arg59[%c1, %c0_65, %c0_66] : memref<2x16x32xf32, #tpu.memory_space<vmem>>, vector<1x16x32xf32>
    %65 = vector.shape_cast %64 : vector<1x16x32xf32> to vector<16x32xf32>
    %cst_67 = arith.constant dense<0.000000e+00> : vector<16x16xf32>
    %66 = tpu.matmul %65, %56, %cst_67 {dimension_numbers = #tpu.dot_dimension_numbers<[1], [0], [0], [1], [0, 0, 1, 1], [], []>} : vector<16x32xf32>, vector<32x16xf32>, vector<16x16xf32> -> vector<16x16xf32>
    %67 = vector.extract_strided_slice %33 {offsets = [16, 0], sizes = [16, 32], strides = [1, 1]} : vector<32x32xf32> to vector<16x32xf32>
    %cst_68 = arith.constant dense<0.000000e+00> : vector<16x32xf32>
    %68 = tpu.matmul %66, %67, %cst_68 {dimension_numbers = #tpu.dot_dimension_numbers<[1], [0], [0], [1], [0, 0, 1, 1], [], []>} : vector<16x16xf32>, vector<16x32xf32>, vector<16x32xf32> -> vector<16x32xf32>
    %69 = arith.addf %63, %68 : vector<16x32xf32>
    %70 = arith.addf %20, %69 : vector<16x32xf32>
    %cst_69 = arith.constant dense<0.000000e+00> : vector<16x32xf32>
    %71 = tpu.matmul %21, %70, %cst_69 {dimension_numbers = #tpu.dot_dimension_numbers<[1], [0], [0], [1], [0, 0, 1, 1], [], []>} : vector<16x16xf32>, vector<16x32xf32>, vector<16x32xf32> -> vector<16x32xf32>
    %c0_70 = arith.constant 0 : index
    %c0_71 = arith.constant 0 : index
    %c0_72 = arith.constant 0 : index
    %72 = vector.load %arg33[%c0_70, %c0_71, %c0_72] : memref<2x32x64xf32, #tpu.memory_space<vmem>>, vector<1x32x64xf32>
    %73 = vector.shape_cast %72 : vector<1x32x64xf32> to vector<32x64xf32>
    %cst_73 = arith.constant dense<0.000000e+00> : vector<16x64xf32>
    %74 = tpu.matmul %71, %73, %cst_73 {dimension_numbers = #tpu.dot_dimension_numbers<[1], [0], [0], [1], [0, 0, 1, 1], [], []>} : vector<16x32xf32>, vector<32x64xf32>, vector<16x64xf32> -> vector<16x64xf32>
    %cst_74 = arith.constant 0.000000e+00 : f32
    %75 = vector.broadcast %cst_74 : f32 to vector<16x64xf32>
    %76 = arith.maximumf %74, %75 : vector<16x64xf32>
    %c0_75 = arith.constant 0 : index
    %c0_76 = arith.constant 0 : index
    %c0_77 = arith.constant 0 : index
    %77 = vector.load %arg34[%c0_75, %c0_76, %c0_77] : memref<2x64x32xf32, #tpu.memory_space<vmem>>, vector<1x64x32xf32>
    %78 = vector.shape_cast %77 : vector<1x64x32xf32> to vector<64x32xf32>
    %cst_78 = arith.constant dense<0.000000e+00> : vector<16x32xf32>
    %79 = tpu.matmul %76, %78, %cst_78 {dimension_numbers = #tpu.dot_dimension_numbers<[1], [0], [0], [1], [0, 0, 1, 1], [], []>} : vector<16x64xf32>, vector<64x32xf32>, vector<16x32xf32> -> vector<16x32xf32>
    %80 = arith.addf %71, %79 : vector<16x32xf32>
    %cst_79 = arith.constant dense<0.000000e+00> : vector<16x32xf32>
    %81 = tpu.matmul %21, %80, %cst_79 {dimension_numbers = #tpu.dot_dimension_numbers<[1], [0], [0], [1], [0, 0, 1, 1], [], []>} : vector<16x16xf32>, vector<16x32xf32>, vector<16x32xf32> -> vector<16x32xf32>
    %c1_80 = arith.constant 1 : index
    %c0_81 = arith.constant 0 : index
    %c0_82 = arith.constant 0 : index
    %82 = vector.load %arg36[%c1_80, %c0_81, %c0_82] : memref<2x32x32xf32, #tpu.memory_space<vmem>>, vector<1x32x32xf32>
    %83 = vector.shape_cast %82 : vector<1x32x32xf32> to vector<32x32xf32>
    %c1_83 = arith.constant 1 : index
    %c0_84 = arith.constant 0 : index
    %c0_85 = arith.constant 0 : index
    %84 = vector.load %arg31[%c1_83, %c0_84, %c0_85] : memref<2x1x32xf32, #tpu.memory_space<vmem>>, vector<1x1x32xf32>
    %85 = vector.shape_cast %84 : vector<1x1x32xf32> to vector<1x32xf32>
    %c1_86 = arith.constant 1 : index
    %c0_87 = arith.constant 0 : index
    %c0_88 = arith.constant 0 : index
    %86 = vector.load %arg37[%c1_86, %c0_87, %c0_88] : memref<2x32x256xf32, #tpu.memory_space<vmem>>, vector<1x32x256xf32>
    %87 = vector.shape_cast %86 : vector<1x32x256xf32> to vector<32x256xf32>
    %c1_89 = arith.constant 1 : index
    %c0_90 = arith.constant 0 : index
    %c0_91 = arith.constant 0 : index
    %88 = vector.load %arg35[%c1_89, %c0_90, %c0_91] : memref<2x32x32xf32, #tpu.memory_space<vmem>>, vector<1x32x32xf32>
    %89 = vector.shape_cast %88 : vector<1x32x32xf32> to vector<32x32xf32>
    %c1_92 = arith.constant 1 : index
    %c0_93 = arith.constant 0 : index
    %c0_94 = arith.constant 0 : index
    %90 = vector.load %arg30[%c1_92, %c0_93, %c0_94] : memref<2x1x32xf32, #tpu.memory_space<vmem>>, vector<1x1x32xf32>
    %91 = vector.shape_cast %90 : vector<1x1x32xf32> to vector<1x32xf32>
    %cst_95 = arith.constant dense<0.000000e+00> : vector<16x32xf32>
    %92 = tpu.matmul %81, %83, %cst_95 {dimension_numbers = #tpu.dot_dimension_numbers<[1], [0], [0], [1], [0, 0, 1, 1], [], []>} : vector<16x32xf32>, vector<32x32xf32>, vector<16x32xf32> -> vector<16x32xf32>
    %93 = vector.broadcast %85 : vector<1x32xf32> to vector<16x32xf32>
    %94 = arith.addf %92, %93 : vector<16x32xf32>
    %cst_96 = arith.constant dense<0.000000e+00> : vector<4x32xf32>
    %95 = tpu.matmul %22, %94, %cst_96 {dimension_numbers = #tpu.dot_dimension_numbers<[1], [0], [0], [1], [0, 0, 1, 1], [], []>} : vector<4x16xf32>, vector<16x32xf32>, vector<4x32xf32> -> vector<4x32xf32>
    %cst_97 = arith.constant dense<0.000000e+00> : vector<4x32xf32>
    %96 = tpu.matmul %23, %94, %cst_97 {dimension_numbers = #tpu.dot_dimension_numbers<[1], [0], [0], [1], [0, 0, 1, 1], [], []>} : vector<4x16xf32>, vector<16x32xf32>, vector<4x32xf32> -> vector<4x32xf32>
    %cst_98 = arith.constant dense<0.000000e+00> : vector<4x256xf32>
    %97 = tpu.matmul %95, %87, %cst_98 {dimension_numbers = #tpu.dot_dimension_numbers<[1], [0], [0], [1], [0, 0, 1, 1], [], []>} : vector<4x32xf32>, vector<32x256xf32>, vector<4x256xf32> -> vector<4x256xf32>
    %98 = arith.mulf %97, %0 : vector<4x256xf32>
    %cst_99 = arith.constant dense<0.000000e+00> : vector<4x64xf32>
    %99 = tpu.matmul %98, %1, %cst_99 {dimension_numbers = #tpu.dot_dimension_numbers<[1], [0], [0], [1], [0, 0, 1, 1], [], []>} : vector<4x256xf32>, vector<256x64xf32>, vector<4x64xf32> -> vector<4x64xf32>
    %cst_100 = arith.constant dense<0.000000e+00> : vector<4x256xf32>
    %100 = tpu.matmul %96, %87, %cst_100 {dimension_numbers = #tpu.dot_dimension_numbers<[1], [0], [0], [1], [0, 0, 1, 1], [], []>} : vector<4x32xf32>, vector<32x256xf32>, vector<4x256xf32> -> vector<4x256xf32>
    %101 = arith.mulf %100, %0 : vector<4x256xf32>
    %cst_101 = arith.constant dense<0.000000e+00> : vector<4x64xf32>
    %102 = tpu.matmul %101, %1, %cst_101 {dimension_numbers = #tpu.dot_dimension_numbers<[1], [0], [0], [1], [0, 0, 1, 1], [], []>} : vector<4x256xf32>, vector<256x64xf32>, vector<4x64xf32> -> vector<4x64xf32>
    %103 = vector.extract_strided_slice %99 {offsets = [0, 0], sizes = [4, 32], strides = [1, 1]} : vector<4x64xf32> to vector<4x32xf32>
    %104 = vector.extract_strided_slice %102 {offsets = [0, 32], sizes = [4, 32], strides = [1, 1]} : vector<4x64xf32> to vector<4x32xf32>
    %105 = arith.subf %103, %104 : vector<4x32xf32>
    %106 = vector.extract_strided_slice %99 {offsets = [0, 32], sizes = [4, 32], strides = [1, 1]} : vector<4x64xf32> to vector<4x32xf32>
    %107 = vector.extract_strided_slice %102 {offsets = [0, 0], sizes = [4, 32], strides = [1, 1]} : vector<4x64xf32> to vector<4x32xf32>
    %108 = arith.addf %106, %107 : vector<4x32xf32>
    %cst_102 = arith.constant dense<0.000000e+00> : vector<16x32xf32>
    %109 = tpu.matmul %24, %105, %cst_102 {dimension_numbers = #tpu.dot_dimension_numbers<[1], [0], [0], [1], [0, 0, 1, 1], [], []>} : vector<16x4xf32>, vector<4x32xf32>, vector<16x32xf32> -> vector<16x32xf32>
    %cst_103 = arith.constant dense<0.000000e+00> : vector<16x32xf32>
    %110 = tpu.matmul %25, %108, %cst_103 {dimension_numbers = #tpu.dot_dimension_numbers<[1], [0], [0], [1], [0, 0, 1, 1], [], []>} : vector<16x4xf32>, vector<4x32xf32>, vector<16x32xf32> -> vector<16x32xf32>
    %111 = arith.addf %109, %110 : vector<16x32xf32>
    %112 = tpu.transpose %111, [1, 0] : vector<16x32xf32> -> vector<32x16xf32>
    %c0_104 = arith.constant 0 : index
    %c0_105 = arith.constant 0 : index
    %c0_106 = arith.constant 0 : index
    %113 = vector.load %arg59[%c0_104, %c0_105, %c0_106] : memref<2x16x32xf32, #tpu.memory_space<vmem>>, vector<1x16x32xf32>
    %114 = vector.shape_cast %113 : vector<1x16x32xf32> to vector<16x32xf32>
    %cst_107 = arith.constant dense<0.000000e+00> : vector<16x16xf32>
    %115 = tpu.matmul %114, %112, %cst_107 {dimension_numbers = #tpu.dot_dimension_numbers<[1], [0], [0], [1], [0, 0, 1, 1], [], []>} : vector<16x32xf32>, vector<32x16xf32>, vector<16x16xf32> -> vector<16x16xf32>
    %116 = vector.extract_strided_slice %89 {offsets = [0, 0], sizes = [16, 32], strides = [1, 1]} : vector<32x32xf32> to vector<16x32xf32>
    %cst_108 = arith.constant dense<0.000000e+00> : vector<16x32xf32>
    %117 = tpu.matmul %115, %116, %cst_108 {dimension_numbers = #tpu.dot_dimension_numbers<[1], [0], [0], [1], [0, 0, 1, 1], [], []>} : vector<16x16xf32>, vector<16x32xf32>, vector<16x32xf32> -> vector<16x32xf32>
    %118 = vector.broadcast %91 : vector<1x32xf32> to vector<16x32xf32>
    %119 = arith.addf %118, %117 : vector<16x32xf32>
    %c1_109 = arith.constant 1 : index
    %c0_110 = arith.constant 0 : index
    %c0_111 = arith.constant 0 : index
    %120 = vector.load %arg59[%c1_109, %c0_110, %c0_111] : memref<2x16x32xf32, #tpu.memory_space<vmem>>, vector<1x16x32xf32>
    %121 = vector.shape_cast %120 : vector<1x16x32xf32> to vector<16x32xf32>
    %cst_112 = arith.constant dense<0.000000e+00> : vector<16x16xf32>
    %122 = tpu.matmul %121, %112, %cst_112 {dimension_numbers = #tpu.dot_dimension_numbers<[1], [0], [0], [1], [0, 0, 1, 1], [], []>} : vector<16x32xf32>, vector<32x16xf32>, vector<16x16xf32> -> vector<16x16xf32>
    %123 = vector.extract_strided_slice %89 {offsets = [16, 0], sizes = [16, 32], strides = [1, 1]} : vector<32x32xf32> to vector<16x32xf32>
    %cst_113 = arith.constant dense<0.000000e+00> : vector<16x32xf32>
    %124 = tpu.matmul %122, %123, %cst_113 {dimension_numbers = #tpu.dot_dimension_numbers<[1], [0], [0], [1], [0, 0, 1, 1], [], []>} : vector<16x16xf32>, vector<16x32xf32>, vector<16x32xf32> -> vector<16x32xf32>
    %125 = arith.addf %119, %124 : vector<16x32xf32>
    %126 = arith.addf %81, %125 : vector<16x32xf32>
    %cst_114 = arith.constant dense<0.000000e+00> : vector<16x32xf32>
    %127 = tpu.matmul %21, %126, %cst_114 {dimension_numbers = #tpu.dot_dimension_numbers<[1], [0], [0], [1], [0, 0, 1, 1], [], []>} : vector<16x16xf32>, vector<16x32xf32>, vector<16x32xf32> -> vector<16x32xf32>
    %c1_115 = arith.constant 1 : index
    %c0_116 = arith.constant 0 : index
    %c0_117 = arith.constant 0 : index
    %128 = vector.load %arg33[%c1_115, %c0_116, %c0_117] : memref<2x32x64xf32, #tpu.memory_space<vmem>>, vector<1x32x64xf32>
    %129 = vector.shape_cast %128 : vector<1x32x64xf32> to vector<32x64xf32>
    %cst_118 = arith.constant dense<0.000000e+00> : vector<16x64xf32>
    %130 = tpu.matmul %127, %129, %cst_118 {dimension_numbers = #tpu.dot_dimension_numbers<[1], [0], [0], [1], [0, 0, 1, 1], [], []>} : vector<16x32xf32>, vector<32x64xf32>, vector<16x64xf32> -> vector<16x64xf32>
    %cst_119 = arith.constant 0.000000e+00 : f32
    %131 = vector.broadcast %cst_119 : f32 to vector<16x64xf32>
    %132 = arith.maximumf %130, %131 : vector<16x64xf32>
    %c1_120 = arith.constant 1 : index
    %c0_121 = arith.constant 0 : index
    %c0_122 = arith.constant 0 : index
    %133 = vector.load %arg34[%c1_120, %c0_121, %c0_122] : memref<2x64x32xf32, #tpu.memory_space<vmem>>, vector<1x64x32xf32>
    %134 = vector.shape_cast %133 : vector<1x64x32xf32> to vector<64x32xf32>
    %cst_123 = arith.constant dense<0.000000e+00> : vector<16x32xf32>
    %135 = tpu.matmul %132, %134, %cst_123 {dimension_numbers = #tpu.dot_dimension_numbers<[1], [0], [0], [1], [0, 0, 1, 1], [], []>} : vector<16x64xf32>, vector<64x32xf32>, vector<16x32xf32> -> vector<16x32xf32>
    %136 = arith.addf %127, %135 : vector<16x32xf32>
    %cst_124 = arith.constant dense<0.000000e+00> : vector<16x32xf32>
    %137 = tpu.matmul %21, %136, %cst_124 {dimension_numbers = #tpu.dot_dimension_numbers<[1], [0], [0], [1], [0, 0, 1, 1], [], []>} : vector<16x16xf32>, vector<16x32xf32>, vector<16x32xf32> -> vector<16x32xf32>
    %c0_125 = arith.constant 0 : index
    %c0_126 = arith.constant 0 : index
    %138 = vector.load %arg32[%c0_125, %c0_126] : memref<1x32xf32, #tpu.memory_space<vmem>>, vector<1x32xf32>
    %c0_127 = arith.constant 0 : index
    %c0_128 = arith.constant 0 : index
    %139 = vector.load %arg29[%c0_127, %c0_128] : memref<1x32xf32, #tpu.memory_space<vmem>>, vector<1x32xf32>
    %cst_129 = arith.constant dense<0.000000e+00> : vector<16xf32>
    %140 = vector.multi_reduction <add>, %137, %cst_129 [1] : vector<16x32xf32> to vector<16xf32>
    %141 = vector.shape_cast %140 : vector<16xf32> to vector<16x1xf32>
    %cst_130 = arith.constant 3.200000e+01 : f32
    %142 = vector.broadcast %cst_130 : f32 to vector<16x1xf32>
    %143 = arith.divf %141, %142 : vector<16x1xf32>
    %144 = vector.broadcast %143 : vector<16x1xf32> to vector<16x32xf32>
    %145 = arith.subf %137, %144 : vector<16x32xf32>
    %146 = arith.mulf %145, %145 : vector<16x32xf32>
    %cst_131 = arith.constant dense<0.000000e+00> : vector<16xf32>
    %147 = vector.multi_reduction <add>, %146, %cst_131 [1] : vector<16x32xf32> to vector<16xf32>
    %148 = vector.shape_cast %147 : vector<16xf32> to vector<16x1xf32>
    %cst_132 = arith.constant 3.200000e+01 : f32
    %149 = vector.broadcast %cst_132 : f32 to vector<16x1xf32>
    %150 = arith.divf %148, %149 : vector<16x1xf32>
    %151 = vector.broadcast %143 : vector<16x1xf32> to vector<16x32xf32>
    %152 = arith.subf %137, %151 : vector<16x32xf32>
    %cst_133 = arith.constant 9.99999974E-6 : f32
    %153 = vector.broadcast %cst_133 : f32 to vector<16x1xf32>
    %154 = arith.addf %150, %153 : vector<16x1xf32>
    %155 = math.rsqrt %154 : vector<16x1xf32>
    %156 = vector.broadcast %155 : vector<16x1xf32> to vector<16x32xf32>
    %157 = arith.mulf %152, %156 : vector<16x32xf32>
    %158 = vector.broadcast %138 : vector<1x32xf32> to vector<16x32xf32>
    %159 = arith.mulf %157, %158 : vector<16x32xf32>
    %160 = vector.broadcast %139 : vector<1x32xf32> to vector<16x32xf32>
    %161 = arith.addf %159, %160 : vector<16x32xf32>
    %cst_134 = arith.constant dense<0.000000e+00> : vector<32xf32>
    %162 = vector.multi_reduction <add>, %161, %cst_134 [0] : vector<16x32xf32> to vector<32xf32>
    %163 = vector.shape_cast %162 : vector<32xf32> to vector<1x32xf32>
    %cst_135 = arith.constant 1.600000e+01 : f32
    %164 = vector.broadcast %cst_135 : f32 to vector<1x32xf32>
    %165 = arith.divf %163, %164 : vector<1x32xf32>
    %166 = vector.broadcast %165 : vector<1x32xf32> to vector<16x32xf32>
    %167 = arith.subf %161, %166 : vector<16x32xf32>
    %c0_136 = arith.constant 0 : index
    %c0_137 = arith.constant 0 : index
    %168 = vector.load %arg57[%c0_136, %c0_137] : memref<16x16xf32, #tpu.memory_space<vmem>>, vector<16x16xf32>
    %cst_138 = arith.constant dense<0.000000e+00> : vector<16x4xf32>
    %169 = tpu.matmul %168, %3, %cst_138 {dimension_numbers = #tpu.dot_dimension_numbers<[1], [0], [0], [1], [0, 0, 1, 1], [], []>} : vector<16x16xf32>, vector<16x4xf32>, vector<16x4xf32> -> vector<16x4xf32>
    %c0_139 = arith.constant 0 : index
    %c0_140 = arith.constant 0 : index
    %170 = vector.load %arg66[%c0_139, %c0_140] : memref<16x16xf32, #tpu.memory_space<vmem>>, vector<16x16xf32>
    %cst_141 = arith.constant dense<0.000000e+00> : vector<16x4xf32>
    %171 = tpu.matmul %170, %3, %cst_141 {dimension_numbers = #tpu.dot_dimension_numbers<[1], [0], [0], [1], [0, 0, 1, 1], [], []>} : vector<16x16xf32>, vector<16x4xf32>, vector<16x4xf32> -> vector<16x4xf32>
    %c0_142 = arith.constant 0 : index
    %c0_143 = arith.constant 0 : index
    %172 = vector.load %arg54[%c0_142, %c0_143] : memref<16x16xf32, #tpu.memory_space<vmem>>, vector<16x16xf32>
    %c0_144 = arith.constant 0 : index
    %c0_145 = arith.constant 0 : index
    %173 = vector.load %arg52[%c0_144, %c0_145] : memref<16x16xf32, #tpu.memory_space<vmem>>, vector<16x16xf32>
    %c0_146 = arith.constant 0 : index
    %c0_147 = arith.constant 0 : index
    %174 = vector.load %arg18[%c0_146, %c0_147] : memref<4x32xf32, #tpu.memory_space<vmem>>, vector<4x32xf32>
    %c0_148 = arith.constant 0 : index
    %c0_149 = arith.constant 0 : index
    %175 = vector.load %arg16[%c0_148, %c0_149] : memref<4x32xf32, #tpu.memory_space<vmem>>, vector<4x32xf32>
    %c0_150 = arith.constant 0 : index
    %c0_151 = arith.constant 0 : index
    %176 = vector.load %arg17[%c0_150, %c0_151] : memref<4x32xf32, #tpu.memory_space<vmem>>, vector<4x32xf32>
    %cst_152 = arith.constant dense<0.000000e+00> : vector<16x4xf32>
    %177 = tpu.matmul %172, %169, %cst_152 {dimension_numbers = #tpu.dot_dimension_numbers<[1], [0], [0], [1], [0, 0, 1, 1], [], []>} : vector<16x16xf32>, vector<16x4xf32>, vector<16x4xf32> -> vector<16x4xf32>
    %cst_153 = arith.constant dense<0.000000e+00> : vector<16x32xf32>
    %178 = tpu.matmul %177, %174, %cst_153 {dimension_numbers = #tpu.dot_dimension_numbers<[1], [0], [0], [1], [0, 0, 1, 1], [], []>} : vector<16x4xf32>, vector<4x32xf32>, vector<16x32xf32> -> vector<16x32xf32>
    %cst_154 = arith.constant dense<0.000000e+00> : vector<16x32xf32>
    %179 = tpu.matmul %169, %175, %cst_154 {dimension_numbers = #tpu.dot_dimension_numbers<[1], [0], [0], [1], [0, 0, 1, 1], [], []>} : vector<16x4xf32>, vector<4x32xf32>, vector<16x32xf32> -> vector<16x32xf32>
    %180 = arith.addf %178, %179 : vector<16x32xf32>
    %cst_155 = arith.constant dense<0.000000e+00> : vector<16x4xf32>
    %181 = tpu.matmul %173, %169, %cst_155 {dimension_numbers = #tpu.dot_dimension_numbers<[1], [0], [0], [1], [0, 0, 1, 1], [], []>} : vector<16x16xf32>, vector<16x4xf32>, vector<16x4xf32> -> vector<16x4xf32>
    %cst_156 = arith.constant dense<0.000000e+00> : vector<16x32xf32>
    %182 = tpu.matmul %181, %176, %cst_156 {dimension_numbers = #tpu.dot_dimension_numbers<[1], [0], [0], [1], [0, 0, 1, 1], [], []>} : vector<16x4xf32>, vector<4x32xf32>, vector<16x32xf32> -> vector<16x32xf32>
    %183 = arith.addf %180, %182 : vector<16x32xf32>
    %c0_157 = arith.constant 0 : index
    %c0_158 = arith.constant 0 : index
    %c0_159 = arith.constant 0 : index
    %184 = vector.load %arg3[%c0_157, %c0_158, %c0_159] : memref<1x16x3xf32, #tpu.memory_space<vmem>>, vector<1x16x3xf32>
    %185 = vector.shape_cast %184 : vector<1x16x3xf32> to vector<16x3xf32>
    %c0_160 = arith.constant 0 : index
    %c0_161 = arith.constant 0 : index
    %186 = vector.load %arg19[%c0_160, %c0_161] : memref<3x32xf32, #tpu.memory_space<vmem>>, vector<3x32xf32>
    %cst_162 = arith.constant dense<0.000000e+00> : vector<16x32xf32>
    %187 = tpu.matmul %185, %186, %cst_162 {dimension_numbers = #tpu.dot_dimension_numbers<[1], [0], [0], [1], [0, 0, 1, 1], [], []>} : vector<16x3xf32>, vector<3x32xf32>, vector<16x32xf32> -> vector<16x32xf32>
    %188 = arith.addf %183, %187 : vector<16x32xf32>
    %c0_163 = arith.constant 0 : index
    %c0_164 = arith.constant 0 : index
    %189 = vector.load %arg48[%c0_163, %c0_164] : memref<16x16xf32, #tpu.memory_space<vmem>>, vector<16x16xf32>
    %c0_165 = arith.constant 0 : index
    %c0_166 = arith.constant 0 : index
    %190 = vector.load %arg40[%c0_165, %c0_166] : memref<4x16xf32, #tpu.memory_space<vmem>>, vector<4x16xf32>
    %c0_167 = arith.constant 0 : index
    %c0_168 = arith.constant 0 : index
    %191 = vector.load %arg38[%c0_167, %c0_168] : memref<4x16xf32, #tpu.memory_space<vmem>>, vector<4x16xf32>
    %c0_169 = arith.constant 0 : index
    %c0_170 = arith.constant 0 : index
    %192 = vector.load %arg45[%c0_169, %c0_170] : memref<16x4xf32, #tpu.memory_space<vmem>>, vector<16x4xf32>
    %c0_171 = arith.constant 0 : index
    %c0_172 = arith.constant 0 : index
    %193 = vector.load %arg42[%c0_171, %c0_172] : memref<16x4xf32, #tpu.memory_space<vmem>>, vector<16x4xf32>
    %c0_173 = arith.constant 0 : index
    %c0_174 = arith.constant 0 : index
    %194 = vector.load %arg47[%c0_173, %c0_174] : memref<16x4xf32, #tpu.memory_space<vmem>>, vector<16x4xf32>
    %c0_175 = arith.constant 0 : index
    %c0_176 = arith.constant 0 : index
    %195 = vector.load %arg44[%c0_175, %c0_176] : memref<16x4xf32, #tpu.memory_space<vmem>>, vector<16x4xf32>
    %c0_177 = arith.constant 0 : index
    %c0_178 = arith.constant 0 : index
    %196 = vector.load %arg65[%c0_177, %c0_178] : memref<32x16xf32, #tpu.memory_space<vmem>>, vector<32x16xf32>
    %c0_179 = arith.constant 0 : index
    %c0_180 = arith.constant 0 : index
    %197 = vector.load %arg64[%c0_179, %c0_180] : memref<32x16xf32, #tpu.memory_space<vmem>>, vector<32x16xf32>
    %c0_181 = arith.constant 0 : index
    %c0_182 = arith.constant 0 : index
    %198 = vector.load %arg4[%c0_181, %c0_182] : memref<32x32xf32, #tpu.memory_space<vmem>>, vector<32x32xf32>
    %c0_183 = arith.constant 0 : index
    %c0_184 = arith.constant 0 : index
    %c0_185 = arith.constant 0 : index
    %199 = vector.load %arg23[%c0_183, %c0_184, %c0_185] : memref<1x32x32xf32, #tpu.memory_space<vmem>>, vector<1x32x32xf32>
    %200 = vector.shape_cast %199 : vector<1x32x32xf32> to vector<32x32xf32>
    %c0_186 = arith.constant 0 : index
    %c0_187 = arith.constant 0 : index
    %c0_188 = arith.constant 0 : index
    %201 = vector.load %arg21[%c0_186, %c0_187, %c0_188] : memref<1x1x32xf32, #tpu.memory_space<vmem>>, vector<1x1x32xf32>
    %202 = vector.shape_cast %201 : vector<1x1x32xf32> to vector<1x32xf32>
    %c0_189 = arith.constant 0 : index
    %c0_190 = arith.constant 0 : index
    %c0_191 = arith.constant 0 : index
    %203 = vector.load %arg24[%c0_189, %c0_190, %c0_191] : memref<1x32x256xf32, #tpu.memory_space<vmem>>, vector<1x32x256xf32>
    %204 = vector.shape_cast %203 : vector<1x32x256xf32> to vector<32x256xf32>
    %c0_192 = arith.constant 0 : index
    %c0_193 = arith.constant 0 : index
    %c0_194 = arith.constant 0 : index
    %205 = vector.load %arg22[%c0_192, %c0_193, %c0_194] : memref<1x32x32xf32, #tpu.memory_space<vmem>>, vector<1x32x32xf32>
    %206 = vector.shape_cast %205 : vector<1x32x32xf32> to vector<32x32xf32>
    %c0_195 = arith.constant 0 : index
    %c0_196 = arith.constant 0 : index
    %c0_197 = arith.constant 0 : index
    %207 = vector.load %arg20[%c0_195, %c0_196, %c0_197] : memref<1x1x32xf32, #tpu.memory_space<vmem>>, vector<1x1x32xf32>
    %208 = vector.shape_cast %207 : vector<1x1x32xf32> to vector<1x32xf32>
    %cst_198 = arith.constant dense<0.000000e+00> : vector<16x32xf32>
    %209 = tpu.matmul %188, %200, %cst_198 {dimension_numbers = #tpu.dot_dimension_numbers<[1], [0], [0], [1], [0, 0, 1, 1], [], []>} : vector<16x32xf32>, vector<32x32xf32>, vector<16x32xf32> -> vector<16x32xf32>
    %210 = vector.broadcast %202 : vector<1x32xf32> to vector<16x32xf32>
    %211 = arith.addf %209, %210 : vector<16x32xf32>
    %cst_199 = arith.constant dense<0.000000e+00> : vector<4x32xf32>
    %212 = tpu.matmul %190, %211, %cst_199 {dimension_numbers = #tpu.dot_dimension_numbers<[1], [0], [0], [1], [0, 0, 1, 1], [], []>} : vector<4x16xf32>, vector<16x32xf32>, vector<4x32xf32> -> vector<4x32xf32>
    %cst_200 = arith.constant dense<0.000000e+00> : vector<4x32xf32>
    %213 = tpu.matmul %191, %211, %cst_200 {dimension_numbers = #tpu.dot_dimension_numbers<[1], [0], [0], [1], [0, 0, 1, 1], [], []>} : vector<4x16xf32>, vector<16x32xf32>, vector<4x32xf32> -> vector<4x32xf32>
    %cst_201 = arith.constant dense<0.000000e+00> : vector<4x256xf32>
    %214 = tpu.matmul %212, %204, %cst_201 {dimension_numbers = #tpu.dot_dimension_numbers<[1], [0], [0], [1], [0, 0, 1, 1], [], []>} : vector<4x32xf32>, vector<32x256xf32>, vector<4x256xf32> -> vector<4x256xf32>
    %215 = arith.mulf %214, %0 : vector<4x256xf32>
    %cst_202 = arith.constant dense<0.000000e+00> : vector<4x64xf32>
    %216 = tpu.matmul %215, %1, %cst_202 {dimension_numbers = #tpu.dot_dimension_numbers<[1], [0], [0], [1], [0, 0, 1, 1], [], []>} : vector<4x256xf32>, vector<256x64xf32>, vector<4x64xf32> -> vector<4x64xf32>
    %cst_203 = arith.constant dense<0.000000e+00> : vector<4x256xf32>
    %217 = tpu.matmul %213, %204, %cst_203 {dimension_numbers = #tpu.dot_dimension_numbers<[1], [0], [0], [1], [0, 0, 1, 1], [], []>} : vector<4x32xf32>, vector<32x256xf32>, vector<4x256xf32> -> vector<4x256xf32>
    %218 = arith.mulf %217, %0 : vector<4x256xf32>
    %cst_204 = arith.constant dense<0.000000e+00> : vector<4x64xf32>
    %219 = tpu.matmul %218, %1, %cst_204 {dimension_numbers = #tpu.dot_dimension_numbers<[1], [0], [0], [1], [0, 0, 1, 1], [], []>} : vector<4x256xf32>, vector<256x64xf32>, vector<4x64xf32> -> vector<4x64xf32>
    %220 = vector.extract_strided_slice %216 {offsets = [0, 0], sizes = [4, 32], strides = [1, 1]} : vector<4x64xf32> to vector<4x32xf32>
    %221 = vector.extract_strided_slice %219 {offsets = [0, 32], sizes = [4, 32], strides = [1, 1]} : vector<4x64xf32> to vector<4x32xf32>
    %222 = arith.subf %220, %221 : vector<4x32xf32>
    %223 = vector.extract_strided_slice %216 {offsets = [0, 32], sizes = [4, 32], strides = [1, 1]} : vector<4x64xf32> to vector<4x32xf32>
    %224 = vector.extract_strided_slice %219 {offsets = [0, 0], sizes = [4, 32], strides = [1, 1]} : vector<4x64xf32> to vector<4x32xf32>
    %225 = arith.addf %223, %224 : vector<4x32xf32>
    %cst_205 = arith.constant dense<0.000000e+00> : vector<16x32xf32>
    %226 = tpu.matmul %192, %222, %cst_205 {dimension_numbers = #tpu.dot_dimension_numbers<[1], [0], [0], [1], [0, 0, 1, 1], [], []>} : vector<16x4xf32>, vector<4x32xf32>, vector<16x32xf32> -> vector<16x32xf32>
    %cst_206 = arith.constant dense<0.000000e+00> : vector<16x32xf32>
    %227 = tpu.matmul %193, %225, %cst_206 {dimension_numbers = #tpu.dot_dimension_numbers<[1], [0], [0], [1], [0, 0, 1, 1], [], []>} : vector<16x4xf32>, vector<4x32xf32>, vector<16x32xf32> -> vector<16x32xf32>
    %228 = arith.addf %226, %227 : vector<16x32xf32>
    %229 = tpu.transpose %228, [1, 0] : vector<16x32xf32> -> vector<32x16xf32>
    %c0_207 = arith.constant 0 : index
    %c0_208 = arith.constant 0 : index
    %c0_209 = arith.constant 0 : index
    %230 = vector.load %arg58[%c0_207, %c0_208, %c0_209] : memref<2x16x32xf32, #tpu.memory_space<vmem>>, vector<1x16x32xf32>
    %231 = vector.shape_cast %230 : vector<1x16x32xf32> to vector<16x32xf32>
    %cst_210 = arith.constant dense<0.000000e+00> : vector<16x16xf32>
    %232 = tpu.matmul %231, %229, %cst_210 {dimension_numbers = #tpu.dot_dimension_numbers<[1], [0], [0], [1], [0, 0, 1, 1], [], []>} : vector<16x32xf32>, vector<32x16xf32>, vector<16x16xf32> -> vector<16x16xf32>
    %233 = vector.extract_strided_slice %206 {offsets = [0, 0], sizes = [16, 32], strides = [1, 1]} : vector<32x32xf32> to vector<16x32xf32>
    %cst_211 = arith.constant dense<0.000000e+00> : vector<16x32xf32>
    %234 = tpu.matmul %232, %233, %cst_211 {dimension_numbers = #tpu.dot_dimension_numbers<[1], [0], [0], [1], [0, 0, 1, 1], [], []>} : vector<16x16xf32>, vector<16x32xf32>, vector<16x32xf32> -> vector<16x32xf32>
    %235 = vector.broadcast %208 : vector<1x32xf32> to vector<16x32xf32>
    %236 = arith.addf %235, %234 : vector<16x32xf32>
    %c1_212 = arith.constant 1 : index
    %c0_213 = arith.constant 0 : index
    %c0_214 = arith.constant 0 : index
    %237 = vector.load %arg58[%c1_212, %c0_213, %c0_214] : memref<2x16x32xf32, #tpu.memory_space<vmem>>, vector<1x16x32xf32>
    %238 = vector.shape_cast %237 : vector<1x16x32xf32> to vector<16x32xf32>
    %cst_215 = arith.constant dense<0.000000e+00> : vector<16x16xf32>
    %239 = tpu.matmul %238, %229, %cst_215 {dimension_numbers = #tpu.dot_dimension_numbers<[1], [0], [0], [1], [0, 0, 1, 1], [], []>} : vector<16x32xf32>, vector<32x16xf32>, vector<16x16xf32> -> vector<16x16xf32>
    %240 = vector.extract_strided_slice %206 {offsets = [16, 0], sizes = [16, 32], strides = [1, 1]} : vector<32x32xf32> to vector<16x32xf32>
    %cst_216 = arith.constant dense<0.000000e+00> : vector<16x32xf32>
    %241 = tpu.matmul %239, %240, %cst_216 {dimension_numbers = #tpu.dot_dimension_numbers<[1], [0], [0], [1], [0, 0, 1, 1], [], []>} : vector<16x16xf32>, vector<16x32xf32>, vector<16x32xf32> -> vector<16x32xf32>
    %242 = arith.addf %236, %241 : vector<16x32xf32>
    %243 = arith.addf %188, %242 : vector<16x32xf32>
    %cst_217 = arith.constant dense<0.000000e+00> : vector<16x32xf32>
    %244 = tpu.matmul %189, %243, %cst_217 {dimension_numbers = #tpu.dot_dimension_numbers<[1], [0], [0], [1], [0, 0, 1, 1], [], []>} : vector<16x16xf32>, vector<16x32xf32>, vector<16x32xf32> -> vector<16x32xf32>
    %245 = arith.subf %243, %244 : vector<16x32xf32>
    %c0_218 = arith.constant 0 : index
    %c0_219 = arith.constant 0 : index
    %c0_220 = arith.constant 0 : index
    %246 = vector.load %arg10[%c0_218, %c0_219, %c0_220] : memref<1x32x32xf32, #tpu.memory_space<vmem>>, vector<1x32x32xf32>
    %247 = vector.shape_cast %246 : vector<1x32x32xf32> to vector<32x32xf32>
    %cst_221 = arith.constant dense<0.000000e+00> : vector<16x32xf32>
    %248 = tpu.matmul %245, %247, %cst_221 {dimension_numbers = #tpu.dot_dimension_numbers<[1], [0], [0], [1], [0, 0, 1, 1], [], []>} : vector<16x32xf32>, vector<32x32xf32>, vector<16x32xf32> -> vector<16x32xf32>
    %c0_222 = arith.constant 0 : index
    %c0_223 = arith.constant 0 : index
    %c0_224 = arith.constant 0 : index
    %249 = vector.load %arg7[%c0_222, %c0_223, %c0_224] : memref<1x1x32xf32, #tpu.memory_space<vmem>>, vector<1x1x32xf32>
    %250 = vector.shape_cast %249 : vector<1x1x32xf32> to vector<1x32xf32>
    %251 = vector.broadcast %250 : vector<1x32xf32> to vector<16x32xf32>
    %252 = arith.addf %248, %251 : vector<16x32xf32>
    %c0_225 = arith.constant 0 : index
    %c0_226 = arith.constant 0 : index
    %c0_227 = arith.constant 0 : index
    %253 = vector.load %arg8[%c0_225, %c0_226, %c0_227] : memref<1x32x32xf32, #tpu.memory_space<vmem>>, vector<1x32x32xf32>
    %254 = vector.shape_cast %253 : vector<1x32x32xf32> to vector<32x32xf32>
    %cst_228 = arith.constant dense<0.000000e+00> : vector<16x32xf32>
    %255 = tpu.matmul %167, %254, %cst_228 {dimension_numbers = #tpu.dot_dimension_numbers<[1], [0], [0], [1], [0, 0, 1, 1], [], []>} : vector<16x32xf32>, vector<32x32xf32>, vector<16x32xf32> -> vector<16x32xf32>
    %c0_229 = arith.constant 0 : index
    %c0_230 = arith.constant 0 : index
    %c0_231 = arith.constant 0 : index
    %256 = vector.load %arg5[%c0_229, %c0_230, %c0_231] : memref<1x1x32xf32, #tpu.memory_space<vmem>>, vector<1x1x32xf32>
    %257 = vector.shape_cast %256 : vector<1x1x32xf32> to vector<1x32xf32>
    %258 = vector.broadcast %257 : vector<1x32xf32> to vector<16x32xf32>
    %259 = arith.addf %255, %258 : vector<16x32xf32>
    %cst_232 = arith.constant dense<0.000000e+00> : vector<4x32xf32>
    %260 = tpu.matmul %190, %252, %cst_232 {dimension_numbers = #tpu.dot_dimension_numbers<[1], [0], [0], [1], [0, 0, 1, 1], [], []>} : vector<4x16xf32>, vector<16x32xf32>, vector<4x32xf32> -> vector<4x32xf32>
    %cst_233 = arith.constant dense<0.000000e+00> : vector<4x32xf32>
    %261 = tpu.matmul %191, %252, %cst_233 {dimension_numbers = #tpu.dot_dimension_numbers<[1], [0], [0], [1], [0, 0, 1, 1], [], []>} : vector<4x16xf32>, vector<16x32xf32>, vector<4x32xf32> -> vector<4x32xf32>
    %cst_234 = arith.constant dense<0.000000e+00> : vector<32x32xf32>
    %262 = tpu.matmul %196, %259, %cst_234 {dimension_numbers = #tpu.dot_dimension_numbers<[1], [0], [0], [1], [0, 0, 1, 1], [], []>} : vector<32x16xf32>, vector<16x32xf32>, vector<32x32xf32> -> vector<32x32xf32>
    %263 = arith.mulf %262, %198 : vector<32x32xf32>
    %cst_235 = arith.constant dense<0.000000e+00> : vector<32x32xf32>
    %264 = tpu.matmul %197, %259, %cst_235 {dimension_numbers = #tpu.dot_dimension_numbers<[1], [0], [0], [1], [0, 0, 1, 1], [], []>} : vector<32x16xf32>, vector<16x32xf32>, vector<32x32xf32> -> vector<32x32xf32>
    %265 = arith.mulf %264, %198 : vector<32x32xf32>
    %266 = tpu.transpose %263, [1, 0] : vector<32x32xf32> -> vector<32x32xf32>
    %267 = tpu.transpose %265, [1, 0] : vector<32x32xf32> -> vector<32x32xf32>
    %cst_236 = arith.constant dense<0.000000e+00> : vector<4x32xf32>
    %268 = tpu.matmul %260, %266, %cst_236 {dimension_numbers = #tpu.dot_dimension_numbers<[1], [0], [0], [1], [0, 0, 1, 1], [], []>} : vector<4x32xf32>, vector<32x32xf32>, vector<4x32xf32> -> vector<4x32xf32>
    %cst_237 = arith.constant dense<0.000000e+00> : vector<4x32xf32>
    %269 = tpu.matmul %261, %267, %cst_237 {dimension_numbers = #tpu.dot_dimension_numbers<[1], [0], [0], [1], [0, 0, 1, 1], [], []>} : vector<4x32xf32>, vector<32x32xf32>, vector<4x32xf32> -> vector<4x32xf32>
    %270 = arith.subf %268, %269 : vector<4x32xf32>
    %cst_238 = arith.constant dense<0.000000e+00> : vector<4x32xf32>
    %271 = tpu.matmul %260, %267, %cst_238 {dimension_numbers = #tpu.dot_dimension_numbers<[1], [0], [0], [1], [0, 0, 1, 1], [], []>} : vector<4x32xf32>, vector<32x32xf32>, vector<4x32xf32> -> vector<4x32xf32>
    %cst_239 = arith.constant dense<0.000000e+00> : vector<4x32xf32>
    %272 = tpu.matmul %261, %266, %cst_239 {dimension_numbers = #tpu.dot_dimension_numbers<[1], [0], [0], [1], [0, 0, 1, 1], [], []>} : vector<4x32xf32>, vector<32x32xf32>, vector<4x32xf32> -> vector<4x32xf32>
    %273 = arith.addf %271, %272 : vector<4x32xf32>
    %cst_240 = arith.constant 2.000000e+00 : f32
    %274 = vector.broadcast %cst_240 : f32 to vector<4x32xf32>
    %275 = arith.mulf %274, %270 : vector<4x32xf32>
    %cst_241 = arith.constant 2.000000e+00 : f32
    %276 = vector.broadcast %cst_241 : f32 to vector<4x32xf32>
    %277 = arith.mulf %276, %273 : vector<4x32xf32>
    %278 = math.absf %275 : vector<4x32xf32>
    %cst_242 = arith.constant 0.000000e+00 : f32
    %279 = vector.broadcast %cst_242 : f32 to vector<4x32xf32>
    %280 = arith.subf %279, %278 : vector<4x32xf32>
    %281 = math.exp %280 : vector<4x32xf32>
    %282 = arith.mulf %281, %281 : vector<4x32xf32>
    %cst_243 = arith.constant 1.000000e+00 : f32
    %283 = vector.broadcast %cst_243 : f32 to vector<4x32xf32>
    %284 = arith.addf %283, %282 : vector<4x32xf32>
    %cst_244 = arith.constant 0.000000e+00 : f32
    %285 = vector.broadcast %cst_244 : f32 to vector<4x32xf32>
    %286 = arith.cmpf oge, %275, %285 : vector<4x32xf32>
    %cst_245 = arith.constant 1.000000e+00 : f32
    %cst_246 = arith.constant -1.000000e+00 : f32
    %287 = vector.broadcast %cst_245 : f32 to vector<4x32xf32>
    %288 = vector.broadcast %cst_246 : f32 to vector<4x32xf32>
    %289 = arith.select %286, %287, %288 : vector<4x32xi1>, vector<4x32xf32>
    %cst_247 = arith.constant 1.000000e+00 : f32
    %290 = vector.broadcast %cst_247 : f32 to vector<4x32xf32>
    %291 = arith.subf %290, %282 : vector<4x32xf32>
    %292 = arith.mulf %289, %291 : vector<4x32xf32>
    %293 = arith.divf %292, %284 : vector<4x32xf32>
    %cst_248 = arith.constant 2.000000e+00 : f32
    %294 = vector.broadcast %cst_248 : f32 to vector<4x32xf32>
    %295 = arith.mulf %294, %281 : vector<4x32xf32>
    %296 = arith.divf %295, %284 : vector<4x32xf32>
    %297 = math.cos %277 : vector<4x32xf32>
    %298 = arith.mulf %297, %296 : vector<4x32xf32>
    %cst_249 = arith.constant 1.000000e+00 : f32
    %299 = vector.broadcast %cst_249 : f32 to vector<4x32xf32>
    %300 = arith.addf %299, %298 : vector<4x32xf32>
    %301 = arith.divf %293, %300 : vector<4x32xf32>
    %302 = math.sin %277 : vector<4x32xf32>
    %303 = arith.mulf %302, %296 : vector<4x32xf32>
    %304 = arith.divf %303, %300 : vector<4x32xf32>
    %cst_250 = arith.constant dense<0.000000e+00> : vector<4x32xf32>
    %305 = tpu.matmul %301, %263, %cst_250 {dimension_numbers = #tpu.dot_dimension_numbers<[1], [0], [0], [1], [0, 0, 1, 1], [], []>} : vector<4x32xf32>, vector<32x32xf32>, vector<4x32xf32> -> vector<4x32xf32>
    %cst_251 = arith.constant dense<0.000000e+00> : vector<4x32xf32>
    %306 = tpu.matmul %304, %265, %cst_251 {dimension_numbers = #tpu.dot_dimension_numbers<[1], [0], [0], [1], [0, 0, 1, 1], [], []>} : vector<4x32xf32>, vector<32x32xf32>, vector<4x32xf32> -> vector<4x32xf32>
    %307 = arith.subf %305, %306 : vector<4x32xf32>
    %cst_252 = arith.constant dense<0.000000e+00> : vector<4x32xf32>
    %308 = tpu.matmul %301, %265, %cst_252 {dimension_numbers = #tpu.dot_dimension_numbers<[1], [0], [0], [1], [0, 0, 1, 1], [], []>} : vector<4x32xf32>, vector<32x32xf32>, vector<4x32xf32> -> vector<4x32xf32>
    %cst_253 = arith.constant dense<0.000000e+00> : vector<4x32xf32>
    %309 = tpu.matmul %304, %263, %cst_253 {dimension_numbers = #tpu.dot_dimension_numbers<[1], [0], [0], [1], [0, 0, 1, 1], [], []>} : vector<4x32xf32>, vector<32x32xf32>, vector<4x32xf32> -> vector<4x32xf32>
    %310 = arith.addf %308, %309 : vector<4x32xf32>
    %c0_254 = arith.constant 0 : index
    %c0_255 = arith.constant 0 : index
    %c0_256 = arith.constant 0 : index
    %311 = vector.load %arg11[%c0_254, %c0_255, %c0_256] : memref<1x32x256xf32, #tpu.memory_space<vmem>>, vector<1x32x256xf32>
    %312 = vector.shape_cast %311 : vector<1x32x256xf32> to vector<32x256xf32>
    %cst_257 = arith.constant dense<0.000000e+00> : vector<4x256xf32>
    %313 = tpu.matmul %307, %312, %cst_257 {dimension_numbers = #tpu.dot_dimension_numbers<[1], [0], [0], [1], [0, 0, 1, 1], [], []>} : vector<4x32xf32>, vector<32x256xf32>, vector<4x256xf32> -> vector<4x256xf32>
    %314 = arith.mulf %313, %0 : vector<4x256xf32>
    %cst_258 = arith.constant dense<0.000000e+00> : vector<4x64xf32>
    %315 = tpu.matmul %314, %1, %cst_258 {dimension_numbers = #tpu.dot_dimension_numbers<[1], [0], [0], [1], [0, 0, 1, 1], [], []>} : vector<4x256xf32>, vector<256x64xf32>, vector<4x64xf32> -> vector<4x64xf32>
    %cst_259 = arith.constant dense<0.000000e+00> : vector<4x256xf32>
    %316 = tpu.matmul %310, %312, %cst_259 {dimension_numbers = #tpu.dot_dimension_numbers<[1], [0], [0], [1], [0, 0, 1, 1], [], []>} : vector<4x32xf32>, vector<32x256xf32>, vector<4x256xf32> -> vector<4x256xf32>
    %317 = arith.mulf %316, %0 : vector<4x256xf32>
    %cst_260 = arith.constant dense<0.000000e+00> : vector<4x64xf32>
    %318 = tpu.matmul %317, %1, %cst_260 {dimension_numbers = #tpu.dot_dimension_numbers<[1], [0], [0], [1], [0, 0, 1, 1], [], []>} : vector<4x256xf32>, vector<256x64xf32>, vector<4x64xf32> -> vector<4x64xf32>
    %319 = vector.extract_strided_slice %315 {offsets = [0, 0], sizes = [4, 32], strides = [1, 1]} : vector<4x64xf32> to vector<4x32xf32>
    %320 = vector.extract_strided_slice %318 {offsets = [0, 32], sizes = [4, 32], strides = [1, 1]} : vector<4x64xf32> to vector<4x32xf32>
    %321 = arith.subf %319, %320 : vector<4x32xf32>
    %322 = vector.extract_strided_slice %315 {offsets = [0, 32], sizes = [4, 32], strides = [1, 1]} : vector<4x64xf32> to vector<4x32xf32>
    %323 = vector.extract_strided_slice %318 {offsets = [0, 0], sizes = [4, 32], strides = [1, 1]} : vector<4x64xf32> to vector<4x32xf32>
    %324 = arith.addf %322, %323 : vector<4x32xf32>
    %cst_261 = arith.constant dense<0.000000e+00> : vector<16x32xf32>
    %325 = tpu.matmul %194, %321, %cst_261 {dimension_numbers = #tpu.dot_dimension_numbers<[1], [0], [0], [1], [0, 0, 1, 1], [], []>} : vector<16x4xf32>, vector<4x32xf32>, vector<16x32xf32> -> vector<16x32xf32>
    %cst_262 = arith.constant dense<0.000000e+00> : vector<16x32xf32>
    %326 = tpu.matmul %195, %324, %cst_262 {dimension_numbers = #tpu.dot_dimension_numbers<[1], [0], [0], [1], [0, 0, 1, 1], [], []>} : vector<16x4xf32>, vector<4x32xf32>, vector<16x32xf32> -> vector<16x32xf32>
    %327 = arith.addf %325, %326 : vector<16x32xf32>
    %c0_263 = arith.constant 0 : index
    %c0_264 = arith.constant 0 : index
    %c0_265 = arith.constant 0 : index
    %328 = vector.load %arg9[%c0_263, %c0_264, %c0_265] : memref<1x32x32xf32, #tpu.memory_space<vmem>>, vector<1x32x32xf32>
    %329 = vector.shape_cast %328 : vector<1x32x32xf32> to vector<32x32xf32>
    %c0_266 = arith.constant 0 : index
    %c0_267 = arith.constant 0 : index
    %c0_268 = arith.constant 0 : index
    %330 = vector.load %arg6[%c0_266, %c0_267, %c0_268] : memref<1x1x32xf32, #tpu.memory_space<vmem>>, vector<1x1x32xf32>
    %331 = vector.shape_cast %330 : vector<1x1x32xf32> to vector<1x32xf32>
    %332 = tpu.transpose %327, [1, 0] : vector<16x32xf32> -> vector<32x16xf32>
    %c0_269 = arith.constant 0 : index
    %c0_270 = arith.constant 0 : index
    %c0_271 = arith.constant 0 : index
    %333 = vector.load %arg58[%c0_269, %c0_270, %c0_271] : memref<2x16x32xf32, #tpu.memory_space<vmem>>, vector<1x16x32xf32>
    %334 = vector.shape_cast %333 : vector<1x16x32xf32> to vector<16x32xf32>
    %cst_272 = arith.constant dense<0.000000e+00> : vector<16x16xf32>
    %335 = tpu.matmul %334, %332, %cst_272 {dimension_numbers = #tpu.dot_dimension_numbers<[1], [0], [0], [1], [0, 0, 1, 1], [], []>} : vector<16x32xf32>, vector<32x16xf32>, vector<16x16xf32> -> vector<16x16xf32>
    %336 = vector.extract_strided_slice %329 {offsets = [0, 0], sizes = [16, 32], strides = [1, 1]} : vector<32x32xf32> to vector<16x32xf32>
    %cst_273 = arith.constant dense<0.000000e+00> : vector<16x32xf32>
    %337 = tpu.matmul %335, %336, %cst_273 {dimension_numbers = #tpu.dot_dimension_numbers<[1], [0], [0], [1], [0, 0, 1, 1], [], []>} : vector<16x16xf32>, vector<16x32xf32>, vector<16x32xf32> -> vector<16x32xf32>
    %338 = vector.broadcast %331 : vector<1x32xf32> to vector<16x32xf32>
    %339 = arith.addf %338, %337 : vector<16x32xf32>
    %c1_274 = arith.constant 1 : index
    %c0_275 = arith.constant 0 : index
    %c0_276 = arith.constant 0 : index
    %340 = vector.load %arg58[%c1_274, %c0_275, %c0_276] : memref<2x16x32xf32, #tpu.memory_space<vmem>>, vector<1x16x32xf32>
    %341 = vector.shape_cast %340 : vector<1x16x32xf32> to vector<16x32xf32>
    %cst_277 = arith.constant dense<0.000000e+00> : vector<16x16xf32>
    %342 = tpu.matmul %341, %332, %cst_277 {dimension_numbers = #tpu.dot_dimension_numbers<[1], [0], [0], [1], [0, 0, 1, 1], [], []>} : vector<16x32xf32>, vector<32x16xf32>, vector<16x16xf32> -> vector<16x16xf32>
    %343 = vector.extract_strided_slice %329 {offsets = [16, 0], sizes = [16, 32], strides = [1, 1]} : vector<32x32xf32> to vector<16x32xf32>
    %cst_278 = arith.constant dense<0.000000e+00> : vector<16x32xf32>
    %344 = tpu.matmul %342, %343, %cst_278 {dimension_numbers = #tpu.dot_dimension_numbers<[1], [0], [0], [1], [0, 0, 1, 1], [], []>} : vector<16x16xf32>, vector<16x32xf32>, vector<16x32xf32> -> vector<16x32xf32>
    %345 = arith.addf %339, %344 : vector<16x32xf32>
    %346 = arith.addf %245, %345 : vector<16x32xf32>
    %cst_279 = arith.constant dense<0.000000e+00> : vector<16x32xf32>
    %347 = tpu.matmul %189, %346, %cst_279 {dimension_numbers = #tpu.dot_dimension_numbers<[1], [0], [0], [1], [0, 0, 1, 1], [], []>} : vector<16x16xf32>, vector<16x32xf32>, vector<16x32xf32> -> vector<16x32xf32>
    %348 = arith.subf %346, %347 : vector<16x32xf32>
    %c0_280 = arith.constant 0 : index
    %c0_281 = arith.constant 0 : index
    %c0_282 = arith.constant 0 : index
    %349 = vector.load %arg14[%c0_280, %c0_281, %c0_282] : memref<1x32x64xf32, #tpu.memory_space<vmem>>, vector<1x32x64xf32>
    %350 = vector.shape_cast %349 : vector<1x32x64xf32> to vector<32x64xf32>
    %cst_283 = arith.constant dense<0.000000e+00> : vector<16x64xf32>
    %351 = tpu.matmul %348, %350, %cst_283 {dimension_numbers = #tpu.dot_dimension_numbers<[1], [0], [0], [1], [0, 0, 1, 1], [], []>} : vector<16x32xf32>, vector<32x64xf32>, vector<16x64xf32> -> vector<16x64xf32>
    %cst_284 = arith.constant 0.000000e+00 : f32
    %352 = vector.broadcast %cst_284 : f32 to vector<16x64xf32>
    %353 = arith.maximumf %351, %352 : vector<16x64xf32>
    %c0_285 = arith.constant 0 : index
    %c0_286 = arith.constant 0 : index
    %c0_287 = arith.constant 0 : index
    %354 = vector.load %arg15[%c0_285, %c0_286, %c0_287] : memref<1x64x32xf32, #tpu.memory_space<vmem>>, vector<1x64x32xf32>
    %355 = vector.shape_cast %354 : vector<1x64x32xf32> to vector<64x32xf32>
    %cst_288 = arith.constant dense<0.000000e+00> : vector<16x32xf32>
    %356 = tpu.matmul %353, %355, %cst_288 {dimension_numbers = #tpu.dot_dimension_numbers<[1], [0], [0], [1], [0, 0, 1, 1], [], []>} : vector<16x64xf32>, vector<64x32xf32>, vector<16x32xf32> -> vector<16x32xf32>
    %357 = arith.addf %348, %356 : vector<16x32xf32>
    %cst_289 = arith.constant dense<0.000000e+00> : vector<16x32xf32>
    %358 = tpu.matmul %189, %357, %cst_289 {dimension_numbers = #tpu.dot_dimension_numbers<[1], [0], [0], [1], [0, 0, 1, 1], [], []>} : vector<16x16xf32>, vector<16x32xf32>, vector<16x32xf32> -> vector<16x32xf32>
    %359 = arith.subf %357, %358 : vector<16x32xf32>
    %360 = arith.addf %244, %347 : vector<16x32xf32>
    %361 = arith.addf %360, %358 : vector<16x32xf32>
    %c0_290 = arith.constant 0 : index
    %c0_291 = arith.constant 0 : index
    %c0_292 = arith.constant 0 : index
    %362 = vector.load %arg63[%c0_290, %c0_291, %c0_292] : memref<1x32x4xf32, #tpu.memory_space<vmem>>, vector<1x32x4xf32>
    %363 = vector.shape_cast %362 : vector<1x32x4xf32> to vector<32x4xf32>
    %c0_293 = arith.constant 0 : index
    %c0_294 = arith.constant 0 : index
    %c0_295 = arith.constant 0 : index
    %364 = vector.load %arg61[%c0_293, %c0_294, %c0_295] : memref<1x32x4xf32, #tpu.memory_space<vmem>>, vector<1x32x4xf32>
    %365 = vector.shape_cast %364 : vector<1x32x4xf32> to vector<32x4xf32>
    %c0_296 = arith.constant 0 : index
    %c0_297 = arith.constant 0 : index
    %c0_298 = arith.constant 0 : index
    %366 = vector.load %arg62[%c0_296, %c0_297, %c0_298] : memref<1x32x4xf32, #tpu.memory_space<vmem>>, vector<1x32x4xf32>
    %367 = vector.shape_cast %366 : vector<1x32x4xf32> to vector<32x4xf32>
    %cst_299 = arith.constant dense<0.000000e+00> : vector<16x32xf32>
    %368 = tpu.matmul %172, %361, %cst_299 {dimension_numbers = #tpu.dot_dimension_numbers<[1], [0], [0], [1], [0, 0, 1, 1], [], []>} : vector<16x16xf32>, vector<16x32xf32>, vector<16x32xf32> -> vector<16x32xf32>
    %cst_300 = arith.constant dense<0.000000e+00> : vector<16x4xf32>
    %369 = tpu.matmul %368, %363, %cst_300 {dimension_numbers = #tpu.dot_dimension_numbers<[1], [0], [0], [1], [0, 0, 1, 1], [], []>} : vector<16x32xf32>, vector<32x4xf32>, vector<16x4xf32> -> vector<16x4xf32>
    %cst_301 = arith.constant dense<0.000000e+00> : vector<16x4xf32>
    %370 = tpu.matmul %361, %365, %cst_301 {dimension_numbers = #tpu.dot_dimension_numbers<[1], [0], [0], [1], [0, 0, 1, 1], [], []>} : vector<16x32xf32>, vector<32x4xf32>, vector<16x4xf32> -> vector<16x4xf32>
    %371 = arith.addf %369, %370 : vector<16x4xf32>
    %cst_302 = arith.constant dense<0.000000e+00> : vector<16x32xf32>
    %372 = tpu.matmul %173, %361, %cst_302 {dimension_numbers = #tpu.dot_dimension_numbers<[1], [0], [0], [1], [0, 0, 1, 1], [], []>} : vector<16x16xf32>, vector<16x32xf32>, vector<16x32xf32> -> vector<16x32xf32>
    %cst_303 = arith.constant dense<0.000000e+00> : vector<16x4xf32>
    %373 = tpu.matmul %372, %367, %cst_303 {dimension_numbers = #tpu.dot_dimension_numbers<[1], [0], [0], [1], [0, 0, 1, 1], [], []>} : vector<16x32xf32>, vector<32x4xf32>, vector<16x4xf32> -> vector<16x4xf32>
    %374 = arith.addf %371, %373 : vector<16x4xf32>
    %375 = arith.addf %171, %374 : vector<16x4xf32>
    %c0_304 = arith.constant 0 : index
    %c0_305 = arith.constant 0 : index
    %376 = vector.load %arg13[%c0_304, %c0_305] : memref<1x32xf32, #tpu.memory_space<vmem>>, vector<1x32xf32>
    %c0_306 = arith.constant 0 : index
    %c0_307 = arith.constant 0 : index
    %377 = vector.load %arg12[%c0_306, %c0_307] : memref<1x32xf32, #tpu.memory_space<vmem>>, vector<1x32xf32>
    %cst_308 = arith.constant dense<0.000000e+00> : vector<16xf32>
    %378 = vector.multi_reduction <add>, %359, %cst_308 [1] : vector<16x32xf32> to vector<16xf32>
    %379 = vector.shape_cast %378 : vector<16xf32> to vector<16x1xf32>
    %cst_309 = arith.constant 3.200000e+01 : f32
    %380 = vector.broadcast %cst_309 : f32 to vector<16x1xf32>
    %381 = arith.divf %379, %380 : vector<16x1xf32>
    %382 = vector.broadcast %381 : vector<16x1xf32> to vector<16x32xf32>
    %383 = arith.subf %359, %382 : vector<16x32xf32>
    %384 = arith.mulf %383, %383 : vector<16x32xf32>
    %cst_310 = arith.constant dense<0.000000e+00> : vector<16xf32>
    %385 = vector.multi_reduction <add>, %384, %cst_310 [1] : vector<16x32xf32> to vector<16xf32>
    %386 = vector.shape_cast %385 : vector<16xf32> to vector<16x1xf32>
    %cst_311 = arith.constant 3.200000e+01 : f32
    %387 = vector.broadcast %cst_311 : f32 to vector<16x1xf32>
    %388 = arith.divf %386, %387 : vector<16x1xf32>
    %389 = vector.broadcast %381 : vector<16x1xf32> to vector<16x32xf32>
    %390 = arith.subf %359, %389 : vector<16x32xf32>
    %cst_312 = arith.constant 9.99999974E-6 : f32
    %391 = vector.broadcast %cst_312 : f32 to vector<16x1xf32>
    %392 = arith.addf %388, %391 : vector<16x1xf32>
    %393 = math.rsqrt %392 : vector<16x1xf32>
    %394 = vector.broadcast %393 : vector<16x1xf32> to vector<16x32xf32>
    %395 = arith.mulf %390, %394 : vector<16x32xf32>
    %396 = vector.broadcast %376 : vector<1x32xf32> to vector<16x32xf32>
    %397 = arith.mulf %395, %396 : vector<16x32xf32>
    %398 = vector.broadcast %377 : vector<1x32xf32> to vector<16x32xf32>
    %399 = arith.addf %397, %398 : vector<16x32xf32>
    %cst_313 = arith.constant dense<0.000000e+00> : vector<32xf32>
    %400 = vector.multi_reduction <add>, %399, %cst_313 [0] : vector<16x32xf32> to vector<32xf32>
    %401 = vector.shape_cast %400 : vector<32xf32> to vector<1x32xf32>
    %cst_314 = arith.constant 1.600000e+01 : f32
    %402 = vector.broadcast %cst_314 : f32 to vector<1x32xf32>
    %403 = arith.divf %401, %402 : vector<1x32xf32>
    %404 = vector.broadcast %403 : vector<1x32xf32> to vector<16x32xf32>
    %405 = arith.subf %399, %404 : vector<16x32xf32>
    %c0_315 = arith.constant 0 : index
    %c0_316 = arith.constant 0 : index
    %406 = vector.load %arg51[%c0_315, %c0_316] : memref<32x4xf32, #tpu.memory_space<vmem>>, vector<32x4xf32>
    %cst_317 = arith.constant dense<0.000000e+00> : vector<16x4xf32>
    %407 = tpu.matmul %405, %406, %cst_317 {dimension_numbers = #tpu.dot_dimension_numbers<[1], [0], [0], [1], [0, 0, 1, 1], [], []>} : vector<16x32xf32>, vector<32x4xf32>, vector<16x4xf32> -> vector<16x4xf32>
    %c0_318 = arith.constant 0 : index
    %c0_319 = arith.constant 0 : index
    %408 = vector.load %arg50[%c0_318, %c0_319] : memref<1x4xf32, #tpu.memory_space<vmem>>, vector<1x4xf32>
    %409 = vector.broadcast %408 : vector<1x4xf32> to vector<16x4xf32>
    %410 = arith.addf %407, %409 : vector<16x4xf32>
    %411 = arith.addf %375, %410 : vector<16x4xf32>
    %412 = vector.extract_strided_slice %411 {offsets = [8, 0], sizes = [8, 4], strides = [1, 1]} : vector<16x4xf32> to vector<8x4xf32>
    %c0_320 = arith.constant 0 : index
    %c0_321 = arith.constant 0 : index
    %c0_322 = arith.constant 0 : index
    %413 = vector.load %arg67[%c0_320, %c0_321, %c0_322] : memref<1x8x4xf32, #tpu.memory_space<vmem>>, vector<1x8x4xf32>
    %414 = vector.shape_cast %413 : vector<1x8x4xf32> to vector<8x4xf32>
    %415 = vector.shape_cast %412 : vector<8x4xf32> to vector<1x8x4xf32>
    tpu.vector_store %arg67[%c0_320, %c0_321, %c0_322], %415 {strides = array<i32>} : memref<1x8x4xf32, #tpu.memory_space<vmem>>, vector<1x8x4xf32>,
    return
  }
  func.func @transform_0(%arg0: i32) -> (i32, i32, i32) {
    %c0_i32 = arith.constant 0 : i32
    %c0_i32_0 = arith.constant 0 : i32
    %c0_i32_1 = arith.constant 0 : i32
    return %arg0, %c0_i32, %c0_i32_0 : i32, i32, i32
  }
  func.func @transform_1(%arg0: i32) -> (i32, i32, i32) {
    %c0_i32 = arith.constant 0 : i32
    %c0_i32_0 = arith.constant 0 : i32
    %c0_i32_1 = arith.constant 0 : i32
    return %arg0, %c0_i32, %c0_i32_0 : i32, i32, i32
  }
  func.func @transform_2(%arg0: i32) -> (i32, i32, i32) {
    %c0_i32 = arith.constant 0 : i32
    %c0_i32_0 = arith.constant 0 : i32
    %c0_i32_1 = arith.constant 0 : i32
    return %arg0, %c0_i32, %c0_i32_0 : i32, i32, i32
  }
  func.func @transform_3(%arg0: i32) -> (i32, i32) {
    %c0_i32 = arith.constant 0 : i32
    %c0_i32_0 = arith.constant 0 : i32
    %c0_i32_1 = arith.constant 0 : i32
    return %c0_i32, %c0_i32_0 : i32, i32
  }
  func.func @transform_4(%arg0: i32) -> (i32, i32, i32) {
    %c0_i32 = arith.constant 0 : i32
    %c0_i32_0 = arith.constant 0 : i32
    %c0_i32_1 = arith.constant 0 : i32
    %c0_i32_2 = arith.constant 0 : i32
    return %c0_i32, %c0_i32_0, %c0_i32_1 : i32, i32, i32
  }
  func.func @transform_5(%arg0: i32) -> (i32, i32, i32) {
    %c0_i32 = arith.constant 0 : i32
    %c0_i32_0 = arith.constant 0 : i32
    %c0_i32_1 = arith.constant 0 : i32
    %c0_i32_2 = arith.constant 0 : i32
    return %c0_i32, %c0_i32_0, %c0_i32_1 : i32, i32, i32
  }
  func.func @transform_6(%arg0: i32) -> (i32, i32, i32) {
    %c0_i32 = arith.constant 0 : i32
    %c0_i32_0 = arith.constant 0 : i32
    %c0_i32_1 = arith.constant 0 : i32
    %c0_i32_2 = arith.constant 0 : i32
    return %c0_i32, %c0_i32_0, %c0_i32_1 : i32, i32, i32
  }
  func.func @transform_7(%arg0: i32) -> (i32, i32, i32) {
    %c0_i32 = arith.constant 0 : i32
    %c0_i32_0 = arith.constant 0 : i32
    %c0_i32_1 = arith.constant 0 : i32
    %c0_i32_2 = arith.constant 0 : i32
    return %c0_i32, %c0_i32_0, %c0_i32_1 : i32, i32, i32
  }
  func.func @transform_8(%arg0: i32) -> (i32, i32, i32) {
    %c0_i32 = arith.constant 0 : i32
    %c0_i32_0 = arith.constant 0 : i32
    %c0_i32_1 = arith.constant 0 : i32
    %c0_i32_2 = arith.constant 0 : i32
    return %c0_i32, %c0_i32_0, %c0_i32_1 : i32, i32, i32
  }
  func.func @transform_9(%arg0: i32) -> (i32, i32, i32) {
    %c0_i32 = arith.constant 0 : i32
    %c0_i32_0 = arith.constant 0 : i32
    %c0_i32_1 = arith.constant 0 : i32
    %c0_i32_2 = arith.constant 0 : i32
    return %c0_i32, %c0_i32_0, %c0_i32_1 : i32, i32, i32
  }
  func.func @transform_10(%arg0: i32) -> (i32, i32, i32) {
    %c0_i32 = arith.constant 0 : i32
    %c0_i32_0 = arith.constant 0 : i32
    %c0_i32_1 = arith.constant 0 : i32
    %c0_i32_2 = arith.constant 0 : i32
    return %c0_i32, %c0_i32_0, %c0_i32_1 : i32, i32, i32
  }
  func.func @transform_11(%arg0: i32) -> (i32, i32) {
    %c0_i32 = arith.constant 0 : i32
    %c0_i32_0 = arith.constant 0 : i32
    %c0_i32_1 = arith.constant 0 : i32
    return %c0_i32, %c0_i32_0 : i32, i32
  }
  func.func @transform_12(%arg0: i32) -> (i32, i32) {
    %c0_i32 = arith.constant 0 : i32
    %c0_i32_0 = arith.constant 0 : i32
    %c0_i32_1 = arith.constant 0 : i32
    return %c0_i32, %c0_i32_0 : i32, i32
  }
  func.func @transform_13(%arg0: i32) -> (i32, i32, i32) {
    %c0_i32 = arith.constant 0 : i32
    %c0_i32_0 = arith.constant 0 : i32
    %c0_i32_1 = arith.constant 0 : i32
    %c0_i32_2 = arith.constant 0 : i32
    return %c0_i32, %c0_i32_0, %c0_i32_1 : i32, i32, i32
  }
  func.func @transform_14(%arg0: i32) -> (i32, i32, i32) {
    %c0_i32 = arith.constant 0 : i32
    %c0_i32_0 = arith.constant 0 : i32
    %c0_i32_1 = arith.constant 0 : i32
    %c0_i32_2 = arith.constant 0 : i32
    return %c0_i32, %c0_i32_0, %c0_i32_1 : i32, i32, i32
  }
  func.func @transform_15(%arg0: i32) -> (i32, i32) {
    %c0_i32 = arith.constant 0 : i32
    %c0_i32_0 = arith.constant 0 : i32
    %c0_i32_1 = arith.constant 0 : i32
    return %c0_i32, %c0_i32_0 : i32, i32
  }
  func.func @transform_16(%arg0: i32) -> (i32, i32) {
    %c0_i32 = arith.constant 0 : i32
    %c0_i32_0 = arith.constant 0 : i32
    %c0_i32_1 = arith.constant 0 : i32
    return %c0_i32, %c0_i32_0 : i32, i32
  }
  func.func @transform_17(%arg0: i32) -> (i32, i32) {
    %c0_i32 = arith.constant 0 : i32
    %c0_i32_0 = arith.constant 0 : i32
    %c0_i32_1 = arith.constant 0 : i32
    return %c0_i32, %c0_i32_0 : i32, i32
  }
  func.func @transform_18(%arg0: i32) -> (i32, i32) {
    %c0_i32 = arith.constant 0 : i32
    %c0_i32_0 = arith.constant 0 : i32
    %c0_i32_1 = arith.constant 0 : i32
    return %c0_i32, %c0_i32_0 : i32, i32
  }
  func.func @transform_19(%arg0: i32) -> (i32, i32, i32) {
    %c0_i32 = arith.constant 0 : i32
    %c0_i32_0 = arith.constant 0 : i32
    %c0_i32_1 = arith.constant 0 : i32
    %c0_i32_2 = arith.constant 0 : i32
    return %c0_i32, %c0_i32_0, %c0_i32_1 : i32, i32, i32
  }
  func.func @transform_20(%arg0: i32) -> (i32, i32, i32) {
    %c0_i32 = arith.constant 0 : i32
    %c0_i32_0 = arith.constant 0 : i32
    %c0_i32_1 = arith.constant 0 : i32
    %c0_i32_2 = arith.constant 0 : i32
    return %c0_i32, %c0_i32_0, %c0_i32_1 : i32, i32, i32
  }
  func.func @transform_21(%arg0: i32) -> (i32, i32, i32) {
    %c0_i32 = arith.constant 0 : i32
    %c0_i32_0 = arith.constant 0 : i32
    %c0_i32_1 = arith.constant 0 : i32
    %c0_i32_2 = arith.constant 0 : i32
    return %c0_i32, %c0_i32_0, %c0_i32_1 : i32, i32, i32
  }
  func.func @transform_22(%arg0: i32) -> (i32, i32, i32) {
    %c0_i32 = arith.constant 0 : i32
    %c0_i32_0 = arith.constant 0 : i32
    %c0_i32_1 = arith.constant 0 : i32
    %c0_i32_2 = arith.constant 0 : i32
    return %c0_i32, %c0_i32_0, %c0_i32_1 : i32, i32, i32
  }
  func.func @transform_23(%arg0: i32) -> (i32, i32, i32) {
    %c0_i32 = arith.constant 0 : i32
    %c0_i32_0 = arith.constant 0 : i32
    %c0_i32_1 = arith.constant 0 : i32
    %c0_i32_2 = arith.constant 0 : i32
    return %c0_i32, %c0_i32_0, %c0_i32_1 : i32, i32, i32
  }
  func.func @transform_24(%arg0: i32) -> (i32, i32) {
    %c0_i32 = arith.constant 0 : i32
    %c0_i32_0 = arith.constant 0 : i32
    %c0_i32_1 = arith.constant 0 : i32
    return %c0_i32, %c0_i32_0 : i32, i32
  }
  func.func @transform_25(%arg0: i32) -> (i32, i32) {
    %c0_i32 = arith.constant 0 : i32
    %c0_i32_0 = arith.constant 0 : i32
    %c0_i32_1 = arith.constant 0 : i32
    return %c0_i32, %c0_i32_0 : i32, i32
  }
  func.func @transform_26(%arg0: i32) -> (i32, i32) {
    %c0_i32 = arith.constant 0 : i32
    %c0_i32_0 = arith.constant 0 : i32
    %c0_i32_1 = arith.constant 0 : i32
    return %c0_i32, %c0_i32_0 : i32, i32
  }
  func.func @transform_27(%arg0: i32) -> (i32, i32) {
    %c0_i32 = arith.constant 0 : i32
    %c0_i32_0 = arith.constant 0 : i32
    %c0_i32_1 = arith.constant 0 : i32
    return %c0_i32, %c0_i32_0 : i32, i32
  }
  func.func @transform_28(%arg0: i32) -> (i32, i32) {
    %c0_i32 = arith.constant 0 : i32
    %c0_i32_0 = arith.constant 0 : i32
    %c0_i32_1 = arith.constant 0 : i32
    return %c0_i32, %c0_i32_0 : i32, i32
  }
  func.func @transform_29(%arg0: i32) -> (i32, i32, i32) {
    %c0_i32 = arith.constant 0 : i32
    %c0_i32_0 = arith.constant 0 : i32
    %c0_i32_1 = arith.constant 0 : i32
    %c0_i32_2 = arith.constant 0 : i32
    return %c0_i32, %c0_i32_0, %c0_i32_1 : i32, i32, i32
  }
  func.func @transform_30(%arg0: i32) -> (i32, i32, i32) {
    %c0_i32 = arith.constant 0 : i32
    %c0_i32_0 = arith.constant 0 : i32
    %c0_i32_1 = arith.constant 0 : i32
    %c0_i32_2 = arith.constant 0 : i32
    return %c0_i32, %c0_i32_0, %c0_i32_1 : i32, i32, i32
  }
  func.func @transform_31(%arg0: i32) -> (i32, i32) {
    %c0_i32 = arith.constant 0 : i32
    %c0_i32_0 = arith.constant 0 : i32
    %c0_i32_1 = arith.constant 0 : i32
    return %c0_i32, %c0_i32_0 : i32, i32
  }
  func.func @transform_32(%arg0: i32) -> (i32, i32, i32) {
    %c0_i32 = arith.constant 0 : i32
    %c0_i32_0 = arith.constant 0 : i32
    %c0_i32_1 = arith.constant 0 : i32
    %c0_i32_2 = arith.constant 0 : i32
    return %c0_i32, %c0_i32_0, %c0_i32_1 : i32, i32, i32
  }
  func.func @transform_33(%arg0: i32) -> (i32, i32, i32) {
    %c0_i32 = arith.constant 0 : i32
    %c0_i32_0 = arith.constant 0 : i32
    %c0_i32_1 = arith.constant 0 : i32
    %c0_i32_2 = arith.constant 0 : i32
    return %c0_i32, %c0_i32_0, %c0_i32_1 : i32, i32, i32
  }
  func.func @transform_34(%arg0: i32) -> (i32, i32, i32) {
    %c0_i32 = arith.constant 0 : i32
    %c0_i32_0 = arith.constant 0 : i32
    %c0_i32_1 = arith.constant 0 : i32
    %c0_i32_2 = arith.constant 0 : i32
    return %c0_i32, %c0_i32_0, %c0_i32_1 : i32, i32, i32
  }
  func.func @transform_35(%arg0: i32) -> (i32, i32, i32) {
    %c0_i32 = arith.constant 0 : i32
    %c0_i32_0 = arith.constant 0 : i32
    %c0_i32_1 = arith.constant 0 : i32
    %c0_i32_2 = arith.constant 0 : i32
    return %c0_i32, %c0_i32_0, %c0_i32_1 : i32, i32, i32
  }
  func.func @transform_36(%arg0: i32) -> (i32, i32, i32) {
    %c0_i32 = arith.constant 0 : i32
    %c0_i32_0 = arith.constant 0 : i32
    %c0_i32_1 = arith.constant 0 : i32
    %c0_i32_2 = arith.constant 0 : i32
    return %c0_i32, %c0_i32_0, %c0_i32_1 : i32, i32, i32
  }
  func.func @transform_37(%arg0: i32) -> (i32, i32) {
    %c0_i32 = arith.constant 0 : i32
    %c0_i32_0 = arith.constant 0 : i32
    %c0_i32_1 = arith.constant 0 : i32
    return %c0_i32, %c0_i32_0 : i32, i32
  }
  func.func @transform_38(%arg0: i32) -> (i32, i32) {
    %c0_i32 = arith.constant 0 : i32
    %c0_i32_0 = arith.constant 0 : i32
    %c0_i32_1 = arith.constant 0 : i32
    return %c0_i32, %c0_i32_0 : i32, i32
  }
  func.func @transform_39(%arg0: i32) -> (i32, i32) {
    %c0_i32 = arith.constant 0 : i32
    %c0_i32_0 = arith.constant 0 : i32
    %c0_i32_1 = arith.constant 0 : i32
    return %c0_i32, %c0_i32_0 : i32, i32
  }
  func.func @transform_40(%arg0: i32) -> (i32, i32) {
    %c0_i32 = arith.constant 0 : i32
    %c0_i32_0 = arith.constant 0 : i32
    %c0_i32_1 = arith.constant 0 : i32
    return %c0_i32, %c0_i32_0 : i32, i32
  }
  func.func @transform_41(%arg0: i32) -> (i32, i32) {
    %c0_i32 = arith.constant 0 : i32
    %c0_i32_0 = arith.constant 0 : i32
    %c0_i32_1 = arith.constant 0 : i32
    return %c0_i32, %c0_i32_0 : i32, i32
  }
  func.func @transform_42(%arg0: i32) -> (i32, i32) {
    %c0_i32 = arith.constant 0 : i32
    %c0_i32_0 = arith.constant 0 : i32
    %c0_i32_1 = arith.constant 0 : i32
    return %c0_i32, %c0_i32_0 : i32, i32
  }
  func.func @transform_43(%arg0: i32) -> (i32, i32) {
    %c0_i32 = arith.constant 0 : i32
    %c0_i32_0 = arith.constant 0 : i32
    %c0_i32_1 = arith.constant 0 : i32
    return %c0_i32, %c0_i32_0 : i32, i32
  }
  func.func @transform_44(%arg0: i32) -> (i32, i32) {
    %c0_i32 = arith.constant 0 : i32
    %c0_i32_0 = arith.constant 0 : i32
    %c0_i32_1 = arith.constant 0 : i32
    return %c0_i32, %c0_i32_0 : i32, i32
  }
  func.func @transform_45(%arg0: i32) -> (i32, i32) {
    %c0_i32 = arith.constant 0 : i32
    %c0_i32_0 = arith.constant 0 : i32
    %c0_i32_1 = arith.constant 0 : i32
    return %c0_i32, %c0_i32_0 : i32, i32
  }
  func.func @transform_46(%arg0: i32) -> (i32, i32) {
    %c0_i32 = arith.constant 0 : i32
    %c0_i32_0 = arith.constant 0 : i32
    %c0_i32_1 = arith.constant 0 : i32
    return %c0_i32, %c0_i32_0 : i32, i32
  }
  func.func @transform_47(%arg0: i32) -> (i32, i32) {
    %c0_i32 = arith.constant 0 : i32
    %c0_i32_0 = arith.constant 0 : i32
    %c0_i32_1 = arith.constant 0 : i32
    return %c0_i32, %c0_i32_0 : i32, i32
  }
  func.func @transform_48(%arg0: i32) -> (i32, i32) {
    %c0_i32 = arith.constant 0 : i32
    %c0_i32_0 = arith.constant 0 : i32
    %c0_i32_1 = arith.constant 0 : i32
    return %c0_i32, %c0_i32_0 : i32, i32
  }
  func.func @transform_49(%arg0: i32) -> (i32, i32) {
    %c0_i32 = arith.constant 0 : i32
    %c0_i32_0 = arith.constant 0 : i32
    %c0_i32_1 = arith.constant 0 : i32
    return %c0_i32, %c0_i32_0 : i32, i32
  }
  func.func @transform_50(%arg0: i32) -> (i32, i32) {
    %c0_i32 = arith.constant 0 : i32
    %c0_i32_0 = arith.constant 0 : i32
    %c0_i32_1 = arith.constant 0 : i32
    return %c0_i32, %c0_i32_0 : i32, i32
  }
  func.func @transform_51(%arg0: i32) -> (i32, i32) {
    %c0_i32 = arith.constant 0 : i32
    %c0_i32_0 = arith.constant 0 : i32
    %c0_i32_1 = arith.constant 0 : i32
    return %c0_i32, %c0_i32_0 : i32, i32
  }
  func.func @transform_52(%arg0: i32) -> (i32, i32) {
    %c0_i32 = arith.constant 0 : i32
    %c0_i32_0 = arith.constant 0 : i32
    %c0_i32_1 = arith.constant 0 : i32
    return %c0_i32, %c0_i32_0 : i32, i32
  }
  func.func @transform_53(%arg0: i32) -> (i32, i32) {
    %c0_i32 = arith.constant 0 : i32
    %c0_i32_0 = arith.constant 0 : i32
    %c0_i32_1 = arith.constant 0 : i32
    return %c0_i32, %c0_i32_0 : i32, i32
  }
  func.func @transform_54(%arg0: i32) -> (i32, i32) {
    %c0_i32 = arith.constant 0 : i32
    %c0_i32_0 = arith.constant 0 : i32
    %c0_i32_1 = arith.constant 0 : i32
    return %c0_i32, %c0_i32_0 : i32, i32
  }
  func.func @transform_55(%arg0: i32) -> (i32, i32) {
    %c0_i32 = arith.constant 0 : i32
    %c0_i32_0 = arith.constant 0 : i32
    %c0_i32_1 = arith.constant 0 : i32
    return %c0_i32, %c0_i32_0 : i32, i32
  }
  func.func @transform_56(%arg0: i32) -> (i32, i32) {
    %c0_i32 = arith.constant 0 : i32
    %c0_i32_0 = arith.constant 0 : i32
    %c0_i32_1 = arith.constant 0 : i32
    return %c0_i32, %c0_i32_0 : i32, i32
  }
  func.func @transform_57(%arg0: i32) -> (i32, i32, i32) {
    %c0_i32 = arith.constant 0 : i32
    %c0_i32_0 = arith.constant 0 : i32
    %c0_i32_1 = arith.constant 0 : i32
    %c0_i32_2 = arith.constant 0 : i32
    return %c0_i32, %c0_i32_0, %c0_i32_1 : i32, i32, i32
  }
  func.func @transform_58(%arg0: i32) -> (i32, i32, i32) {
    %c0_i32 = arith.constant 0 : i32
    %c0_i32_0 = arith.constant 0 : i32
    %c0_i32_1 = arith.constant 0 : i32
    %c0_i32_2 = arith.constant 0 : i32
    return %c0_i32, %c0_i32_0, %c0_i32_1 : i32, i32, i32
  }
  func.func @transform_59(%arg0: i32) -> (i32, i32) {
    %c0_i32 = arith.constant 0 : i32
    %c0_i32_0 = arith.constant 0 : i32
    %c0_i32_1 = arith.constant 0 : i32
    return %c0_i32, %c0_i32_0 : i32, i32
  }
  func.func @transform_60(%arg0: i32) -> (i32, i32, i32) {
    %c0_i32 = arith.constant 0 : i32
    %c0_i32_0 = arith.constant 0 : i32
    %c0_i32_1 = arith.constant 0 : i32
    %c0_i32_2 = arith.constant 0 : i32
    return %c0_i32, %c0_i32_0, %c0_i32_1 : i32, i32, i32
  }
  func.func @transform_61(%arg0: i32) -> (i32, i32, i32) {
    %c0_i32 = arith.constant 0 : i32
    %c0_i32_0 = arith.constant 0 : i32
    %c0_i32_1 = arith.constant 0 : i32
    %c0_i32_2 = arith.constant 0 : i32
    return %c0_i32, %c0_i32_0, %c0_i32_1 : i32, i32, i32
  }
  func.func @transform_62(%arg0: i32) -> (i32, i32, i32) {
    %c0_i32 = arith.constant 0 : i32
    %c0_i32_0 = arith.constant 0 : i32
    %c0_i32_1 = arith.constant 0 : i32
    %c0_i32_2 = arith.constant 0 : i32
    return %c0_i32, %c0_i32_0, %c0_i32_1 : i32, i32, i32
  }
  func.func @transform_63(%arg0: i32) -> (i32, i32) {
    %c0_i32 = arith.constant 0 : i32
    %c0_i32_0 = arith.constant 0 : i32
    %c0_i32_1 = arith.constant 0 : i32
    return %c0_i32, %c0_i32_0 : i32, i32
  }
  func.func @transform_64(%arg0: i32) -> (i32, i32) {
    %c0_i32 = arith.constant 0 : i32
    %c0_i32_0 = arith.constant 0 : i32
    %c0_i32_1 = arith.constant 0 : i32
    return %c0_i32, %c0_i32_0 : i32, i32
  }
  func.func @transform_65(%arg0: i32) -> (i32, i32) {
    %c0_i32 = arith.constant 0 : i32
    %c0_i32_0 = arith.constant 0 : i32
    %c0_i32_1 = arith.constant 0 : i32
    return %c0_i32, %c0_i32_0 : i32, i32
  }
  func.func @transform_66(%arg0: i32) -> (i32, i32, i32) {
    %c0_i32 = arith.constant 0 : i32
    %c0_i32_0 = arith.constant 0 : i32
    %c0_i32_1 = arith.constant 0 : i32
    return %arg0, %c0_i32, %c0_i32_0 : i32, i32, i32
  }
}

</mosaic_0001>

<bundles_post_ra>
// kernel: fedformer_forward.1
= control target key start
LH: loop header
LB: loop body
LE: loop exit
PB: predicated region body
PF: predicated region fallthrough
CT: control target
= control target key end

     0   :  { %s7969_s6 = smov 1   ;;  %s7970_s10 = smov 2   ;;  %s9897_s0 = inlined_call_operand.smem [shape: u32[67], index: -1, kind: input, shape index: {}] }
   0x1   :  { %s8081_s5 = sld [smem:[%s9897_s0]]   ;;  %s7971_s14 = smov 3  }
   0x2   :  { %s8086_s9 = sld [smem:[%s9897_s0 + %s7969_s6]]   ;;  %s7972_s18 = smov 4  }
   0x3   :  { %s8091_s13 = sld [smem:[%s9897_s0 + %s7970_s10]]   ;;  %s7973_s22 = smov 5  }
   0x4   :  { %s8096_s17 = sld [smem:[%s9897_s0 + %s7971_s14]]   ;;  %s7974_s26 = smov 6  }
   0x5   :  { %s8101_s21 = sld [smem:[%s9897_s0 + %s7972_s18]]   ;;  %s7975_s30 = smov 7  }
   0x6   :  { %s8106_s25 = sld [smem:[%s9897_s0 + %s7973_s22]]   ;;  %s7976_s4 = smov 8  }
   0x7   :  { %9985 = sst [smem:[#allocation52_spill]] %s8081_s5  ;;  %s7977_s10 = smov 9  }
   0x8   :  { %9986 = sst [smem:[#allocation53_spill]] %s8086_s9  ;;  %s7978_s15 = smov 10  }
   0x9   :  { %9987 = sst [smem:[#allocation54_spill]] %s8091_s13  ;;  %s7979_s20 = smov 11  }
   0xa   :  { %9988 = sst [smem:[#allocation55_spill]] %s8096_s17  ;;  %s7981_s1 = smov 13  }
   0xb   :  { %s8111_s29 = sld [smem:[%s9897_s0 + %s7974_s26]]   ;;  %s7980_s26 = smov 12  }
   0xc   :  { %s8116_s3 = sld [smem:[%s9897_s0 + %s7975_s30]]   ;;  %s7982_s7 = smov 14  }
   0xd   :  { %s8121_s8 = sld [smem:[%s9897_s0 + %s7976_s4]]   ;;  %s7984_s22 = smov 16  }
   0xe   :  { %s8126_s14 = sld [smem:[%s9897_s0 + %s7977_s10]]   ;;  %s7985_s28 = smov 17  }
   0xf   :  { %s8131_s19 = sld [smem:[%s9897_s0 + %s7978_s15]]   ;;  %s7983_s15 = smov 15  }
  0x10   :  { %s8136_s24 = sld [smem:[%s9897_s0 + %s7979_s20]]  }
  0x11   :  { %s8141_s30 = sld [smem:[%s9897_s0 + %s7980_s26]]  }
  0x12   :  { %9989 = sst [smem:[#allocation56_spill]] %s8116_s3 }
  0x13   :  { %9990 = sst [smem:[#allocation57_spill]] %s8121_s8 }
  0x14   :  { %9991 = sst [smem:[#allocation58_spill]] %s8126_s14 }
  0x15   :  { %9992 = sst [smem:[#allocation59_spill]] %s8131_s19 }
  0x16   :  { %s8146_s6 = sld [smem:[%s9897_s0 + %s7981_s1]]  }
  0x17   :  { %s8151_s12 = sld [smem:[%s9897_s0 + %s7982_s7]]   ;;  %s7986_s7 = smov 18  }
  0x18   :  { %s8156_s20 = sld [smem:[%s9897_s0 + %s7983_s15]]   ;;  %s7987_s15 = smov 19  }
  0x19   :  { %s8161_s27 = sld [smem:[%s9897_s0 + %s7984_s22]]   ;;  %s7988_s22 = smov 20  }
  0x1a   :  { %s8166_s4 = sld [smem:[%s9897_s0 + %s7985_s28]]   ;;  %s7989_s28 = smov 21  }
  0x1b   :  { %s8181_s8 = sld [smem:[%s9897_s0 + %s7988_s22]]   ;;  %s7992_s22 = smov 24  }
  0x1c   :  { %9993 = sst [smem:[#allocation60_spill]] %s8146_s6 }
  0x1d   :  { %9994 = sst [smem:[#allocation61_spill]] %s8151_s12 }
  0x1e   :  { %s8171_s12 = sld [smem:[%s9897_s0 + %s7986_s7]]   ;;  %s7990_s7 = smov 22  }
  0x1f   :  { %9995 = sst [smem:[#allocation62_spill]] %s8161_s27 }
  0x20   :  { %9996 = sst [smem:[#allocation63_spill]] %s8166_s4 }
  0x21   :  { %s8176_s6 = sld [smem:[%s9897_s0 + %s7987_s15]]   ;;  %s7991_s15 = smov 23  }
  0x22   :  { %9999 = sst [smem:[#allocation66_spill]] %s8181_s8 }
  0x23   :  { %s8186_s19 = sld [smem:[%s9897_s0 + %s7989_s28]]   ;;  %s7993_s28 = smov 25  }
  0x24   :  { %9997 = sst [smem:[#allocation64_spill]] %s8171_s12 }
  0x25   :  { %s8191_s17 = sld [smem:[%s9897_s0 + %s7990_s7]]   ;;  %s7994_s7 = smov 26  }
  0x26   :  { %s8196_s14 = sld [smem:[%s9897_s0 + %s7991_s15]]   ;;  %s7995_s15 = smov 27  }
  0x27   :  { %9998 = sst [smem:[#allocation65_spill]] %s8176_s6 }
  0x28   :  { %s8201_s3 = sld [smem:[%s9897_s0 + %s7992_s22]]   ;;  %s7996_s22 = smov 28  }
  0x29   :  { %10000 = sst [smem:[#allocation67_spill]] %s8186_s19 }
  0x2a   :  { %s8206_s19 = sld [smem:[%s9897_s0 + %s7993_s28]]   ;;  %s7997_s28 = smov 29  }
  0x2b   :  { %10001 = sst [smem:[#allocation68_spill]] %s8191_s17 }
  0x2c   :  { %10002 = sst [smem:[#allocation69_spill]] %s8196_s14 }
  0x2d   :  { %s8211_s17 = sld [smem:[%s9897_s0 + %s7994_s7]]   ;;  %s7998_s7 = smov 30  }
  0x2e   :  { %10003 = sst [smem:[#allocation70_spill]] %s8201_s3 }
  0x2f   :  { %s8216_s14 = sld [smem:[%s9897_s0 + %s7995_s15]]   ;;  %s7999_s15 = smov 31  }
  0x30   :  { %10004 = sst [smem:[#allocation71_spill]] %s8206_s19 }
  0x31   :  { %s8221_s13 = sld [smem:[%s9897_s0 + %s7996_s22]]   ;;  %s8000_s22 = smov 32  }
  0x32   :  { %s8226_s9 = sld [smem:[%s9897_s0 + %s7997_s28]]   ;;  %s8001_s28 = smov 33  }
  0x33   :  { %s8231_s5 = sld [smem:[%s9897_s0 + %s7998_s7]]   ;;  %s8002_s7 = smov 34  }
  0x34   :  { %s8241_s19 = sld [smem:[%s9897_s0 + %s8000_s22]]   ;;  %s8004_s22 = smov 36  }
  0x35   :  { %10005 = sst [smem:[#allocation72_spill]] %s8216_s14 }
  0x36   :  { %s8236_s14 = sld [smem:[%s9897_s0 + %s7999_s15]]   ;;  %s8003_s15 = smov 35  }
  0x37   :  { %s8251_s8 = sld [smem:[%s9897_s0 + %s8002_s7]]   ;;  %s8006_s7 = smov 38  }
  0x38   :  { %10006 = sst [smem:[#allocation73_spill]] %s8226_s9 }
  0x39   :  { %10007 = sst [smem:[#allocation74_spill]] %s8231_s5 }
  0x3a   :  { %10009 = sst [smem:[#allocation76_spill]] %s8241_s19 }
  0x3b   :  { %s8246_s9 = sld [smem:[%s9897_s0 + %s8001_s28]]   ;;  %s8005_s28 = smov 37  }
  0x3c   :  { %10008 = sst [smem:[#allocation75_spill]] %s8236_s14 }
  0x3d   :  { %10011 = sst [smem:[#allocation78_spill]] %s8251_s8 }
  0x3e   :  { %s8256_s14 = sld [smem:[%s9897_s0 + %s8003_s15]]   ;;  %s8007_s15 = smov 39  }
  0x3f   :  { %s8261_s19 = sld [smem:[%s9897_s0 + %s8004_s22]]   ;;  %s8008_s22 = smov 40  }
  0x40   :  { %s8271_s8 = sld [smem:[%s9897_s0 + %s8006_s7]]   ;;  %s8010_s7 = smov 42  }
  0x41   :  { %10010 = sst [smem:[#allocation77_spill]] %s8246_s9 }
  0x42   :  { %s8266_s9 = sld [smem:[%s9897_s0 + %s8005_s28]]   ;;  %s8009_s28 = smov 41  }
  0x43   :  { %s8286_s12 = sld [smem:[%s9897_s0 + %s8009_s28]]   ;;  %s8013_s28 = smov 45  }
  0x44   :  { %10012 = sst [smem:[#allocation79_spill]] %s8256_s14 }
  0x45   :  { %10013 = sst [smem:[#allocation80_spill]] %s8261_s19 }
  0x46   :  { %10015 = sst [smem:[#allocation82_spill]] %s8271_s8 }
  0x47   :  { %s8276_s14 = sld [smem:[%s9897_s0 + %s8007_s15]]   ;;  %s8011_s15 = smov 43  }
  0x48   :  { %10014 = sst [smem:[#allocation81_spill]] %s8266_s9 }
  0x49   :  { %s8281_s19 = sld [smem:[%s9897_s0 + %s8008_s22]]   ;;  %s8012_s22 = smov 44  }
  0x4a   :  { %10017 = sst [smem:[#allocation84_spill]] %s8286_s12 }
  0x4b   :  { %s8291_s8 = sld [smem:[%s9897_s0 + %s8010_s7]]   ;;  %s8014_s7 = smov 46  }
  0x4c   :  { %s8296_s27 = sld [smem:[%s9897_s0 + %s8011_s15]]   ;;  %s8015_s15 = smov 47  }
  0x4d   :  { %s8306_s12 = sld [smem:[%s9897_s0 + %s8013_s28]]   ;;  %s8017_s28 = smov 49  }
  0x4f   :  { %10016 = sst [smem:[#allocation83_spill]] %s8281_s19 }
  0x50   :  { %s8301_s19 = sld [smem:[%s9897_s0 + %s8012_s22]]   ;;  %s8016_s22 = smov 48  }
  0x51   :  { %10018 = sst [smem:[#allocation85_spill]] %s8291_s8 }
  0x52   :  { %10019 = sst [smem:[#allocation86_spill]] %s8296_s27 }
  0x53   :  { %10021 = sst [smem:[#allocation88_spill]] %s8306_s12 }
  0x54   :  { %s8311_s8 = sld [smem:[%s9897_s0 + %s8014_s7]]   ;;  %s8018_s7 = smov 50  }
  0x55   :  { %s8316_s27 = sld [smem:[%s9897_s0 + %s8015_s15]]   ;;  %s8019_s15 = smov 51  }
  0x56   :  { %10020 = sst [smem:[#allocation87_spill]] %s8301_s19 }
  0x57   :  { %s8321_s19 = sld [smem:[%s9897_s0 + %s8016_s22]]   ;;  %s8020_s22 = smov 52  }
  0x58   :  { %s8326_s12 = sld [smem:[%s9897_s0 + %s8017_s28]]   ;;  %s8021_s28 = smov 53  }
  0x5a   :  { %10022 = sst [smem:[#allocation89_spill]] %s8311_s8 }
  0x5b   :  { %10023 = sst [smem:[#allocation90_spill]] %s8316_s27 }
  0x5c   :  { %s8331_s8 = sld [smem:[%s9897_s0 + %s8018_s7]]   ;;  %s8022_s7 = smov 54  }
  0x5d   :  { %10024 = sst [smem:[#allocation91_spill]] %s8321_s19 }
  0x5e   :  { %10025 = sst [smem:[#allocation92_spill]] %s8326_s12 }
  0x5f   :  { %s8336_s27 = sld [smem:[%s9897_s0 + %s8019_s15]]   ;;  %s8023_s15 = smov 55  }
  0x60   :  { %s8341_s19 = sld [smem:[%s9897_s0 + %s8020_s22]]   ;;  %s8024_s22 = smov 56  }
  0x61   :  { %s8346_s12 = sld [smem:[%s9897_s0 + %s8021_s28]]   ;;  %s8025_s28 = smov 57  }
  0x62   :  { %10026 = sst [smem:[#allocation93_spill]] %s8331_s8 }
  0x63   :  { %s8351_s8 = sld [smem:[%s9897_s0 + %s8022_s7]]   ;;  %s8026_s7 = smov 58  }
  0x65   :  { %10027 = sst [smem:[#allocation94_spill]] %s8336_s27 }
  0x66   :  { %10028 = sst [smem:[#allocation95_spill]] %s8341_s19 }
  0x67   :  { %10029 = sst [smem:[#allocation96_spill]] %s8346_s12 }
  0x68   :  { %s8356_s27 = sld [smem:[%s9897_s0 + %s8023_s15]]   ;;  %s8027_s15 = smov 59  }
  0x69   :  { %10030 = sst [smem:[#allocation97_spill]] %s8351_s8 }
  0x6a   :  { %s8361_s19 = sld [smem:[%s9897_s0 + %s8024_s22]]   ;;  %s8028_s22 = smov 60  }
  0x6b   :  { %s8366_s12 = sld [smem:[%s9897_s0 + %s8025_s28]]   ;;  %s8029_s28 = smov 61  }
  0x6c   :  { %s8371_s8 = sld [smem:[%s9897_s0 + %s8026_s7]]   ;;  %s8030_s7 = smov 62  }
  0x6e   :  { %10031 = sst [smem:[#allocation98_spill]] %s8356_s27 }
  0x6f   :  { %s8376_s27 = sld [smem:[%s9897_s0 + %s8027_s15]]   ;;  %s8031_s15 = smov 63  }
  0x70   :  { %10032 = sst [smem:[#allocation99_spill]] %s8361_s19 }
  0x71   :  { %10033 = sst [smem:[#allocation100_spill]] %s8366_s12 }
  0x72   :  { %10034 = sst [smem:[#allocation101_spill]] %s8371_s8 }
  0x73   :  { %s8381_s19 = sld [smem:[%s9897_s0 + %s8028_s22]]   ;;  %s8032_s22 = smov 64  }
  0x74   :  { %s8386_s12 = sld [smem:[%s9897_s0 + %s8029_s28]]   ;;  %s8033_s28 = smov 65  }
  0x75   :  { %10035 = sst [smem:[#allocation102_spill]] %s8376_s27 }
  0x76   :  { %s8391_s8 = sld [smem:[%s9897_s0 + %s8030_s7]]   ;;  %s8034_s7 = smov 66  }
  0x77   :  { %s8396_s27 = sld [smem:[%s9897_s0 + %s8031_s15]]  }
  0x79   :  { %10036 = sst [smem:[#allocation103_spill]] %s8381_s19 }
  0x7a   :  { %10037 = sst [smem:[#allocation104_spill]] %s8386_s12 }
  0x7b   :  { %s8401_s19 = sld [smem:[%s9897_s0 + %s8032_s22]]  }
  0x7c   :  { %10038 = sst [smem:[#allocation105_spill]] %s8391_s8 }
  0x7d   :  { %s8406_s12 = sld [smem:[%s9897_s0 + %s8033_s28]]  }
  0x7e   :  { %s8411_s8 = sld [smem:[%s9897_s0 + %s8034_s7]]  }
  0x7f   :  { %138 = vsyncpa [#allocation3], 0 }
  0x80   :  { %139 = vsyncpa [#allocation5], 0 }
  0x81   :  { %140 = vsyncpa [#allocation8], 0 }
  0x82   :  { %141 = vsyncpa [#allocation11], 0 }
  0x83   :  { %142 = vsyncpa [#allocation14], 0 }
  0x84   :  { %143 = vsyncpa [#allocation17], 0 }
  0x85   :  { %144 = vsyncpa [#allocation20], 0 }
  0x86   :  { %145 = vsyncpa [#allocation23], 0 }
  0x87   :  { %146 = vsyncpa [#allocation26], 0 }
  0x88   :  { %147 = vsyncpa [#allocation29], 0 }
  0x89   :  { %148 = vsyncpa [#allocation32], 0 }
  0x8a   :  { %149 = vsyncpa [#allocation35], 0 }
  0x8b   :  { %150 = vsyncpa [#allocation38], 0  ;;  %s8413_s15 = smov 0  }
  0x8c LB: > { %s10039_s9 = sld [smem:[#allocation81_spill]]  ;;  %s8419_s0 = sadd.s32 4294967295, %s7967_s15   ;;  %s7967_s15 = sphi %s8413_s15, %s156_s15  }
  0x8d   : > { %s10040_s6 = sld [smem:[#allocation65_spill]]  ;;  %p6557_p0 = scmp.ge.s32.totalorder %s7967_s15, 1 }
  0x8e   : > { %s10041_s5 = sld [smem:[#allocation74_spill]]  ;;  %p1588_p1 = scmp.lt.s32.totalorder %s7967_s15, 3 }
  0x8f   : > { %s10042_s4 = sld [smem:[#allocation63_spill]] }
  0x90   : > { %s10043_s3 = sld [smem:[#allocation70_spill]]  ;;  %p8423_p2 = pnand %p6557_p0, %p1588_p1 }
  0x91   : > { %p6967_p3 = scmp.eq.s32.totalorder (!%p8423_p2), %s8419_s0, 0  ;;  %s1615_s18 = sshll.u32 (!%p8423_p2), %s8106_s25, 4  ;;  %s1616_s18 = int_to_ptr.hbm [resolvable:$true] %s1615_s18 }
  0x92   : > { %1592 = sbr.rel (%p8423_p2) target bundleno = 460 (0x1cc), region = 12  ;;  %s8035_s22 = smov (!%p8423_p2), [#allocation4]  }
  0x93   : > { %s1617_s23 = sshll.u32 (!%p8423_p2), %s8035_s22, 4  ;;  %s1651_s26 = sshll.u32 (!%p8423_p2), %s8136_s24, 4  ;;  %s1618_s23 = int_to_ptr.vmem [resolvable:$true] %s1617_s23  ;;  %s8432_s26 = int_to_ptr.hbm [resolvable:$true] %s1651_s26 }
  0x94   : > { %s7237_s28 = sshra.s32 (!%p8423_p2), %s1616_s18, 4  ;;  %s7243_s2 = scalar_lea.hbm (!%p8423_p2), %s8106_s25, 1  ;;  %s7238_s28 = int_to_ptr.hbm [resolvable:$true] %s7237_s28 }
  0x95   : > { %s7239_s1 = scalar_lea.hbm (!%p8423_p2), %s7238_s28, 1  ;;  %p7244_p7 = scmp.lt.s32.totalorder (!%p8423_p2), %s7238_s28, %s8106_s25 }
  0x96   : > { %p7240_p4 = scmp.ne.s32.totalorder (!%p8423_p2), %s7238_s28, %s7239_s1  ;;  %p7245_p8 = scmp.lt.s32.totalorder (!%p8423_p2), %s7243_s2, %s7239_s1 }
  0x98   : > { %p7241_p5 = pnand %p7240_p4, %p6967_p3  ;;  %p7246_p9 = por %p7245_p8, %p7244_p7 }
  0x9a   : > { %p7242_p6 = pneg %p7241_p5 }
  0x9c   : > { %p7247_p10 = pnand %p7246_p9, %p7242_p6 }
  0x9e   : > { %7250 = shalt.err (!%p7247_p10)
}
  0x9f   : > { %6874 = dma.hbm_to_vmem [thread:$0]  (%p6967_p3), %s1616_s18, 16, %s1618_s23, [#allocation5]  }
  0xa0   : > { %s1681_s7 = sshll.u32 %s8156_s20, 4  ;;  %s8036_s10 = smov [#allocation7]   ;;  %s8441_s7 = int_to_ptr.hbm [resolvable:$true] %s1681_s7 }
  0xa1   : > { %s1653_s11 = sshll.u32 %s8036_s10, 4  ;;  %s7265_s22 = sshra.s32 %s8432_s26, 4  ;;  %s1654_s11 = int_to_ptr.vmem [resolvable:$true] %s1653_s11  ;;  %s7266_s22 = int_to_ptr.hbm [resolvable:$true] %s7265_s22 }
  0xa2   : > { %s7267_s28 = scalar_lea.hbm %s7266_s22, 1  ;;  %s7271_s1 = scalar_lea.hbm %s8136_s24, 1 }
  0xa3   : > { %p7268_p11 = scmp.ne.s32.totalorder %s7266_s22, %s7267_s28  ;;  %p7272_p0 = scmp.lt.s32.totalorder %s7266_s22, %s8136_s24 }
  0xa4   : > { %p7273_p1 = scmp.lt.s32.totalorder %s7271_s1, %s7267_s28 }
  0xa5   : > { %p7269_p12 = pnand %p7268_p11, %p6967_p3 }
  0xa6   : > { %p7274_p4 = por %p7273_p1, %p7272_p0 }
  0xa7   : > { %p7270_p13 = pneg %p7269_p12 }
  0xa9   : > { %p7275_p5 = pnand %p7274_p4, %p7270_p13 }
  0xab   : > { %7278 = shalt.err (!%p7275_p5)
}
  0xac   : > { %6878 = dma.hbm_to_vmem [thread:$0]  (%p6967_p3), %s8432_s26, 16, %s1654_s11, [#allocation8]  }
  0xad   : > { %s8037_s18 = smov [#allocation10]   ;;  %s1705_s2 = sshll.u32 %s10042_s4, 4  ;;  %s8452_s2 = int_to_ptr.hbm [resolvable:$true] %s1705_s2 }
  0xae   : > { %s1683_s23 = sshll.u32 %s8037_s18, 4  ;;  %s7293_s10 = sshra.s32 %s8441_s7, 4  ;;  %s1684_s23 = int_to_ptr.vmem [resolvable:$true] %s1683_s23  ;;  %s7294_s10 = int_to_ptr.hbm [resolvable:$true] %s7293_s10 }
  0xaf   : > { %s7295_s22 = scalar_lea.hbm %s7294_s10, 4  ;;  %s7299_s28 = scalar_lea.hbm %s8156_s20, 4 }
  0xb0   : > { %p7296_p6 = scmp.ne.s32.totalorder %s7294_s10, %s7295_s22  ;;  %p7300_p9 = scmp.lt.s32.totalorder %s7294_s10, %s8156_s20 }
  0xb1   : > { %p7301_p10 = scmp.lt.s32.totalorder %s7299_s28, %s7295_s22 }
  0xb2   : > { %p7297_p7 = pnand %p7296_p6, %p6967_p3 }
  0xb3   : > { %p7302_p11 = por %p7301_p10, %p7300_p9 }
  0xb4   : > { %p7298_p8 = pneg %p7297_p7 }
  0xb6   : > { %p7303_p12 = pnand %p7302_p11, %p7298_p8 }
  0xb8   : > { %7306 = shalt.err (!%p7303_p12)
}
  0xb9   : > { %6882 = dma.hbm_to_vmem [thread:$0]  (%p6967_p3), %s8441_s7, 64, %s1684_s23, [#allocation11]  }
  0xba   : > { %s1729_s26 = sshll.u32 %s10040_s6, 4  ;;  %s8038_s11 = smov [#allocation13]   ;;  %s8463_s26 = int_to_ptr.hbm [resolvable:$true] %s1729_s26 }
  0xbb   : > { %s1707_s1 = sshll.u32 %s8038_s11, 4  ;;  %s7321_s18 = sshra.s32 %s8452_s2, 4  ;;  %s1708_s1 = int_to_ptr.vmem [resolvable:$true] %s1707_s1  ;;  %s7322_s18 = int_to_ptr.hbm [resolvable:$true] %s7321_s18 }
  0xbc   : > { %s7323_s10 = scalar_lea.hbm %s7322_s18, 4  ;;  %s7327_s22 = scalar_lea.hbm %s10042_s4, 4 }
  0xbd   : > { %p7324_p13 = scmp.ne.s32.totalorder %s7322_s18, %s7323_s10  ;;  %p7328_p4 = scmp.lt.s32.totalorder %s7322_s18, %s10042_s4 }
  0xbe   : > { %p7329_p5 = scmp.lt.s32.totalorder %s7327_s22, %s7323_s10 }
  0xbf   : > { %p7325_p0 = pnand %p7324_p13, %p6967_p3 }
  0xc0   : > { %p7330_p6 = por %p7329_p5, %p7328_p4 }
  0xc1   : > { %p7326_p1 = pneg %p7325_p0 }
  0xc3   : > { %p7331_p7 = pnand %p7330_p6, %p7326_p1 }
  0xc5   : > { %7334 = shalt.err (!%p7331_p7)
}
  0xc6   : > { %6886 = dma.hbm_to_vmem [thread:$0]  (%p6967_p3), %s8452_s2, 64, %s1708_s1, [#allocation14]  }
  0xc7   : > { %s8039_s7 = smov [#allocation16]   ;;  %s1762_s28 = sshll.u32 %s10043_s3, 4  ;;  %s8474_s28 = int_to_ptr.hbm [resolvable:$true] %s1762_s28 }
  0xc8   : > { %s1731_s23 = sshll.u32 %s8039_s7, 4  ;;  %s7349_s11 = sshra.s32 %s8463_s26, 4  ;;  %s1732_s23 = int_to_ptr.vmem [resolvable:$true] %s1731_s23  ;;  %s7350_s11 = int_to_ptr.hbm [resolvable:$true] %s7349_s11 }
  0xc9   : > { %s7351_s18 = scalar_lea.hbm %s7350_s11, 1  ;;  %s7355_s10 = scalar_lea.hbm %s10040_s6, 1 }
  0xca   : > { %p7352_p8 = scmp.ne.s32.totalorder %s7350_s11, %s7351_s18  ;;  %p7356_p11 = scmp.lt.s32.totalorder %s7350_s11, %s10040_s6 }
  0xcb   : > { %p7357_p12 = scmp.lt.s32.totalorder %s7355_s10, %s7351_s18 }
  0xcc   : > { %p7353_p9 = pnand %p7352_p8, %p6967_p3 }
  0xcd   : > { %p7358_p13 = por %p7357_p12, %p7356_p11 }
  0xce   : > { %p7354_p10 = pneg %p7353_p9 }
  0xd0   : > { %p7359_p0 = pnand %p7358_p13, %p7354_p10 }
  0xd2   : > { %7362 = shalt.err (!%p7359_p0)
}
  0xd3   : > { %6890 = dma.hbm_to_vmem [thread:$0]  (%p6967_p3), %s8463_s26, 16, %s1732_s23, [#allocation17]  }
  0xd4   : > { %s1786_s2 = sshll.u32 %s8211_s17, 4  ;;  %s8040_s1 = smov [#allocation19]   ;;  %s8485_s2 = int_to_ptr.hbm [resolvable:$true] %s1786_s2 }
  0xd5   : > { %s1764_s22 = sshll.u32 %s8040_s1, 4  ;;  %s7377_s7 = sshra.s32 %s8474_s28, 4  ;;  %s1765_s22 = int_to_ptr.vmem [resolvable:$true] %s1764_s22  ;;  %s7378_s7 = int_to_ptr.hbm [resolvable:$true] %s7377_s7 }
  0xd6   : > { %s7379_s11 = scalar_lea.hbm %s7378_s7, 4  ;;  %s7383_s18 = scalar_lea.hbm %s10043_s3, 4 }
  0xd7   : > { %p7380_p1 = scmp.ne.s32.totalorder %s7378_s7, %s7379_s11  ;;  %p7384_p6 = scmp.lt.s32.totalorder %s7378_s7, %s10043_s3 }
  0xd8   : > { %p7385_p7 = scmp.lt.s32.totalorder %s7383_s18, %s7379_s11 }
  0xd9   : > { %p7381_p4 = pnand %p7380_p1, %p6967_p3 }
  0xda   : > { %p7386_p8 = por %p7385_p7, %p7384_p6 }
  0xdb   : > { %p7382_p5 = pneg %p7381_p4 }
  0xdd   : > { %p7387_p9 = pnand %p7386_p8, %p7382_p5 }
  0xdf   : > { %7390 = shalt.err (!%p7387_p9)
}
  0xe0   : > { %6894 = dma.hbm_to_vmem [thread:$0]  (%p6967_p3), %s8474_s28, 64, %s1765_s22, [#allocation20]  }
  0xe1   : > { %s8041_s26 = smov [#allocation22]   ;;  %s1810_s10 = sshll.u32 %s8221_s13, 4  ;;  %s8496_s10 = int_to_ptr.hbm [resolvable:$true] %s1810_s10 }
  0xe2   : > { %s1788_s23 = sshll.u32 %s8041_s26, 4  ;;  %s7405_s1 = sshra.s32 %s8485_s2, 4  ;;  %s1789_s23 = int_to_ptr.vmem [resolvable:$true] %s1788_s23  ;;  %s7406_s1 = int_to_ptr.hbm [resolvable:$true] %s7405_s1 }
  0xe3   : > { %s7407_s7 = scalar_lea.hbm %s7406_s1, 4  ;;  %s7411_s11 = scalar_lea.hbm %s8211_s17, 4 }
  0xe4   : > { %p7408_p10 = scmp.ne.s32.totalorder %s7406_s1, %s7407_s7  ;;  %p7412_p13 = scmp.lt.s32.totalorder %s7406_s1, %s8211_s17 }
  0xe5   : > { %p7413_p0 = scmp.lt.s32.totalorder %s7411_s11, %s7407_s7 }
  0xe6   : > { %p7409_p11 = pnand %p7408_p10, %p6967_p3 }
  0xe7   : > { %p7414_p1 = por %p7413_p0, %p7412_p13 }
  0xe8   : > { %p7410_p12 = pneg %p7409_p11 }
  0xea   : > { %p7415_p4 = pnand %p7414_p1, %p7410_p12 }
  0xec   : > { %7418 = shalt.err (!%p7415_p4)
}
  0xed   : > { %6898 = dma.hbm_to_vmem [thread:$0]  (%p6967_p3), %s8485_s2, 64, %s1789_s23, [#allocation23]  }
  0xee   : > { %s8042_s28 = smov [#allocation25]   ;;  %s1835_s18 = sshll.u32 %s10041_s5, 4  ;;  %s1836_s18 = int_to_ptr.hbm [resolvable:$true] %s1835_s18 }
  0xef   : > { %s1812_s22 = sshll.u32 %s8042_s28, 4  ;;  %s7433_s26 = sshra.s32 %s8496_s10, 4  ;;  %s1813_s22 = int_to_ptr.vmem [resolvable:$true] %s1812_s22  ;;  %s7434_s26 = int_to_ptr.hbm [resolvable:$true] %s7433_s26 }
  0xf0   : > { %s7435_s1 = scalar_lea.hbm %s7434_s26, 1  ;;  %s7439_s7 = scalar_lea.hbm %s8221_s13, 1 }
  0xf1   : > { %p7436_p5 = scmp.ne.s32.totalorder %s7434_s26, %s7435_s1  ;;  %p7440_p8 = scmp.lt.s32.totalorder %s7434_s26, %s8221_s13 }
  0xf2   : > { %p7441_p9 = scmp.lt.s32.totalorder %s7439_s7, %s7435_s1 }
  0xf3   : > { %p7437_p6 = pnand %p7436_p5, %p6967_p3 }
  0xf4   : > { %p7442_p10 = por %p7441_p9, %p7440_p8 }
  0xf5   : > { %p7438_p7 = pneg %p7437_p6 }
  0xf7   : > { %p7443_p11 = pnand %p7442_p10, %p7438_p7 }
  0xf9   : > { %7446 = shalt.err (!%p7443_p11)
}
  0xfa   : > { %6902 = dma.hbm_to_vmem [thread:$0]  (%p6967_p3), %s8496_s10, 16, %s1813_s22, [#allocation26]  }
  0xfb   : > { %s8043_s2 = smov [#allocation28]   ;;  %s1877_s11 = sshll.u32 %s10039_s9, 4  ;;  %s8516_s11 = int_to_ptr.hbm [resolvable:$true] %s1877_s11 }
  0xfc   : > { %s1837_s23 = sshll.u32 %s8043_s2, 4  ;;  %s7461_s28 = sshra.s32 %s1836_s18, 4  ;;  %s1838_s23 = int_to_ptr.vmem [resolvable:$true] %s1837_s23  ;;  %s7462_s28 = int_to_ptr.hbm [resolvable:$true] %s7461_s28 }
  0xfd   : > { %s7463_s26 = scalar_lea.hbm %s7462_s28, 2  ;;  %s7467_s1 = scalar_lea.hbm %s10041_s5, 2 }
  0xfe   : > { %p7464_p12 = scmp.ne.s32.totalorder %s7462_s28, %s7463_s26  ;;  %p7468_p1 = scmp.lt.s32.totalorder %s7462_s28, %s10041_s5 }
  0xff   : > { %p7469_p4 = scmp.lt.s32.totalorder %s7467_s1, %s7463_s26 }
 0x100   : > { %p7465_p13 = pnand %p7464_p12, %p6967_p3 }
 0x101   : > { %p7470_p5 = por %p7469_p4, %p7468_p1 }
 0x102   : > { %p7466_p0 = pneg %p7465_p13 }
 0x104   : > { %p7471_p6 = pnand %p7470_p5, %p7466_p0 }
 0x106   : > { %7474 = shalt.err (!%p7471_p6)
}
 0x107   : > { %s9944_s10 = smov 16   ;;  %s9945_s22 = smov 1  }
 0x108   : > { %6906 = dma.hbm_to_vmem [thread:$0]  (%p6967_p3), %s1836_s18, 32, %s1838_s23, [#allocation29], %s9944_s10, %s9944_s10, %s9945_s22  }
 0x109   : > { %s1901_s7 = sshll.u32 %s8276_s14, 4  ;;  %s8046_s2 = smov [#allocation31]   ;;  %s8528_s7 = int_to_ptr.hbm [resolvable:$true] %s1901_s7 }
 0x10a   : > { %s1879_s28 = sshll.u32 %s8046_s2, 4  ;;  %s7489_s26 = sshra.s32 %s8516_s11, 4  ;;  %s1880_s28 = int_to_ptr.vmem [resolvable:$true] %s1879_s28  ;;  %s7490_s26 = int_to_ptr.hbm [resolvable:$true] %s7489_s26 }
 0x10b   : > { %s7491_s1 = scalar_lea.hbm %s7490_s26, 4  ;;  %s7495_s3 = scalar_lea.hbm %s10039_s9, 4 }
 0x10c   : > { %p7492_p7 = scmp.ne.s32.totalorder %s7490_s26, %s7491_s1  ;;  %p7496_p10 = scmp.lt.s32.totalorder %s7490_s26, %s10039_s9 }
 0x10d   : > { %p7497_p11 = scmp.lt.s32.totalorder %s7495_s3, %s7491_s1 }
 0x10e   : > { %p7493_p8 = pnand %p7492_p7, %p6967_p3 }
 0x10f   : > { %p7498_p12 = por %p7497_p11, %p7496_p10 }
 0x110   : > { %p7494_p9 = pneg %p7493_p8 }
 0x112   : > { %p7499_p13 = pnand %p7498_p12, %p7494_p9 }
 0x114   : > { %7502 = shalt.err (!%p7499_p13)
}
 0x115   : > { %6910 = dma.hbm_to_vmem [thread:$0]  (%p6967_p3), %s8516_s11, 64, %s1880_s28, [#allocation32]  }
 0x116   : > { %s8047_s18 = smov [#allocation34]   ;;  %s1603_s2 = sshll.u32 %s8101_s21, 4  ;;  %s1604_s2 = int_to_ptr.hbm [resolvable:$true] %s1603_s2 }
 0x117   : > { %s1903_s23 = sshll.u32 %s8047_s18, 4  ;;  %s7517_s10 = sshra.s32 %s8528_s7, 4  ;;  %s1904_s23 = int_to_ptr.vmem [resolvable:$true] %s1903_s23  ;;  %s7518_s10 = int_to_ptr.hbm [resolvable:$true] %s7517_s10 }
 0x118   : > { %s7519_s26 = scalar_lea.hbm %s7518_s10, 4  ;;  %s7523_s3 = scalar_lea.hbm %s8276_s14, 4 }
 0x119   : > { %p7520_p0 = scmp.ne.s32.totalorder %s7518_s10, %s7519_s26  ;;  %p7524_p5 = scmp.lt.s32.totalorder %s7518_s10, %s8276_s14 }
 0x11a   : > { %p7525_p6 = scmp.lt.s32.totalorder %s7523_s3, %s7519_s26 }
 0x11b   : > { %p7521_p1 = pnand %p7520_p0, %p6967_p3 }
 0x11c   : > { %p7526_p7 = por %p7525_p6, %p7524_p5 }
 0x11d   : > { %p7522_p4 = pneg %p7521_p1 }
 0x11f   : > { %p7527_p8 = pnand %p7526_p7, %p7522_p4 }
 0x121   : > { %7530 = shalt.err (!%p7527_p8)
}
 0x122   : > { %6914 = dma.hbm_to_vmem [thread:$0]  (%p6967_p3), %s8528_s7, 64, %s1904_s23, [#allocation35]  }
 0x123   : > { %s8048_s11 = smov [#allocation2]   ;;  %s1627_s1 = sshll.u32 %s8111_s29, 4  ;;  %s8548_s1 = int_to_ptr.hbm [resolvable:$true] %s1627_s1 }
 0x124   : > { %s1605_s28 = sshll.u32 %s8048_s11, 4  ;;  %s7545_s10 = sshra.s32 %s1604_s2, 4  ;;  %s1606_s28 = int_to_ptr.vmem [resolvable:$true] %s1605_s28  ;;  %s7546_s10 = int_to_ptr.hbm [resolvable:$true] %s7545_s10 }
 0x125   : > { %s7547_s18 = scalar_lea.hbm %s7546_s10, 1  ;;  %s7551_s26 = scalar_lea.hbm %s8101_s21, 1 }
 0x126   : > { %p7548_p9 = scmp.ne.s32.totalorder %s7546_s10, %s7547_s18  ;;  %p7552_p12 = scmp.lt.s32.totalorder %s7546_s10, %s8101_s21 }
 0x127   : > { %p7553_p13 = scmp.lt.s32.totalorder %s7551_s26, %s7547_s18 }
 0x128   : > { %p7549_p10 = pnand %p7548_p9, %p6967_p3 }
 0x129   : > { %p7554_p0 = por %p7553_p13, %p7552_p12 }
 0x12a   : > { %p7550_p11 = pneg %p7549_p10 }
 0x12c   : > { %p7555_p1 = pnand %p7554_p0, %p7550_p11 }
 0x12e   : > { %7558 = shalt.err (!%p7555_p1)
}
 0x12f   : > { %6872 = dma.hbm_to_vmem [thread:$0]  (%p6967_p3), %s1604_s2, 16, %s1606_s28, [#allocation3]  }
 0x130   : > { %s1663_s7 = sshll.u32 %s8141_s30, 4  ;;  %s8049_s23 = smov [#allocation6]   ;;  %s8557_s7 = int_to_ptr.hbm [resolvable:$true] %s1663_s7 }
 0x131   : > { %s1629_s3 = sshll.u32 %s8049_s23, 4  ;;  %s7573_s11 = sshra.s32 %s8548_s1, 4  ;;  %s1630_s3 = int_to_ptr.vmem [resolvable:$true] %s1629_s3  ;;  %s7574_s11 = int_to_ptr.hbm [resolvable:$true] %s7573_s11 }
 0x132   : > { %s7575_s10 = scalar_lea.hbm %s7574_s11, 1  ;;  %s7579_s18 = scalar_lea.hbm %s8111_s29, 1 }
 0x133   : > { %p7576_p4 = scmp.ne.s32.totalorder %s7574_s11, %s7575_s10  ;;  %p7580_p7 = scmp.lt.s32.totalorder %s7574_s11, %s8111_s29 }
 0x134   : > { %p7581_p8 = scmp.lt.s32.totalorder %s7579_s18, %s7575_s10 }
 0x135   : > { %p7577_p5 = pnand %p7576_p4, %p6967_p3 }
 0x136   : > { %p7582_p9 = por %p7581_p8, %p7580_p7 }
 0x137   : > { %p7578_p6 = pneg %p7577_p5 }
 0x139   : > { %p7583_p10 = pnand %p7582_p9, %p7578_p6 }
 0x13b   : > { %7586 = shalt.err (!%p7583_p10)
}
 0x13c   : > { %s10045_s2 = sld [smem:[#allocation62_spill]]  ;;  %s8050_s28 = smov [#allocation9]  }
 0x13d   : > { %6876 = dma.hbm_to_vmem [thread:$0]  (%p6967_p3), %s8548_s1, 16, %s1630_s3, [#allocation5]  }
 0x13e   : > { %s1665_s26 = sshll.u32 %s8050_s28, 4  ;;  %s7601_s11 = sshra.s32 %s8557_s7, 4  ;;  %s1666_s26 = int_to_ptr.vmem [resolvable:$true] %s1665_s26  ;;  %s7602_s11 = int_to_ptr.hbm [resolvable:$true] %s7601_s11 }
 0x13f   : > { %s7603_s10 = scalar_lea.hbm %s7602_s11, 1  ;;  %s7607_s18 = scalar_lea.hbm %s8141_s30, 1 }
 0x140   : > { %p7604_p11 = scmp.ne.s32.totalorder %s7602_s11, %s7603_s10  ;;  %p7608_p0 = scmp.lt.s32.totalorder %s7602_s11, %s8141_s30 }
 0x141   : > { %p7609_p1 = scmp.lt.s32.totalorder %s7607_s18, %s7603_s10 }
 0x142   : > { %s1693_s23 = sshll.u32 %s10045_s2, 4  ;;  %p7605_p12 = pnand %p7604_p11, %p6967_p3  ;;  %s8568_s23 = int_to_ptr.hbm [resolvable:$true] %s1693_s23 }
 0x143   : > { %p7610_p4 = por %p7609_p1, %p7608_p0 }
 0x144   : > { %p7606_p13 = pneg %p7605_p12 }
 0x146   : > { %p7611_p5 = pnand %p7610_p4, %p7606_p13 }
 0x148   : > { %7614 = shalt.err (!%p7611_p5)
}
 0x149   : > { %s10046_s1 = sld [smem:[#allocation64_spill]]  ;;  %s8051_s28 = smov [#allocation12]  }
 0x14a   : > { %6880 = dma.hbm_to_vmem [thread:$0]  (%p6967_p3), %s8557_s7, 16, %s1666_s26, [#allocation8]  }
 0x14b   : > { %s1695_s22 = sshll.u32 %s8051_s28, 4  ;;  %s7629_s11 = sshra.s32 %s8568_s23, 4  ;;  %s1696_s22 = int_to_ptr.vmem [resolvable:$true] %s1695_s22  ;;  %s7630_s11 = int_to_ptr.hbm [resolvable:$true] %s7629_s11 }
 0x14c   : > { %s7631_s10 = scalar_lea.hbm %s7630_s11, 4  ;;  %s7635_s18 = scalar_lea.hbm %s10045_s2, 4 }
 0x14d   : > { %p7632_p6 = scmp.ne.s32.totalorder %s7630_s11, %s7631_s10  ;;  %p7636_p9 = scmp.lt.s32.totalorder %s7630_s11, %s10045_s2 }
 0x14e   : > { %p7637_p10 = scmp.lt.s32.totalorder %s7635_s18, %s7631_s10 }
 0x14f   : > { %s1717_s3 = sshll.u32 %s10046_s1, 4  ;;  %p7633_p7 = pnand %p7632_p6, %p6967_p3  ;;  %s8579_s3 = int_to_ptr.hbm [resolvable:$true] %s1717_s3 }
 0x150   : > { %p7638_p11 = por %p7637_p10, %p7636_p9 }
 0x151   : > { %p7634_p8 = pneg %p7633_p7 }
 0x153   : > { %p7639_p12 = pnand %p7638_p11, %p7634_p8 }
 0x155   : > { %7642 = shalt.err (!%p7639_p12)
}
 0x156   : > { %s10047_s7 = sld [smem:[#allocation66_spill]]  ;;  %s8052_s26 = smov [#allocation15]  }
 0x157   : > { %6884 = dma.hbm_to_vmem [thread:$0]  (%p6967_p3), %s8568_s23, 64, %s1696_s22, [#allocation11]  }
 0x158   : > { %s1719_s28 = sshll.u32 %s8052_s26, 4  ;;  %s7657_s11 = sshra.s32 %s8579_s3, 4  ;;  %s1720_s28 = int_to_ptr.vmem [resolvable:$true] %s1719_s28  ;;  %s7658_s11 = int_to_ptr.hbm [resolvable:$true] %s7657_s11 }
 0x159   : > { %s7659_s10 = scalar_lea.hbm %s7658_s11, 4  ;;  %s7663_s18 = scalar_lea.hbm %s10046_s1, 4 }
 0x15a   : > { %p7660_p13 = scmp.ne.s32.totalorder %s7658_s11, %s7659_s10  ;;  %p7664_p4 = scmp.lt.s32.totalorder %s7658_s11, %s10046_s1 }
 0x15b   : > { %p7665_p5 = scmp.lt.s32.totalorder %s7663_s18, %s7659_s10 }
 0x15c   : > { %s1741_s4 = sshll.u32 %s10047_s7, 4  ;;  %p7661_p0 = pnand %p7660_p13, %p6967_p3  ;;  %s8590_s4 = int_to_ptr.hbm [resolvable:$true] %s1741_s4 }
 0x15d   : > { %p7666_p6 = por %p7665_p5, %p7664_p4 }
 0x15e   : > { %p7662_p1 = pneg %p7661_p0 }
 0x160   : > { %p7667_p7 = pnand %p7666_p6, %p7662_p1 }
 0x162   : > { %7670 = shalt.err (!%p7667_p7)
}
 0x163   : > { %s10048_s22 = sld [smem:[#allocation71_spill]]  ;;  %s8053_s26 = smov [#allocation18]  }
 0x164   : > { %6888 = dma.hbm_to_vmem [thread:$0]  (%p6967_p3), %s8579_s3, 64, %s1720_s28, [#allocation14]  }
 0x165   : > { %s1743_s2 = sshll.u32 %s8053_s26, 4  ;;  %s7685_s11 = sshra.s32 %s8590_s4, 4  ;;  %s1744_s2 = int_to_ptr.vmem [resolvable:$true] %s1743_s2  ;;  %s7686_s11 = int_to_ptr.hbm [resolvable:$true] %s7685_s11 }
 0x166   : > { %s7687_s10 = scalar_lea.hbm %s7686_s11, 1  ;;  %s7691_s18 = scalar_lea.hbm %s10047_s7, 1 }
 0x167   : > { %p7688_p8 = scmp.ne.s32.totalorder %s7686_s11, %s7687_s10  ;;  %p7692_p11 = scmp.lt.s32.totalorder %s7686_s11, %s10047_s7 }
 0x168   : > { %p7693_p12 = scmp.lt.s32.totalorder %s7691_s18, %s7687_s10 }
 0x169   : > { %s1774_s23 = sshll.u32 %s10048_s22, 4  ;;  %p7689_p9 = pnand %p7688_p8, %p6967_p3  ;;  %s8601_s23 = int_to_ptr.hbm [resolvable:$true] %s1774_s23 }
 0x16a   : > { %p7694_p13 = por %p7693_p12, %p7692_p11 }
 0x16b   : > { %p7690_p10 = pneg %p7689_p9 }
 0x16d   : > { %p7695_p0 = pnand %p7694_p13, %p7690_p10 }
 0x16f   : > { %7698 = shalt.err (!%p7695_p0)
}
 0x170   : > { %s10049_s3 = sld [smem:[#allocation72_spill]]  ;;  %s8054_s28 = smov [#allocation21]  }
 0x171   : > { %6892 = dma.hbm_to_vmem [thread:$0]  (%p6967_p3), %s8590_s4, 16, %s1744_s2, [#allocation17]  }
 0x172   : > { %s1776_s26 = sshll.u32 %s8054_s28, 4  ;;  %s7713_s11 = sshra.s32 %s8601_s23, 4  ;;  %s1777_s26 = int_to_ptr.vmem [resolvable:$true] %s1776_s26  ;;  %s7714_s11 = int_to_ptr.hbm [resolvable:$true] %s7713_s11 }
 0x173   : > { %s7715_s10 = scalar_lea.hbm %s7714_s11, 4  ;;  %s7719_s18 = scalar_lea.hbm %s10048_s22, 4 }
 0x174   : > { %p7716_p1 = scmp.ne.s32.totalorder %s7714_s11, %s7715_s10  ;;  %p7720_p6 = scmp.lt.s32.totalorder %s7714_s11, %s10048_s22 }
 0x175   : > { %p7721_p7 = scmp.lt.s32.totalorder %s7719_s18, %s7715_s10 }
 0x176   : > { %s1798_s1 = sshll.u32 %s10049_s3, 4  ;;  %p7717_p4 = pnand %p7716_p1, %p6967_p3  ;;  %s8612_s1 = int_to_ptr.hbm [resolvable:$true] %s1798_s1 }
 0x177   : > { %p7722_p8 = por %p7721_p7, %p7720_p6 }
 0x178   : > { %p7718_p5 = pneg %p7717_p4 }
 0x17a   : > { %p7723_p9 = pnand %p7722_p8, %p7718_p5 }
 0x17c   : > { %7726 = shalt.err (!%p7723_p9)
}
 0x17d   : > { %s10050_s4 = sld [smem:[#allocation73_spill]]  ;;  %s8055_s28 = smov [#allocation24]  }
 0x17e   : > { %6896 = dma.hbm_to_vmem [thread:$0]  (%p6967_p3), %s8601_s23, 64, %s1777_s26, [#allocation20]  }
 0x17f   : > { %s1800_s5 = sshll.u32 %s8055_s28, 4  ;;  %s7741_s11 = sshra.s32 %s8612_s1, 4  ;;  %s1801_s5 = int_to_ptr.vmem [resolvable:$true] %s1800_s5  ;;  %s7742_s11 = int_to_ptr.hbm [resolvable:$true] %s7741_s11 }
 0x180   : > { %s7743_s10 = scalar_lea.hbm %s7742_s11, 4  ;;  %s7747_s18 = scalar_lea.hbm %s10049_s3, 4 }
 0x181   : > { %p7744_p10 = scmp.ne.s32.totalorder %s7742_s11, %s7743_s10  ;;  %p7748_p13 = scmp.lt.s32.totalorder %s7742_s11, %s10049_s3 }
 0x182   : > { %p7749_p0 = scmp.lt.s32.totalorder %s7747_s18, %s7743_s10 }
 0x183   : > { %s1821_s2 = sshll.u32 %s10050_s4, 4  ;;  %p7745_p11 = pnand %p7744_p10, %p6967_p3  ;;  %s8623_s2 = int_to_ptr.hbm [resolvable:$true] %s1821_s2 }
 0x184   : > { %p7750_p1 = por %p7749_p0, %p7748_p13 }
 0x185   : > { %p7746_p12 = pneg %p7745_p11 }
 0x187   : > { %p7751_p4 = pnand %p7750_p1, %p7746_p12 }
 0x189   : > { %7754 = shalt.err (!%p7751_p4)
}
 0x18a   : > { %s10051_s23 = sld [smem:[#allocation75_spill]]  ;;  %s8056_s26 = smov [#allocation27]  }
 0x18b   : > { %6900 = dma.hbm_to_vmem [thread:$0]  (%p6967_p3), %s8612_s1, 64, %s1801_s5, [#allocation23]  }
 0x18c   : > { %s1823_s28 = sshll.u32 %s8056_s26, 4  ;;  %s7769_s11 = sshra.s32 %s8623_s2, 4  ;;  %s1824_s28 = int_to_ptr.vmem [resolvable:$true] %s1823_s28  ;;  %s7770_s11 = int_to_ptr.hbm [resolvable:$true] %s7769_s11 }
 0x18d   : > { %s7771_s10 = scalar_lea.hbm %s7770_s11, 2  ;;  %s7775_s18 = scalar_lea.hbm %s10050_s4, 2 }
 0x18e   : > { %p7772_p5 = scmp.ne.s32.totalorder %s7770_s11, %s7771_s10  ;;  %p7776_p8 = scmp.lt.s32.totalorder %s7770_s11, %s10050_s4 }
 0x18f   : > { %p7777_p9 = scmp.lt.s32.totalorder %s7775_s18, %s7771_s10 }
 0x190   : > { %s1850_s6 = sshll.u32 %s10051_s23, 4  ;;  %p7773_p6 = pnand %p7772_p5, %p6967_p3  ;;  %s8634_s6 = int_to_ptr.hbm [resolvable:$true] %s1850_s6 }
 0x191   : > { %p7778_p10 = por %p7777_p9, %p7776_p8 }
 0x192   : > { %p7774_p7 = pneg %p7773_p6 }
 0x194   : > { %p7779_p11 = pnand %p7778_p10, %p7774_p7 }
 0x196   : > { %7782 = shalt.err (!%p7779_p11)
}
 0x197   : > { %s10052_s5 = smov 1   ;;  %s10053_s1 = smov 16  }
 0x198   : > { %s10054_s26 = sld [smem:[#allocation82_spill]]  ;;  %s8057_s7 = smov [#allocation30]  }
 0x199   : > { %6904 = dma.hbm_to_vmem [thread:$0]  (%p6967_p3), %s8623_s2, 32, %s1824_s28, [#allocation26], %s10053_s1, %s10053_s1, %s10052_s5  }
 0x19a   : > { %s1852_s9 = sshll.u32 %s8057_s7, 4  ;;  %s7797_s11 = sshra.s32 %s8634_s6, 4  ;;  %s1853_s9 = int_to_ptr.vmem [resolvable:$true] %s1852_s9  ;;  %s7798_s11 = int_to_ptr.hbm [resolvable:$true] %s7797_s11 }
 0x19b   : > { %s7799_s10 = scalar_lea.hbm %s7798_s11, 1  ;;  %s7803_s18 = scalar_lea.hbm %s10051_s23, 1 }
 0x19c   : > { %p7800_p12 = scmp.ne.s32.totalorder %s7798_s11, %s7799_s10  ;;  %p7804_p1 = scmp.lt.s32.totalorder %s7798_s11, %s10051_s23 }
 0x19d   : > { %p7805_p4 = scmp.lt.s32.totalorder %s7803_s18, %s7799_s10 }
 0x19e   : > { %s1889_s3 = sshll.u32 %s10054_s26, 4  ;;  %p7801_p13 = pnand %p7800_p12, %p6967_p3  ;;  %s8648_s3 = int_to_ptr.hbm [resolvable:$true] %s1889_s3 }
 0x19f   : > { %p7806_p5 = por %p7805_p4, %p7804_p1 }
 0x1a0   : > { %p7802_p0 = pneg %p7801_p13 }
 0x1a2   : > { %p7807_p6 = pnand %p7806_p5, %p7802_p0 }
 0x1a4   : > { %7810 = shalt.err (!%p7807_p6)
}
 0x1a5   : > { %s10055_s7 = sld [smem:[#allocation83_spill]]  ;;  %s8058_s2 = smov [#allocation33]  }
 0x1a6   : > { %6908 = dma.hbm_to_vmem [thread:$0]  (%p6967_p3), %s8634_s6, 16, %s1853_s9, [#allocation29]  }
 0x1a7   : > { %s1891_s28 = sshll.u32 %s8058_s2, 4  ;;  %s7825_s1 = sshra.s32 %s8648_s3, 4  ;;  %s1892_s28 = int_to_ptr.vmem [resolvable:$true] %s1891_s28  ;;  %s7826_s1 = int_to_ptr.hbm [resolvable:$true] %s7825_s1 }
 0x1a8   : > { %s7827_s11 = scalar_lea.hbm %s7826_s1, 4  ;;  %s7831_s10 = scalar_lea.hbm %s10054_s26, 4 }
 0x1a9   : > { %p7828_p7 = scmp.ne.s32.totalorder %s7826_s1, %s7827_s11  ;;  %p7832_p10 = scmp.lt.s32.totalorder %s7826_s1, %s10054_s26 }
 0x1aa   : > { %p7833_p11 = scmp.lt.s32.totalorder %s7831_s10, %s7827_s11 }
 0x1ab   : > { %s1913_s5 = sshll.u32 %s10055_s7, 4  ;;  %p7829_p8 = pnand %p7828_p7, %p6967_p3  ;;  %s8659_s5 = int_to_ptr.hbm [resolvable:$true] %s1913_s5 }
 0x1ac   : > { %p7834_p12 = por %p7833_p11, %p7832_p10 }
 0x1ad   : > { %p7830_p9 = pneg %p7829_p8 }
 0x1af   : > { %p7835_p13 = pnand %p7834_p12, %p7830_p9 }
 0x1b1   : > { %7838 = shalt.err (!%p7835_p13)
}
 0x1b2   : > { %s10056_s9 = sld [smem:[#allocation92_spill]]  ;;  %s8059_s18 = smov [#allocation36]  }
 0x1b3   : > { %6912 = dma.hbm_to_vmem [thread:$0]  (%p6967_p3), %s8648_s3, 64, %s1892_s28, [#allocation32]  }
 0x1b4   : > { %s1915_s2 = sshll.u32 %s8059_s18, 4  ;;  %s7853_s1 = sshra.s32 %s8659_s5, 4  ;;  %s1916_s2 = int_to_ptr.vmem [resolvable:$true] %s1915_s2  ;;  %s7854_s1 = int_to_ptr.hbm [resolvable:$true] %s7853_s1 }
 0x1b5   : > { %s7855_s11 = scalar_lea.hbm %s7854_s1, 4  ;;  %s7859_s10 = scalar_lea.hbm %s10055_s7, 4 }
 0x1b6   : > { %p7856_p0 = scmp.ne.s32.totalorder %s7854_s1, %s7855_s11  ;;  %p7860_p5 = scmp.lt.s32.totalorder %s7854_s1, %s10055_s7 }
 0x1b7   : > { %p7861_p6 = scmp.lt.s32.totalorder %s7859_s10, %s7855_s11 }
 0x1b8   : > { %s1949_s6 = sshll.u32 %s10056_s9, 4  ;;  %p7857_p1 = pnand %p7856_p0, %p6967_p3  ;;  %s8670_s6 = int_to_ptr.hbm [resolvable:$true] %s1949_s6 }
 0x1b9   : > { %p7862_p7 = por %p7861_p6, %p7860_p5 }
 0x1ba   : > { %p7858_p4 = pneg %p7857_p1 }
 0x1bc   : > { %p7863_p8 = pnand %p7862_p7, %p7858_p4 }
 0x1be   : > { %7866 = shalt.err (!%p7863_p8)
}
 0x1bf   : > { %6916 = dma.hbm_to_vmem [thread:$0]  (%p6967_p3), %s8659_s5, 64, %s1916_s2, [#allocation35]  }
 0x1c0   : > { %s8060_s3 = smov [#allocation37]   ;;  %s7881_s18 = sshra.s32 %s8670_s6, 4  ;;  %s7882_s18 = int_to_ptr.hbm [resolvable:$true] %s7881_s18 }
 0x1c1   : > { %s1951_s28 = sshll.u32 %s8060_s3, 4  ;;  %s7883_s4 = scalar_lea.hbm %s7882_s18, 1  ;;  %s1952_s28 = int_to_ptr.vmem [resolvable:$true] %s1951_s28 }
 0x1c2   : > { %p7884_p9 = scmp.ne.s32.totalorder %s7882_s18, %s7883_s4  ;;  %s7887_s1 = scalar_lea.hbm %s10056_s9, 1 }
 0x1c3   : > { %p7888_p12 = scmp.lt.s32.totalorder %s7882_s18, %s10056_s9  ;;  %p7889_p13 = scmp.lt.s32.totalorder %s7887_s1, %s7883_s4 }
 0x1c4   : > { %p7885_p10 = pnand %p7884_p9, %p6967_p3 }
 0x1c5   : > { %p7890_p0 = por %p7889_p13, %p7888_p12 }
 0x1c6   : > { %p7886_p11 = pneg %p7885_p10 }
 0x1c8   : > { %p7891_p1 = pnand %p7890_p0, %p7886_p11 }
 0x1ca   : > { %7894 = shalt.err (!%p7891_p1)
}
 0x1cb   : > { %6918 = dma.hbm_to_vmem [thread:$0]  (%p6967_p3), %s8670_s6, 16, %s1952_s28, [#allocation38]  }
 0x1cc PF: > { %2036 = sbr.rel (%p8423_p2) target bundleno = 8117 (0x1fb5), region = 284  ;;  %p6991_p4 = scmp.eq.s32.totalorder (!%p8423_p2), %s8419_s0, 0 }
 0x1d1   : > { %7914 = dma.done.wait (%p6991_p4), [#allocation3], 16  }
 0x1d2   : > { %7916 = vsyncadd (%p6991_p4), [#allocation3], 4294967280 }
 0x1d3   : > { %7918 = dma.done.wait (%p6991_p4), [#allocation5], 32  }
 0x1d4   : > { %7920 = vsyncadd (%p6991_p4), [#allocation5], 4294967264 }
 0x1d5   : > { %7922 = dma.done.wait (%p6991_p4), [#allocation8], 32  }
 0x1d6   : > { %7924 = vsyncadd (%p6991_p4), [#allocation8], 4294967264 }
 0x1d7   : > { %7926 = dma.done.wait (%p6991_p4), [#allocation11], 128  }
 0x1d8   : > { %7928 = vsyncadd (%p6991_p4), [#allocation11], 4294967168 }
 0x1d9   : > { %7930 = dma.done.wait (%p6991_p4), [#allocation14], 128  }
 0x1da   : > { %7932 = vsyncadd (%p6991_p4), [#allocation14], 4294967168 }
 0x1db   : > { %7934 = dma.done.wait (%p6991_p4), [#allocation17], 32  }
 0x1dc   : > { %7936 = vsyncadd (%p6991_p4), [#allocation17], 4294967264 }
 0x1dd   : > { %7938 = dma.done.wait (%p6991_p4), [#allocation20], 128  }
 0x1de   : > { %7940 = vsyncadd (%p6991_p4), [#allocation20], 4294967168 }
 0x1df   : > { %7942 = dma.done.wait (%p6991_p4), [#allocation23], 128  }
 0x1e0   : > { %7944 = vsyncadd (%p6991_p4), [#allocation23], 4294967168 }
 0x1e1   : > { %7946 = dma.done.wait (%p6991_p4), [#allocation26], 48  }
 0x1e2   : > { %7948 = vsyncadd (%p6991_p4), [#allocation26], 4294967248 }
 0x1e3   : > { %7950 = dma.done.wait (%p6991_p4), [#allocation29], 48  }
 0x1e4   : > { %7952 = vsyncadd (%p6991_p4), [#allocation29], 4294967248 }
 0x1e5   : > { %7954 = dma.done.wait (%p6991_p4), [#allocation32], 128  }
 0x1e6   : > { %7956 = vsyncadd (%p6991_p4), [#allocation32], 4294967168 }
 0x1e7   : > { %7958 = dma.done.wait (%p6991_p4), [#allocation35], 128  }
 0x1e8   : > { %7960 = vsyncadd (%p6991_p4), [#allocation35], 4294967168 }
 0x1e9   : > { %7962 = dma.done.wait (%p6991_p4), [#allocation38], 16  }
 0x1ea   : > { %7964 = vsyncadd (%p6991_p4), [#allocation38], 4294967280  ;;  %s10057_s16 = sld [smem:[#allocation52_spill]]  ;;  %p2311_p2 = scmp.lt.s32.totalorder %s8419_s0, 1  ;;  %vm2372_vm0 = vcmask 130048   ;;  %vm2409_vm1 = vcmask 1043456  }
 0x1eb   : > { %s10058_s4 = sld [smem:[#allocation97_spill]]  ;;  %v2370_v6 = vld [vmem:[#allocation19] sm:$0xf]  ;;  %v2369_v7 = vld [vmem:[#allocation22] sm:$0xf]  ;;  %vm2402_vm2 = vcmask 31744  }
 0x1ec   : > { %s10059_s5 = sld [smem:[#allocation95_spill]]  ;;  %s10101_s0 = smov (!%p2311_p2, %s8419_s0), 1  ;;  %6870 = vmatpush.msk.msra.mxu1 %vm2409_vm1, %v2370_v6  ;;  %6620 = vmatpush.msk.msra.mxu2 %vm2409_vm1, %v2369_v7  ;;  %v2371_v8 = vld [vmem:[#allocation21] sm:$0xf]  ;;  %v2533_v9 = vld [vmem:[#allocation24] sm:$0x7] }
 0x1ed   : > { %s8748_s6 = sshll.u32 %s10101_s0, 4  ;;  %s10060_s11 = sld [smem:[#allocation53_spill]]  ;;  %vm2541_vm3 = vcmask 1042432   ;;  %vm2534_vm4 = vcmask 23552   ;;  %vm2599_vm5 = vcmask 261120   ;;  %vm3139_vm6 = vcmask 523264  }
 0x1ee   : > { %6625 = vmatpush.msk.msrb.mxu1 %vm2409_vm1, %v2371_v8  ;;  %s10061_s10 = sld [smem:[#allocation79_spill]]  ;;  %6628 = vmatpush.msk.msrb.mxu2 %vm2541_vm3, %v2533_v9  ;;  %v7127_v41 = vld [vmem:[#allocation28] ss:$0 sm:$0xff]  ;;  %v8797_v45 = vld [vmem:[#allocation36] sm:$0xf]  ;;  %s10073_s7 = smov 32  }
 0x1ef   : > { %s10062_s28 = sld [smem:[#allocation80_spill]]  ;;  %v8801_v46 = vld [vmem:[#allocation33] sm:$0xf] }
 0x1f0   : > { %s8752_s2 = scalar_lea.vmem %s10057_s16, %s8748_s6  ;;  %s10063_s18 = sld [smem:[#allocation102_spill]] }
 0x1f1   : > { %v2364_v0 = vld [vmem:[%s8752_s2 + $0x8] sm:$0xff]  ;;  %v2363_v1 = vld [vmem:[%s8752_s2] sm:$0xff]  ;;  %s10064_s1 = sld [smem:[#allocation91_spill]] }
 0x1f2   : > { %2393 = vmatpush.msra.mxu0 %v2364_v0  ;;  %2488 = vmatpush.msra.mxu3 %v2364_v0  ;;  %v2365_v2 = vld [vmem:[%s10058_s4] sm:$0xff]  ;;  %v2366_v4 = vld [vmem:[%s10058_s4 + $0x8] sm:$0xff]  ;;  %s10065_s16 = sld [smem:[#allocation88_spill]] }
 0x1f3   : > { %v2367_v3 = vld [vmem:[%s10059_s5] sm:$0xff]  ;;  %v2368_v5 = vld [vmem:[%s10059_s5 + $0x8] sm:$0xff]  ;;  %6619 = vmatmul.msk.f32.vlgmr.msra.gmra.mxu1 %vm2402_vm2, %v2364_v0  ;;  %s2320_s3 = scalar_lea.vmem %s10060_s11, %s8748_s6  ;;  %s9956_s11 = smov 32  }
 0x1f4   : > { %2394 = vmatpush.msra.mxu0 %v2363_v1  ;;  %2489 = vmatpush.msra.mxu3 %v2363_v1  ;;  %v2531_v14 = vld [vmem:[%s2320_s3] sm:$0xff]  ;;  %v2532_v15 = vld [vmem:[%s2320_s3 + $0x8] sm:$0xff]  ;;  %v2581_v16 = vld [vmem:[%s10061_s10 + $0x18] sm:$0xff]  ;;  %s10066_s3 = sld [smem:[#allocation85_spill]] }
 0x1f5   : > { %6615 = vmatmul.msk.f32.vlgmr.msra.gmra.mxu0 %vm2372_vm0, %v2365_v2  ;;  %6623 = vmatmul.msk.f32.vlgmr.msra.gmra.mxu3 %vm2372_vm0, %v2367_v3  ;;  %v2580_v17 = vld [vmem:[%s10061_s10 + $0x10] sm:$0xff]  ;;  %v2579_v18 = vld [vmem:[%s10061_s10 + $0x8] sm:$0xff]  ;;  %v2578_v19 = vld [vmem:[%s10061_s10] sm:$0xff]  ;;  %s10067_s4 = sld [smem:[#allocation78_spill]] }
 0x1f6   : > { %6617 = vmatpush.msk.msrb.mxu0 %vm2409_vm1, %v2370_v6  ;;  %v2589_v34 = vld [vmem:[%s10062_s28 + $0x30] sm:$0xff]  ;;  %v2590_v35 = vld [vmem:[%s10062_s28 + $0x38] sm:$0xff]  ;;  %v2587_v36 = vld [vmem:[%s10062_s28 + $0x20] sm:$0xff]  ;;  %s10071_s5 = sld [smem:[#allocation77_spill]] }
 0x1f7   : > { %2690 = vmatpush.msra.mxu1 %v2589_v34  ;;  %v2588_v37 = vld [vmem:[%s10062_s28 + $0x28] sm:$0xff]  ;;  %v2585_v38 = vld [vmem:[%s10062_s28 + $0x10] sm:$0xff]  ;;  %v2586_v39 = vld [vmem:[%s10062_s28 + $0x18] sm:$0xff]  ;;  %s10076_s9 = sld [smem:[#allocation94_spill]] }
 0x1f8   : > { %2618 = vmatpush.msra.mxu0 %v2581_v16  ;;  %v2583_v47 = vld [vmem:[%s10062_s28] sm:$0xff]  ;;  %v2584_v48 = vld [vmem:[%s10062_s28 + $0x8] sm:$0xff]  ;;  %v8808_v49 = vld [vmem:[%s10063_s18 + $0x78] sm:$0xff] }
 0x1f9   : > { %2691 = vmatpush.msra.mxu1 %v2587_v36  ;;  %v8811_v50 = vld [vmem:[%s10063_s18 + $0x70] sm:$0xff]  ;;  %v8815_v51 = vld [vmem:[%s10063_s18 + $0xf8] sm:$0xff]  ;;  %v8818_v52 = vld [vmem:[%s10063_s18 + $0x68] sm:$0xff] }
 0x1fa   : > { %2619 = vmatpush.msra.mxu0 %v2580_v17  ;;  %v8822_v53 = vld [vmem:[%s10063_s18 + $0xf0] sm:$0xff]  ;;  %v8826_v54 = vld [vmem:[%s10063_s18 + $0xe8] sm:$0xff]  ;;  %v8829_v55 = vld [vmem:[%s10063_s18 + $0x60] sm:$0xff] }
 0x1fb   : > { %2692 = vmatpush.msra.mxu1 %v2585_v38  ;;  %v8834_v56 = vld [vmem:[%s10063_s18 + $0xe0] sm:$0xff]  ;;  %v8837_v57 = vld [vmem:[%s10063_s18 + $0x58] sm:$0xff]  ;;  %v8845_v59 = vld [vmem:[%s10063_s18 + $0x50] sm:$0xff] }
 0x1fc   : > { %2620 = vmatpush.msra.mxu0 %v2579_v18  ;;  %v8842_v58 = vld [vmem:[%s10063_s18 + $0xd8] sm:$0xff]  ;;  %v8850_v60 = vld [vmem:[%s10063_s18 + $0xd0] sm:$0xff]  ;;  %v8853_v61 = vld [vmem:[%s10063_s18 + $0x48] sm:$0xff] }
 0x1fd   : > { %6616 = vmatmul.msk.f32.gmra.mxu0 %vm2372_vm0, %v2366_v4  ;;  %6624 = vmatmul.msk.f32.gmra.mxu3 %vm2372_vm0, %v2368_v5  ;;  %v8858_v62 = vld [vmem:[%s10063_s18 + $0xc8] sm:$0xff]  ;;  %v8861_v63 = vld [vmem:[%s10064_s1] sm:$0xff]  ;;  %v8873_v2 = vld [vmem:[%s10063_s18 + $0x38] sm:$0xff]  ;;  %s9958_s1 = smov 96  }
 0x1fe   : > { %2621 = vmatpush.msra.mxu0 %v2578_v19  ;;  %2693 = vmatpush.msra.mxu1 %v2583_v47  ;;  %v8864_v0 = vld [vmem:[%s10063_s18 + $0x40] sm:$0xff]  ;;  %2719 = vst [vmem:[#allocation1] ss:$2 sm:$0xff] %v8861_v63  ;;  %v8878_v3 = vld [vmem:[%s10063_s18 + $0xb8] sm:$0xff]  ;;  %v8881_v4 = vld [vmem:[%s10063_s18 + $0x30] sm:$0xff] }
 0x1ff   : > { %v8886_v5 = vld [vmem:[%s10063_s18 + $0xb0] sm:$0xff]  ;;  %v8889_v6 = vld [vmem:[%s10063_s18 + $0x28] sm:$0xff]  ;;  %v8897_v8 = vld [vmem:[%s10063_s18 + $0x20] sm:$0xff] }
 0x200   : > { %v8894_v7 = vld [vmem:[%s10063_s18 + $0xa8] sm:$0xff]  ;;  %v8949_v16 = vld [vmem:[%s10063_s18] sm:$0xff]  ;;  %v8952_v17 = vld [vmem:[%s10063_s18 + $0x98] sm:$0xff] }
 0x201   : > { %v8960_v19 = vld [vmem:[%s10063_s18 + $0x90] sm:$0xff] }
 0x205   : > { %6618 = vmatmul.msk.f32.vlgmr.msrb.gmra.mxu0 %vm2402_vm2, %v2363_v1  ;;  %v8870_v1 = vld [vmem:[%s10063_s18 + $0xc0] sm:$0xff]  ;;  %v2721_v18 = vld.sshfl [vmem:[#allocation1 + $0x8] sm:$0xff pattern:$0x75316420] }
 0x206   : > { %2726 = vmatpush.msrb.mxu0 %v8808_v49 }
 0x208   : > { %2727 = vmatpush.msrb.mxu0 %v8811_v50 }
 0x20a   : > { %2728 = vmatpush.msrb.mxu0 %v8818_v52 }
 0x20c   : > { %2729 = vmatpush.msrb.mxu0 %v8829_v55 }
 0x20e   : > { %2730 = vmatpush.msrb.mxu0 %v8837_v57 }
 0x210   : > { %2731 = vmatpush.msrb.mxu0 %v8845_v59 }
 0x212   : > { %2732 = vmatpush.msrb.mxu0 %v8853_v61 }
 0x214   : > { %2733 = vmatpush.msrb.mxu0 %v8864_v0 }
 0x216   : > { %2734 = vmatpush.msrb.mxu0 %v8873_v2 }
 0x218   : > { %2735 = vmatpush.msrb.mxu0 %v8881_v4 }
 0x21a   : > { %2736 = vmatpush.msrb.mxu0 %v8889_v6 }
 0x21c   : > { %2737 = vmatpush.msrb.mxu0 %v8897_v8 }
 0x270   : > { %v2433_v20 = vpop.f32.mrf.mxu1 }
 0x272   : > { %v2396_v10 = vpop.f32.mrf.mxu0 }
 0x273   : > { %6621 = vmatmul.msk.f32.vlgmr.msra.gmra.mxu2 %vm2402_vm2, %v2396_v10  ;;  %v8904_v10 = vld [vmem:[%s10063_s18 + $0x18] sm:$0xff] }
 0x274   : > { %2710 = vmatpush.msra.mxu2 %v2590_v35  ;;  %2738 = vmatpush.msrb.mxu0 %v8904_v10 }
 0x276   : > { %2711 = vmatpush.msra.mxu2 %v2588_v37 }
 0x278   : > { %v2491_v11 = vpop.f32.mrf.mxu3  ;;  %2712 = vmatpush.msra.mxu2 %v2586_v39 }
 0x279   : > { %6626 = vmatmul.msk.f32.vlgmr.msrb.gmra.mxu1 %vm2402_vm2, %v2491_v11  ;;  %v8911_v11 = vld [vmem:[%s10063_s18 + $0x10] sm:$0xff] }
 0x27a   : > { %v2399_v12 = vpop.f32.mrf.mxu0  ;;  %2713 = vmatpush.msra.mxu2 %v2584_v48  ;;  %2781 = vmatpush.msrb.mxu1 %v2589_v34 }
 0x27b   : > { %6622 = vmatmul.msk.f32.gmra.mxu2 %vm2402_vm2, %v2399_v12  ;;  %2739 = vmatpush.msrb.mxu0 %v8911_v11 }
 0x27c   : > { %2782 = vmatpush.msrb.mxu1 %v2587_v36 }
 0x27e   : > { %2783 = vmatpush.msrb.mxu1 %v2585_v38 }
 0x280   : > { %v2494_v13 = vpop.f32.mrf.mxu3  ;;  %2784 = vmatpush.msrb.mxu1 %v2583_v47  ;;  %v8987_v47 = vld [vmem:[%s10065_s16 + $0x8] sm:$0xff] }
 0x281   : > { %6627 = vmatmul.msk.f32.gmra.mxu1 %vm2402_vm2, %v2494_v13  ;;  %v2720_v13 = vld.sshfl [vmem:[#allocation1] sm:$0xff pattern:$0x75316420] }
 0x282   : > { %v2430_v22 = vpop.f32.mrf.mxu0  ;;  %2809 = vst [vmem:[#allocation1] ss:$2 sm:$0xff] %v8861_v63 }
 0x283   : > { %6629 = vmatmul.msk.f32.vlgmr.msrb.gmra.mxu2 %vm2534_vm4, %v2531_v14  ;;  %v8941_v14 = vld [vmem:[%s10063_s18 + $0x8] sm:$0xff] }
 0x284   : > { %2801 = vmatpush.msrb.mxu2 %v2590_v35  ;;  %2740 = vmatpush.msrb.mxu0 %v8941_v14 }
 0x286   : > { %2802 = vmatpush.msrb.mxu2 %v2588_v37  ;;  %2741 = vmatpush.msrb.mxu0 %v8949_v16 }
 0x288   : > { %2803 = vmatpush.msrb.mxu2 %v2586_v39 }
 0x28a   : > { %2804 = vmatpush.msrb.mxu2 %v2584_v48  ;;  %v8992_v48 = vld [vmem:[%s10066_s3] sm:$0xff] }
 0x28b   : > { %6630 = vmatmul.msk.f32.gmra.mxu2 %vm2534_vm4, %v2532_v15  ;;  %v8944_v15 = vld [vmem:[%s10063_s18 + $0xa0] sm:$0xff] }
 0x2f6   : > { %v2462_v21 = vpop.f32.mrf.mxu2  ;;  %v2523_v24 = vpop.f32.mrf.mxu1 }
 0x2f7   : > { %v2463_v25 = vadd.f32 %v2462_v21, %v2430_v22  ;;  %v8971_v21 = vld [vmem:[%s10063_s18 + $0x80] sm:$0xff] }
 0x2f8   : > { %v2810_v22 = vld.sshfl [vmem:[#allocation1] sm:$0xff pattern:$0x75316420] }
 0x2f9   : > { %v2529_v26 = vadd.f32 %v2523_v24, %v2463_v25 }
 0x2fe   : > { %v2465_v23 = vpop.f32.mrf.mxu2  ;;  %v2526_v30 = vpop.f32.mrf.mxu1 }
 0x2ff   : > { %v2466_v29 = vadd.f32 %v2465_v23, %v2433_v20  ;;  %v8966_v20 = vld [vmem:[%s10063_s18 + $0x88] sm:$0xff] }
 0x300   : > { %v2811_v23 = vld.sshfl [vmem:[#allocation1 + $0x8] sm:$0xff pattern:$0x75316420] }
 0x301   : > { %v2530_v31 = vadd.f32 %v2526_v30, %v2466_v29  ;;  %3332 = vst [vmem:[#allocation1] ss:$2 sm:$0xff] %v8861_v63 }
 0x306   : > { %v2562_v27 = vpop.f32.mrf.mxu2 }
 0x307   : > { %v8783_v28 = vadd.f32 %v2562_v27, %v2529_v26 }
 0x309   : > { %6631 = vmatmul.msk.f32.vlgmr.msra.gmra.mxu0 %vm2599_vm5, %v8783_v28 }
 0x30e   : > { %v2565_v32 = vpop.f32.mrf.mxu2 }
 0x30f   : > { %v8787_v33 = vadd.f32 %v2565_v32, %v2530_v31 }
 0x311   : > { %6632 = vmatmul.msk.f32.gmra.mxu0 %vm2599_vm5, %v8787_v33 }
 0x386   : > { %v2623_v40 = vpop.f32.mrf.mxu0 }
 0x387   : > { %v2624_v44 = vadd.f32 %v7127_v41, %v2623_v40 }
 0x38e   : > { %v2626_v42 = vpop.f32.mrf.mxu0 }
 0x38f   : > { %v2627_v43 = vadd.f32 %v7127_v41, %v2626_v42 }
 0x391   : > { %2646 = vmatpush.msrb.mxu3 %v2627_v43 }
 0x393   : > { %2647 = vmatpush.msrb.mxu3 %v2624_v44 }
 0x394   : > { %6633 = vmatmul.msk.f32.vlgmr.msrb.gmra.mxu3 %vm2372_vm0, %v8797_v45 }
 0x395   : > { %2669 = vmatpush.msra.mxu3 %v2627_v43 }
 0x397   : > { %2670 = vmatpush.msra.mxu3 %v2624_v44  ;;  %v8981_v44 = vld [vmem:[%s10065_s16] sm:$0xff] }
 0x399   : > { %2746 = vmatpush.msrb.mxu3 %v8815_v51 }
 0x39b   : > { %2747 = vmatpush.msrb.mxu3 %v8822_v53 }
 0x39c   : > { %6634 = vmatmul.msk.f32.vlgmr.msra.gmra.mxu3 %vm2372_vm0, %v8801_v46 }
 0x39d   : > { %2748 = vmatpush.msrb.mxu3 %v8826_v54 }
 0x39f   : > { %2749 = vmatpush.msrb.mxu3 %v8834_v56 }
 0x3a1   : > { %2750 = vmatpush.msrb.mxu3 %v8842_v58 }
 0x3a3   : > { %2751 = vmatpush.msrb.mxu3 %v8850_v60 }
 0x3a5   : > { %2752 = vmatpush.msrb.mxu3 %v8858_v62 }
 0x3a7   : > { %2753 = vmatpush.msrb.mxu3 %v8870_v1 }
 0x3a9   : > { %2754 = vmatpush.msrb.mxu3 %v8878_v3 }
 0x3ab   : > { %2755 = vmatpush.msrb.mxu3 %v8886_v5 }
 0x3ad   : > { %2756 = vmatpush.msrb.mxu3 %v8894_v7 }
 0x3af   : > { %2757 = vmatpush.msrb.mxu3 %v8944_v15 }
 0x3b1   : > { %2758 = vmatpush.msrb.mxu3 %v8952_v17 }
 0x3b3   : > { %2759 = vmatpush.msrb.mxu3 %v8960_v19 }
 0x3b5   : > { %2760 = vmatpush.msrb.mxu3 %v8966_v20 }
 0x3b7   : > { %2761 = vmatpush.msrb.mxu3 %v8971_v21 }
 0x417   : > { %v2649_v9 = vpop.f32.mrf.mxu3 }
 0x418   : > { %6635 = vmatmul.msk.f32.vlgmr.msra.gmra.mxu1 %vm2599_vm5, %v2649_v9  ;;  %6636 = vmatmul.msk.f32.vlgmr.msra.gmra.mxu2 %vm2599_vm5, %v2649_v9 }
 0x419   : > { %2816 = vmatpush.msra.mxu1 %v8808_v49  ;;  %2836 = vmatpush.msra.mxu2 %v8815_v51 }
 0x41b   : > { %2817 = vmatpush.msra.mxu1 %v8811_v50  ;;  %2837 = vmatpush.msra.mxu2 %v8822_v53 }
 0x41d   : > { %2818 = vmatpush.msra.mxu1 %v8818_v52  ;;  %2838 = vmatpush.msra.mxu2 %v8826_v54 }
 0x41f   : > { %v2672_v12 = vpop.f32.mrf.mxu3  ;;  %2819 = vmatpush.msra.mxu1 %v8829_v55  ;;  %2839 = vmatpush.msra.mxu2 %v8834_v56 }
 0x420   : > { %6637 = vmatmul.msk.f32.vlgmr.msrb.gmra.mxu1 %vm2599_vm5, %v2672_v12  ;;  %6638 = vmatmul.msk.f32.vlgmr.msrb.gmra.mxu2 %vm2599_vm5, %v2672_v12  ;;  %v8998_v12 = vld [vmem:[%s10066_s3 + $0x8] sm:$0xff]  ;;  %s10070_s3 = sld [smem:[#allocation98_spill]] }
 0x421   : > { %2820 = vmatpush.msra.mxu1 %v8837_v57  ;;  %2840 = vmatpush.msra.mxu2 %v8842_v58 }
 0x423   : > { %2821 = vmatpush.msra.mxu1 %v8845_v59  ;;  %2841 = vmatpush.msra.mxu2 %v8850_v60 }
 0x425   : > { %2822 = vmatpush.msra.mxu1 %v8853_v61  ;;  %2842 = vmatpush.msra.mxu2 %v8858_v62 }
 0x427   : > { %2823 = vmatpush.msra.mxu1 %v8864_v0  ;;  %2843 = vmatpush.msra.mxu2 %v8870_v1 }
 0x429   : > { %2824 = vmatpush.msra.mxu1 %v8873_v2  ;;  %2844 = vmatpush.msra.mxu2 %v8878_v3 }
 0x42b   : > { %2825 = vmatpush.msra.mxu1 %v8881_v4  ;;  %2845 = vmatpush.msra.mxu2 %v8886_v5 }
 0x42d   : > { %2826 = vmatpush.msra.mxu1 %v8889_v6  ;;  %2846 = vmatpush.msra.mxu2 %v8894_v7 }
 0x42f   : > { %2827 = vmatpush.msra.mxu1 %v8897_v8  ;;  %2847 = vmatpush.msra.mxu2 %v8944_v15 }
 0x431   : > { %2828 = vmatpush.msra.mxu1 %v8904_v10  ;;  %2848 = vmatpush.msra.mxu2 %v8952_v17 }
 0x433   : > { %2829 = vmatpush.msra.mxu1 %v8911_v11  ;;  %2849 = vmatpush.msra.mxu2 %v8960_v19 }
 0x435   : > { %2830 = vmatpush.msra.mxu1 %v8941_v14  ;;  %2850 = vmatpush.msra.mxu2 %v8966_v20 }
 0x437   : > { %2831 = vmatpush.msra.mxu1 %v8949_v16  ;;  %2851 = vmatpush.msra.mxu2 %v8971_v21 }
 0x495   : > { %v2695_v24 = vpop.f32.mrf.mxu1 }
 0x496   : > { %v2724_v25 = vmul.f32 %v2720_v13, %v2695_v24  ;;  %v2594_v13 = vld [vmem:[%s10067_s4 + $0x18] sm:$0xff] }
 0x498   : > { %2742 = vmatmul.f32.vlgmr.msrb.gmra.mxu0 %v2724_v25 }
 0x49b   : > { %v2715_v26 = vpop.f32.mrf.mxu2 }
 0x49c   : > { %v2725_v27 = vmul.f32 %v2721_v18, %v2715_v26 }
 0x49d   : > { %v2786_v29 = vpop.f32.mrf.mxu1 }
 0x49e   : > { %v2814_v30 = vmul.f32 %v2810_v22, %v2786_v29  ;;  %2762 = vmatmul.f32.vlgmr.msrb.gmra.mxu3 %v2725_v27 }
 0x4a0   : > { %2832 = vmatmul.f32.vlgmr.msra.gmra.mxu1 %v2814_v30 }
 0x4a3   : > { %v2806_v31 = vpop.f32.mrf.mxu2 }
 0x4a4   : > { %v2815_v32 = vmul.f32 %v2811_v23, %v2806_v31 }
 0x4a6   : > { %2852 = vmatmul.f32.vlgmr.msra.gmra.mxu2 %v2815_v32  ;;  %v2593_v32 = vld [vmem:[%s10067_s4 + $0x10] sm:$0xff] }
 0x515   : > { %v2743_v38 = vpop.f32.mrf.mxu0 }
 0x51d   : > { %v2833_v34 = vpop.f32.mrf.mxu1 }
 0x521   : > { %v2763_v37 = vpop.f32.mrf.mxu3 }
 0x522   : > { %v2764_v39 = vadd.f32 %v2763_v37, %v2743_v38 }
 0x529   : > { %v2853_v35 = vpop.f32.mrf.mxu2 }
 0x52a   : > { %v2854_v36 = vadd.f32 %v2853_v35, %v2833_v34  ;;  %v2592_v34 = vld [vmem:[%s10067_s4 + $0x8] sm:$0xff]  ;;  %v2591_v35 = vld [vmem:[%s10067_s4] sm:$0xff] }
 0x52b   : > { %2988 = vmatpush.msrb.mxu1 %v2592_v34 }
 0x52c   : > { %2861 = vrot.lane.b32.xlu0 %v2854_v36, %s9956_s11  ;;  %s10068_s11 = sld [smem:[#allocation101_spill]] }
 0x52d   : > { %2989 = vmatpush.msrb.mxu1 %v2591_v35  ;;  %v9040_v35 = vld [vmem:[%s10070_s3] sm:$0xff] }
 0x532   : > { %v9008_v27 = vld [vmem:[%s10068_s11 + $0x10] sm:$0xff]  ;;  %v9011_v29 = vld [vmem:[%s10068_s11] sm:$0xff]  ;;  %v9018_v30 = vld [vmem:[%s10068_s11 + $0x18] sm:$0xff] }
 0x533   : > { %v9021_v31 = vld [vmem:[%s10068_s11 + $0x8] sm:$0xff]  ;;  %s10093_s11 = sld [smem:[#allocation57_spill]] }
 0x534   : > { %2857 = vrot.lane.b32.xlu0 %v2854_v36, %s9958_s1 }
 0x59e   : > { %v2862_v40 = vpop.permute.xlu0 %2861 }
 0x59f   : > { %v2864_v41 = vadd.f32 %v2862_v40, %v2764_v39 }
 0x5a1   : > { %2866 = vrot.lane.b32.xlu1 %v2864_v41, %s9958_s1  ;;  %s10069_s1 = sld [smem:[#allocation76_spill]] }
 0x5a6   : > { %v2858_v42 = vpop.permute.xlu0 %2857 }
 0x5a7   : > { %v2860_v43 = vsub.f32 %v2764_v39, %v2858_v42  ;;  %v3099_v41 = vld [vmem:[%s10069_s1 + $0x18] sm:$0xff]  ;;  %v3098_v42 = vld [vmem:[%s10069_s1 + $0x10] sm:$0xff] }
 0x5a8   : > { %3118 = vmatpush.msra.mxu1 %v3099_v41  ;;  %v3133_v41 = vld [vmem:[%s10071_s5 + $0x10] sm:$0xff] }
 0x5a9   : > { %6642 = vmatpush.msk.msra.mxu3 %vm2409_vm1, %v2860_v43  ;;  %v3097_v43 = vld [vmem:[%s10069_s1 + $0x8] sm:$0xff] }
 0x5aa   : > { %6643 = vmatmul.msk.f32.vlgmr.msra.gmra.mxu3 %vm2402_vm2, %v8981_v44  ;;  %3119 = vmatpush.msra.mxu1 %v3098_v42 }
 0x5ab   : > { %3054 = vmatpush.msrb.mxu3 %v2594_v13  ;;  %v7128_v13 = vld [vmem:[#allocation27] ss:$0 sm:$0xff] }
 0x5ac   : > { %3120 = vmatpush.msra.mxu1 %v3097_v43 }
 0x5ad   : > { %3055 = vmatpush.msrb.mxu3 %v2593_v32 }
 0x5b2   : > { %6644 = vmatmul.msk.f32.gmra.mxu3 %vm2402_vm2, %v8987_v47 }
 0x613   : > { %v2867_v9 = vpop.permute.xlu1 %2866 }
 0x614   : > { %6639 = vmatpush.msk.msra.mxu0 %vm2409_vm1, %v2867_v9 }
 0x615   : > { %6640 = vmatmul.msk.f32.vlgmr.msra.gmra.mxu0 %vm2402_vm2, %v8992_v48 }
 0x61d   : > { %6641 = vmatmul.msk.f32.gmra.mxu0 %vm2402_vm2, %v8998_v12 }
 0x62d   : > { %v2925_v18 = vpop.f32.mrf.mxu3 }
 0x635   : > { %v2928_v23 = vpop.f32.mrf.mxu3 }
 0x692   : > { %v2893_v22 = vpop.f32.mrf.mxu0 }
 0x693   : > { %v2926_v26 = vadd.f32 %v2925_v18, %v2893_v22 }
 0x69a   : > { %v2896_v24 = vpop.f32.mrf.mxu0 }
 0x69b   : > { %v2929_v25 = vadd.f32 %v2928_v23, %v2896_v24 }
 0x69d   : > { %6645 = vmatpush.xpose.msk.msrb.mxu0 %vm2599_vm5, %v2929_v25  ;;  %6653 = vmatpush.xpose.msk.msrb.mxu2 %vm2599_vm5, %v2929_v25 }
 0x6a1   : > { %6646 = vmatpush.xpose.msk.msrb.mxu0 %vm2599_vm5, %v2926_v26  ;;  %6654 = vmatpush.xpose.msk.msrb.mxu2 %vm2599_vm5, %v2926_v26 }
 0x6a4   : > { %6655 = vmatmul.msk.f32.vlgmr.msrb.gmra.mxu2 %vm2599_vm5, %v9008_v27  ;;  %6647 = vmatmul.msk.f32.vlgmr.msrb.gmra.mxu0 %vm2599_vm5, %v9011_v29 }
 0x6ac   : > { %6656 = vmatmul.msk.f32.gmra.mxu2 %vm2599_vm5, %v9018_v30  ;;  %6648 = vmatmul.msk.f32.gmra.mxu0 %vm2599_vm5, %v9021_v31 }
 0x721   : > { %v2962_v36 = vpop.f32.mrf.mxu0 }
 0x722   : > { %6649 = vmatmul.msk.f32.vlgmr.msrb.gmra.mxu1 %vm2372_vm0, %v2962_v36  ;;  %v9045_v36 = vld [vmem:[%s10070_s3 + $0x8] sm:$0xff]  ;;  %s10072_s3 = smov 96  }
 0x727   : > { %v3028_v37 = vpop.f32.mrf.mxu2 }
 0x728   : > { %6657 = vmatmul.msk.f32.vlgmr.msrb.gmra.mxu3 %vm2372_vm0, %v3028_v37  ;;  %v3096_v37 = vld [vmem:[%s10069_s1] sm:$0xff] }
 0x729   : > { %v2965_v38 = vpop.f32.mrf.mxu0  ;;  %3121 = vmatpush.msra.mxu1 %v3096_v37 }
 0x72a   : > { %6650 = vmatmul.msk.f32.gmra.mxu1 %vm2372_vm0, %v2965_v38  ;;  %v3138_v38 = vld [vmem:[%s10071_s5 + $0x38] sm:$0xff] }
 0x72b   : > { %3154 = vmatpush.msra.mxu2 %v3138_v38 }
 0x72f   : > { %v3031_v39 = vpop.f32.mrf.mxu2 }
 0x730   : > { %6658 = vmatmul.msk.f32.gmra.mxu3 %vm2372_vm0, %v3031_v39  ;;  %v3135_v39 = vld [vmem:[%s10071_s5 + $0x20] sm:$0xff] }
 0x79f   : > { %v2991_v40 = vpop.f32.mrf.mxu1 }
 0x7a0   : > { %v3000_v22 = vadd.f32 %v7128_v13, %v2991_v40  ;;  %v3134_v40 = vld [vmem:[%s10071_s5 + $0x18] sm:$0xff] }
 0x7a7   : > { %v2994_v18 = vpop.f32.mrf.mxu1 }
 0x7a8   : > { %v3001_v23 = vadd.f32 %v7128_v13, %v2994_v18  ;;  %v3131_v13 = vld [vmem:[%s10071_s5] sm:$0xff] }
 0x7ab   : > { %v3057_v9 = vpop.f32.mrf.mxu3 }
 0x7ac   : > { %v3063_v25 = vadd.f32 %v3057_v9, %v3000_v22  ;;  %v3132_v9 = vld [vmem:[%s10071_s5 + $0x8] sm:$0xff] }
 0x7ae   : > { %v3065_v34 = vadd.f32 %v3063_v25, %v8783_v28  ;;  %v3136_v28 = vld [vmem:[%s10071_s5 + $0x28] sm:$0xff]  ;;  %v6670_v25 = vld [vmem:[%s10061_s10 + $0x38] sm:$0xff] }
 0x7b3   : > { %v3060_v24 = vpop.f32.mrf.mxu3 }
 0x7b4   : > { %v3064_v26 = vadd.f32 %v3060_v24, %v3001_v23 }
 0x7b6   : > { %v3066_v32 = vadd.f32 %v3064_v26, %v8787_v33  ;;  %v3137_v33 = vld [vmem:[%s10071_s5 + $0x30] sm:$0xff] }
 0x7b7   : > { %3155 = vmatpush.msra.mxu2 %v3137_v33  ;;  %v6669_v26 = vld [vmem:[%s10061_s10 + $0x30] sm:$0xff] }
 0x7b8   : > { %3087 = vmatpush.msra.mxu0 %v3066_v32  ;;  %v6668_v32 = vld [vmem:[%s10061_s10 + $0x28] sm:$0xff] }
 0x7b9   : > { %3156 = vmatpush.msra.mxu2 %v3136_v28  ;;  %v6667_v28 = vld [vmem:[%s10061_s10 + $0x20] sm:$0xff]  ;;  %s10078_s10 = sld [smem:[#allocation68_spill]] }
 0x7ba   : > { %3088 = vmatpush.msra.mxu0 %v3065_v34 }
 0x7bb   : > { %6659 = vmatmul.msk.f32.vlgmr.msra.gmra.mxu0 %vm2372_vm0, %v9040_v35  ;;  %3157 = vmatpush.msra.mxu2 %v3135_v39 }
 0x7bc   : > { %3238 = vmatpush.msrb.mxu0 %v6670_v25  ;;  %v6676_v25 = vld [vmem:[%s10062_s28 + $0x68] sm:$0xff] }
 0x7bd   : > { %3158 = vmatpush.msra.mxu2 %v3134_v40 }
 0x7be   : > { %3239 = vmatpush.msrb.mxu0 %v6669_v26  ;;  %v6674_v26 = vld [vmem:[%s10062_s28 + $0x58] sm:$0xff] }
 0x7bf   : > { %3159 = vmatpush.msra.mxu2 %v3133_v41  ;;  %v6677_v41 = vld [vmem:[%s10062_s28 + $0x70] sm:$0xff] }
 0x7c0   : > { %3240 = vmatpush.msrb.mxu0 %v6668_v32 }
 0x7c1   : > { %3160 = vmatpush.msra.mxu2 %v3132_v9 }
 0x7c2   : > { %3241 = vmatpush.msrb.mxu0 %v6667_v28 }
 0x7c3   : > { %6660 = vmatmul.msk.f32.gmra.mxu0 %vm2372_vm0, %v9045_v36  ;;  %3161 = vmatpush.msra.mxu2 %v3131_v13  ;;  %v7129_v13 = vld [vmem:[#allocation28 + $0x1] ss:$0 sm:$0xff] }
 0x7c4   : > { %3339 = vmatpush.msra.mxu0 %v8808_v49 }
 0x7c6   : > { %3340 = vmatpush.msra.mxu0 %v8811_v50 }
 0x7c8   : > { %3341 = vmatpush.msra.mxu0 %v8818_v52 }
 0x7ca   : > { %3342 = vmatpush.msra.mxu0 %v8829_v55 }
 0x7cc   : > { %3343 = vmatpush.msra.mxu0 %v8837_v57 }
 0x7ce   : > { %3344 = vmatpush.msra.mxu0 %v8845_v59 }
 0x7d0   : > { %3345 = vmatpush.msra.mxu0 %v8853_v61 }
 0x7d2   : > { %3346 = vmatpush.msra.mxu0 %v8864_v0 }
 0x7d4   : > { %3347 = vmatpush.msra.mxu0 %v8873_v2 }
 0x7d6   : > { %3348 = vmatpush.msra.mxu0 %v8881_v4 }
 0x7d8   : > { %3349 = vmatpush.msra.mxu0 %v8889_v6 }
 0x7da   : > { %3350 = vmatpush.msra.mxu0 %v8897_v8 }
 0x7dc   : > { %3351 = vmatpush.msra.mxu0 %v8904_v10 }
 0x7de   : > { %3352 = vmatpush.msra.mxu0 %v8911_v11 }
 0x7e0   : > { %3353 = vmatpush.msra.mxu0 %v8941_v14 }
 0x7e2   : > { %3354 = vmatpush.msra.mxu0 %v8949_v16 }
 0x838   : > { %v3090_v42 = vpop.f32.mrf.mxu0 }
 0x839   : > { %6661 = vmatmul.msk.f32.vlgmr.msra.gmra.mxu1 %vm2599_vm5, %v3090_v42 }
 0x840   : > { %v3093_v43 = vpop.f32.mrf.mxu0 }
 0x841   : > { %6662 = vmatmul.msk.f32.gmra.mxu1 %vm2599_vm5, %v3093_v43 }
 0x8b6   : > { %v3123_v18 = vpop.f32.mrf.mxu1 }
 0x8b7   : > { %v3129_v22 = vmax.f32 %v3123_v18, 0.0 }
 0x8b9   : > { %6663 = vmatmul.msk.f32.vlgmr.msra.gmra.mxu2 %vm3139_vm6, %v3129_v22 }
 0x8be   : > { %v3126_v23 = vpop.f32.mrf.mxu1 }
 0x8bf   : > { %v3130_v24 = vmax.f32 %v3126_v23, 0.0 }
 0x8c1   : > { %6664 = vmatmul.msk.f32.gmra.mxu2 %vm3139_vm6, %v3130_v24  ;;  %v6678_v24 = vld [vmem:[%s10062_s28 + $0x78] sm:$0xff] }
 0x93c   : > { %v3163_v34 = vpop.f32.mrf.mxu2 }
 0x93d   : > { %v3169_v33 = vadd.f32 %v3163_v34, %v3090_v42  ;;  %v6675_v42 = vld [vmem:[%s10062_s28 + $0x60] sm:$0xff] }
 0x944   : > { %v3166_v37 = vpop.f32.mrf.mxu2 }
 0x945   : > { %v3170_v38 = vadd.f32 %v3166_v37, %v3093_v43  ;;  %v6673_v43 = vld [vmem:[%s10062_s28 + $0x50] sm:$0xff] }
 0x947   : > { %3185 = vmatpush.msra.mxu3 %v3170_v38  ;;  %v6713_v38 = vld [vmem:[%s10069_s1 + $0x30] sm:$0xff] }
 0x949   : > { %3186 = vmatpush.msra.mxu3 %v3169_v33  ;;  %v6712_v33 = vld [vmem:[%s10069_s1 + $0x28] sm:$0xff] }
 0x94a   : > { %6665 = vmatmul.msk.f32.vlgmr.msra.gmra.mxu3 %vm2372_vm0, %v9040_v35 }
 0x94b   : > { %3304 = vmatpush.msrb.mxu3 %v6677_v41 }
 0x94d   : > { %3305 = vmatpush.msrb.mxu3 %v6675_v42 }
 0x94f   : > { %3306 = vmatpush.msrb.mxu3 %v6673_v43 }
 0x952   : > { %6666 = vmatmul.msk.f32.gmra.mxu3 %vm2372_vm0, %v9045_v36 }
 0x9cd   : > { %v9085_v39 = vpop.f32.mrf.mxu3 }
 0x9ce   : > { %6683 = vmatmul.msk.f32.vlgmr.msrb.gmra.mxu0 %vm2599_vm5, %v9085_v39 }
 0x9d5   : > { %v9090_v40 = vpop.f32.mrf.mxu3 }
 0x9d6   : > { %6684 = vmatmul.msk.f32.gmra.mxu0 %vm2599_vm5, %v9090_v40 }
 0xa4b   : > { %v3243_v9 = vpop.f32.mrf.mxu0 }
 0xa4c   : > { %v3244_v23 = vadd.f32 %v7129_v13, %v3243_v9 }
 0xa53   : > { %v3246_v18 = vpop.f32.mrf.mxu0 }
 0xa54   : > { %v3247_v22 = vadd.f32 %v7129_v13, %v3246_v18 }
 0xa56   : > { %3263 = vmatpush.msrb.mxu1 %v3247_v22  ;;  %3283 = vmatpush.msrb.mxu2 %v3247_v22 }
 0xa58   : > { %3264 = vmatpush.msrb.mxu1 %v3244_v23  ;;  %3284 = vmatpush.msrb.mxu2 %v3244_v23 }
 0xa59   : > { %6685 = vmatmul.msk.f32.vlgmr.msrb.gmra.mxu1 %vm2372_vm0, %v8797_v45  ;;  %6686 = vmatmul.msk.f32.vlgmr.msrb.gmra.mxu2 %vm2372_vm0, %v8801_v46  ;;  %v6671_v45 = vld [vmem:[%s10062_s28 + $0x40] sm:$0xff]  ;;  %v6672_v46 = vld [vmem:[%s10062_s28 + $0x48] sm:$0xff] }
 0xa5a   : > { %3324 = vmatpush.msra.mxu1 %v6678_v24  ;;  %3359 = vmatpush.msra.mxu2 %v8815_v51 }
 0xa5b   : > { %3307 = vmatpush.msrb.mxu3 %v6671_v45 }
 0xa5c   : > { %3325 = vmatpush.msra.mxu1 %v6676_v25  ;;  %3360 = vmatpush.msra.mxu2 %v8822_v53 }
 0xa5d   : > { %3394 = vmatpush.msra.mxu3 %v6677_v41 }
 0xa5e   : > { %3326 = vmatpush.msra.mxu1 %v6674_v26  ;;  %3361 = vmatpush.msra.mxu2 %v8826_v54 }
 0xa5f   : > { %3395 = vmatpush.msra.mxu3 %v6675_v42  ;;  %v7130_v42 = vld [vmem:[#allocation27 + $0x1] ss:$0 sm:$0xff] }
 0xa60   : > { %3362 = vmatpush.msra.mxu2 %v8834_v56  ;;  %3327 = vmatpush.msra.mxu1 %v6672_v46 }
 0xa61   : > { %3396 = vmatpush.msra.mxu3 %v6673_v43 }
 0xa62   : > { %3363 = vmatpush.msra.mxu2 %v8842_v58  ;;  %3414 = vmatpush.msrb.mxu1 %v6678_v24 }
 0xa63   : > { %3397 = vmatpush.msra.mxu3 %v6671_v45  ;;  %v7160_v45 = vld [vmem:[%s8752_s2] sm:$0xff] }
 0xa64   : > { %3364 = vmatpush.msra.mxu2 %v8850_v60  ;;  %3415 = vmatpush.msrb.mxu1 %v6676_v25 }
 0xa66   : > { %3365 = vmatpush.msra.mxu2 %v8858_v62  ;;  %3416 = vmatpush.msrb.mxu1 %v6674_v26  ;;  %v7159_v26 = vld [vmem:[%s8752_s2 + $0x8] sm:$0xff] }
 0xa68   : > { %3366 = vmatpush.msra.mxu2 %v8870_v1  ;;  %3417 = vmatpush.msrb.mxu1 %v6672_v46  ;;  %v6724_v46 = vld [vmem:[%s10071_s5 + $0x78] sm:$0xff] }
 0xa6a   : > { %3367 = vmatpush.msra.mxu2 %v8878_v3 }
 0xa6c   : > { %3368 = vmatpush.msra.mxu2 %v8886_v5 }
 0xa6e   : > { %3369 = vmatpush.msra.mxu2 %v8894_v7 }
 0xa70   : > { %3370 = vmatpush.msra.mxu2 %v8944_v15 }
 0xa72   : > { %3371 = vmatpush.msra.mxu2 %v8952_v17 }
 0xa74   : > { %3372 = vmatpush.msra.mxu2 %v8960_v19 }
 0xa76   : > { %3373 = vmatpush.msra.mxu2 %v8966_v20 }
 0xa78   : > { %3374 = vmatpush.msra.mxu2 %v8971_v21 }
 0xad6   : > { %v3266_v32 = vpop.f32.mrf.mxu1 }
 0xad7   : > { %6687 = vmatmul.msk.f32.vlgmr.msrb.gmra.mxu3 %vm2599_vm5, %v3266_v32  ;;  %6688 = vmatmul.msk.f32.vlgmr.msra.gmra.mxu1 %vm2599_vm5, %v3266_v32  ;;  %v6723_v32 = vld [vmem:[%s10071_s5 + $0x70] sm:$0xff] }
 0xad8   : > { %3449 = vmatpush.msra.mxu1 %v8815_v51  ;;  %3429 = vmatpush.msrb.mxu3 %v8808_v49  ;;  %v3334_v49 = vld.sshfl [vmem:[#allocation1 + $0x8] sm:$0xff pattern:$0x75316420] }
 0xada   : > { %3450 = vmatpush.msra.mxu1 %v8822_v53  ;;  %3430 = vmatpush.msrb.mxu3 %v8811_v50  ;;  %v3333_v50 = vld.sshfl [vmem:[#allocation1] sm:$0xff pattern:$0x75316420] }
 0xadb   : > { %3422 = vst [vmem:[#allocation1] ss:$2 sm:$0xff] %v8861_v63 }
 0xadc   : > { %v3286_v34 = vpop.f32.mrf.mxu2  ;;  %3451 = vmatpush.msra.mxu1 %v8826_v54  ;;  %3431 = vmatpush.msrb.mxu3 %v8818_v52 }
 0xade   : > { %3452 = vmatpush.msra.mxu1 %v8834_v56  ;;  %3432 = vmatpush.msrb.mxu3 %v8829_v55 }
 0xadf   : > { %6689 = vmatmul.msk.f32.vlgmr.msra.gmra.mxu3 %vm2599_vm5, %v3286_v34  ;;  %6690 = vmatmul.msk.f32.vlgmr.msrb.gmra.mxu1 %vm2599_vm5, %v3286_v34  ;;  %v6722_v34 = vld [vmem:[%s10071_s5 + $0x68] sm:$0xff] }
 0xae0   : > { %3453 = vmatpush.msra.mxu1 %v8842_v58  ;;  %3433 = vmatpush.msrb.mxu3 %v8837_v57 }
 0xae2   : > { %3454 = vmatpush.msra.mxu1 %v8850_v60  ;;  %3434 = vmatpush.msrb.mxu3 %v8845_v59  ;;  %v3424_v51 = vld.sshfl [vmem:[#allocation1 + $0x8] sm:$0xff pattern:$0x75316420]  ;;  %v3423_v52 = vld.sshfl [vmem:[#allocation1] sm:$0xff pattern:$0x75316420] }
 0xae3   : > { %4251 = vst [vmem:[#allocation1] ss:$2 sm:$0xff] %v8861_v63 }
 0xae4   : > { %3455 = vmatpush.msra.mxu1 %v8858_v62  ;;  %3435 = vmatpush.msrb.mxu3 %v8853_v61 }
 0xae6   : > { %3456 = vmatpush.msra.mxu1 %v8870_v1  ;;  %3436 = vmatpush.msrb.mxu3 %v8864_v0 }
 0xae8   : > { %3457 = vmatpush.msra.mxu1 %v8878_v3  ;;  %3437 = vmatpush.msrb.mxu3 %v8873_v2 }
 0xaea   : > { %3458 = vmatpush.msra.mxu1 %v8886_v5  ;;  %3438 = vmatpush.msrb.mxu3 %v8881_v4 }
 0xaec   : > { %3459 = vmatpush.msra.mxu1 %v8894_v7  ;;  %3439 = vmatpush.msrb.mxu3 %v8889_v6 }
 0xaee   : > { %3460 = vmatpush.msra.mxu1 %v8944_v15  ;;  %3440 = vmatpush.msrb.mxu3 %v8897_v8 }
 0xaf0   : > { %3461 = vmatpush.msra.mxu1 %v8952_v17  ;;  %3441 = vmatpush.msrb.mxu3 %v8904_v10  ;;  %v6680_v10 = vld [vmem:[%s10067_s4 + $0x28] sm:$0xff] }
 0xaf2   : > { %3462 = vmatpush.msra.mxu1 %v8960_v19  ;;  %3442 = vmatpush.msrb.mxu3 %v8911_v11 }
 0xaf4   : > { %3463 = vmatpush.msra.mxu1 %v8966_v20  ;;  %3443 = vmatpush.msrb.mxu3 %v8941_v14 }
 0xaf6   : > { %3464 = vmatpush.msra.mxu1 %v8971_v21  ;;  %3444 = vmatpush.msrb.mxu3 %v8949_v16 }
 0xaf8   : > { %3581 = vmatpush.msra.mxu3 %v6680_v10 }
 0xb54   : > { %v3329_v53 = vpop.f32.mrf.mxu1 }
 0xb55   : > { %v3338_v54 = vmul.f32 %v3334_v49, %v3329_v53  ;;  %v6721_v49 = vld [vmem:[%s10071_s5 + $0x60] sm:$0xff] }
 0xb57   : > { %3375 = vmatmul.f32.vlgmr.msra.gmra.mxu2 %v3338_v54 }
 0xb5a   : > { %v3309_v55 = vpop.f32.mrf.mxu3 }
 0xb5b   : > { %v3337_v56 = vmul.f32 %v3333_v50, %v3309_v55  ;;  %v6718_v55 = vld [vmem:[%s10071_s5 + $0x48] sm:$0xff] }
 0xb5c   : > { %v3419_v57 = vpop.f32.mrf.mxu1 }
 0xb5d   : > { %v3428_v58 = vmul.f32 %v3424_v51, %v3419_v57  ;;  %3355 = vmatmul.f32.vlgmr.msra.gmra.mxu0 %v3337_v56  ;;  %v6720_v51 = vld [vmem:[%s10071_s5 + $0x58] sm:$0xff]  ;;  %v6717_v56 = vld [vmem:[%s10071_s5 + $0x40] sm:$0xff] }
 0xb5f   : > { %3465 = vmatmul.f32.vlgmr.msra.gmra.mxu1 %v3428_v58 }
 0xb62   : > { %v3399_v59 = vpop.f32.mrf.mxu3 }
 0xb63   : > { %v3427_v60 = vmul.f32 %v3423_v52, %v3399_v59  ;;  %v6719_v52 = vld [vmem:[%s10071_s5 + $0x50] sm:$0xff] }
 0xb64   : > { %v3893_v59 = vld [vmem:[#allocation10] sm:$0xf] }
 0xb65   : > { %3445 = vmatmul.f32.vlgmr.msrb.gmra.mxu3 %v3427_v60 }
 0xbda   : > { %v3356_v1 = vpop.f32.mrf.mxu0  ;;  %v3376_v2 = vpop.f32.mrf.mxu2 }
 0xbdb   : > { %v3377_v3 = vadd.f32 %v3376_v2, %v3356_v1  ;;  %v3891_v2 = vld [vmem:[%s10076_s9 + $0x8] sm:$0xff] }
 0xbdc   : > { %v3466_v61 = vpop.f32.mrf.mxu1 }
 0xbe8   : > { %v3446_v62 = vpop.f32.mrf.mxu3 }
 0xbe9   : > { %v3467_v0 = vadd.f32 %v3466_v61, %v3446_v62  ;;  %v3890_v62 = vld [vmem:[%s10076_s9] sm:$0xff] }
 0xbeb   : > { %3470 = vrot.lane.b32.xlu2 %v3467_v0, %s10072_s3  ;;  %3474 = vrot.lane.b32.xlu1 %v3467_v0, %s10073_s7 }
 0xc45   : > { %v3471_v4 = vpop.permute.xlu2 %3470 }
 0xc46   : > { %v3473_v5 = vsub.f32 %v3377_v3, %v3471_v4 }
 0xc48   : > { %6694 = vmatpush.msk.msrb.mxu2 %vm2409_vm1, %v3473_v5  ;;  %v3894_v5 = vld [vmem:[#allocation12] sm:$0xf] }
 0xc49   : > { %6695 = vmatmul.msk.f32.vlgmr.msrb.gmra.mxu2 %vm2402_vm2, %v8981_v44 }
 0xc51   : > { %6696 = vmatmul.msk.f32.gmra.mxu2 %vm2402_vm2, %v8987_v47  ;;  %v6679_v47 = vld [vmem:[%s10067_s4 + $0x20] sm:$0xff] }
 0xc52   : > { %3582 = vmatpush.msra.mxu3 %v6679_v47 }
 0xc5d   : > { %v3475_v6 = vpop.permute.xlu1 %3474 }
 0xc5e   : > { %v3477_v7 = vadd.f32 %v3475_v6, %v3377_v3 }
 0xc60   : > { %3479 = vrot.lane.b32.xlu2 %v3477_v7, %s10072_s3  ;;  %v4053_v7 = vld [vmem:[#allocation15] sm:$0x7] }
 0xcba   : > { %v3480_v8 = vpop.permute.xlu2 %3479 }
 0xcbb   : > { %6691 = vmatpush.msk.msrb.mxu0 %vm2409_vm1, %v3480_v8 }
 0xcbc   : > { %6692 = vmatmul.msk.f32.vlgmr.msrb.gmra.mxu0 %vm2402_vm2, %v8992_v48  ;;  %v6682_v48 = vld [vmem:[%s10067_s4 + $0x38] sm:$0xff] }
 0xcbd   : > { %3638 = vmatpush.msra.mxu2 %v6682_v48 }
 0xcc4   : > { %6693 = vmatmul.msk.f32.gmra.mxu0 %vm2402_vm2, %v8998_v12  ;;  %v6681_v12 = vld [vmem:[%s10067_s4 + $0x30] sm:$0xff]  ;;  %s10074_s4 = sld [smem:[#allocation99_spill]] }
 0xcc5   : > { %3639 = vmatpush.msra.mxu2 %v6681_v12  ;;  %v4115_v12 = vld [vmem:[%s10078_s10 + $0x18] sm:$0xff] }
 0xcca   : > { %v3856_v50 = vld [vmem:[%s10074_s4 + $0x8] sm:$0xff] }
 0xccc   : > { %v3526_v11 = vpop.f32.mrf.mxu2 }
 0xcd4   : > { %v3529_v15 = vpop.f32.mrf.mxu2 }
 0xd39   : > { %v3500_v14 = vpop.f32.mrf.mxu0 }
 0xd3a   : > { %v3527_v44 = vadd.f32 %v3526_v11, %v3500_v14 }
 0xd41   : > { %v3503_v16 = vpop.f32.mrf.mxu0 }
 0xd42   : > { %v3530_v17 = vadd.f32 %v3529_v15, %v3503_v16 }
 0xd44   : > { %6697 = vmatpush.xpose.msk.msra.mxu0 %vm2599_vm5, %v3530_v17  ;;  %6703 = vmatpush.xpose.msk.msrb.mxu1 %vm2599_vm5, %v3530_v17  ;;  %v3892_v17 = vld [vmem:[#allocation13] sm:$0xf] }
 0xd48   : > { %6698 = vmatpush.xpose.msk.msra.mxu0 %vm2599_vm5, %v3527_v44  ;;  %6704 = vmatpush.xpose.msk.msrb.mxu1 %vm2599_vm5, %v3527_v44 }
 0xd4b   : > { %6699 = vmatmul.msk.f32.vlgmr.msra.gmra.mxu0 %vm2599_vm5, %v9011_v29  ;;  %6705 = vmatmul.msk.f32.vlgmr.msrb.gmra.mxu1 %vm2599_vm5, %v9008_v27 }
 0xd4c   : > { %3733 = vmatpush.msra.mxu1 %v6724_v46 }
 0xd4e   : > { %3734 = vmatpush.msra.mxu1 %v6723_v32 }
 0xd50   : > { %3735 = vmatpush.msra.mxu1 %v6722_v34  ;;  %v7131_v34 = vld [vmem:[#allocation18] ss:$0 sm:$0xff] }
 0xd52   : > { %3736 = vmatpush.msra.mxu1 %v6721_v49 }
 0xd53   : > { %6700 = vmatmul.msk.f32.gmra.mxu0 %vm2599_vm5, %v9021_v31  ;;  %6706 = vmatmul.msk.f32.gmra.mxu1 %vm2599_vm5, %v9018_v30  ;;  %v6714_v30 = vld [vmem:[%s10069_s1 + $0x38] sm:$0xff] }
 0xd54   : > { %3697 = vmatpush.msrb.mxu3 %v6714_v30  ;;  %3737 = vmatpush.msra.mxu1 %v6720_v51 }
 0xd56   : > { %3698 = vmatpush.msrb.mxu3 %v6713_v38  ;;  %3738 = vmatpush.msra.mxu1 %v6719_v52  ;;  %v9287_v52 = vld [vmem:[#allocation34] sm:$0xf] }
 0xd58   : > { %3699 = vmatpush.msrb.mxu3 %v6712_v33  ;;  %3739 = vmatpush.msra.mxu1 %v6718_v55  ;;  %v9300_v55 = vld [vmem:[%s10063_s18 + $0xf8] sm:$0xff] }
 0xd5a   : > { %3740 = vmatpush.msra.mxu1 %v6717_v56  ;;  %v9304_v56 = vld [vmem:[%s10063_s18 + $0x70] sm:$0xff] }
 0xd5c   : > { %6733 = vmatpush.msk.msrb.mxu1 %vm2409_vm1, %v3893_v59  ;;  %v9316_v59 = vld [vmem:[%s10063_s18 + $0xe8] sm:$0xff] }
 0xdc8   : > { %v3555_v37 = vpop.f32.mrf.mxu0  ;;  %v3612_v29 = vpop.f32.mrf.mxu1 }
 0xdc9   : > { %6701 = vmatmul.msk.f32.vlgmr.msra.gmra.mxu3 %vm2372_vm0, %v3555_v37  ;;  %6707 = vmatmul.msk.f32.vlgmr.msra.gmra.mxu2 %vm2372_vm0, %v3612_v29  ;;  %v4114_v37 = vld [vmem:[%s10078_s10 + $0x10] sm:$0xff]  ;;  %v4113_v29 = vld [vmem:[%s10078_s10 + $0x8] sm:$0xff] }
 0xdd0   : > { %v3558_v27 = vpop.f32.mrf.mxu0  ;;  %v3615_v31 = vpop.f32.mrf.mxu1 }
 0xdd1   : > { %6702 = vmatmul.msk.f32.gmra.mxu3 %vm2372_vm0, %v3558_v27  ;;  %6708 = vmatmul.msk.f32.gmra.mxu2 %vm2372_vm0, %v3615_v31 }
 0xe4c   : > { %v3584_v28 = vpop.f32.mrf.mxu3  ;;  %v3641_v41 = vpop.f32.mrf.mxu2 }
 0xe4d   : > { %v3593_v43 = vadd.f32 %v7130_v42, %v3584_v28 }
 0xe4f   : > { %v3647_v22 = vadd.f32 %v3641_v41, %v3593_v43 }
 0xe51   : > { %v3649_v25 = vadd.f32 %v3647_v22, %v9085_v39  ;;  %v3855_v39 = vld [vmem:[%s10074_s4] sm:$0xff]  ;;  %s10077_s4 = sld [smem:[#allocation54_spill]] }
 0xe54   : > { %v3587_v9 = vpop.f32.mrf.mxu3  ;;  %v3644_v13 = vpop.f32.mrf.mxu2 }
 0xe55   : > { %v3594_v18 = vadd.f32 %v7130_v42, %v3587_v9 }
 0xe57   : > { %v3648_v23 = vadd.f32 %v3644_v13, %v3594_v18  ;;  %s2325_s5 = scalar_lea.vmem %s10077_s4, %s8748_s6  ;;  %s10079_s4 = sld [smem:[#allocation69_spill]] }
 0xe58   : > { %v4051_v11 = vld [vmem:[%s2325_s5] sm:$0xff]  ;;  %v4052_v44 = vld [vmem:[%s2325_s5 + $0x8] sm:$0xff]  ;;  %s10080_s5 = sld [smem:[#allocation87_spill]] }
 0xe59   : > { %v3650_v24 = vadd.f32 %v3648_v23, %v9090_v40  ;;  %v6711_v40 = vld [vmem:[%s10069_s1 + $0x20] sm:$0xff]  ;;  %s10075_s1 = sld [smem:[#allocation96_spill]] }
 0xe5a   : > { %3700 = vmatpush.msrb.mxu3 %v6711_v40  ;;  %s10081_s6 = sld [smem:[#allocation84_spill]] }
 0xe5b   : > { %3665 = vmatpush.msrb.mxu0 %v3650_v24 }
 0xe5d   : > { %3666 = vmatpush.msrb.mxu0 %v3649_v25  ;;  %v9264_v25 = vld [vmem:[%s10079_s4 + $0x30] sm:$0xff]  ;;  %v9275_v40 = vld [vmem:[%s10079_s4 + $0x28] sm:$0xff]  ;;  %v9281_v46 = vld [vmem:[%s10079_s4 + $0x18] sm:$0xff] }
 0xe5e   : > { %6709 = vmatmul.msk.f32.vlgmr.msrb.gmra.mxu0 %vm2372_vm0, %v9040_v35 }
 0xe5f   : > { %3877 = vmatpush.msra.mxu0 %v7159_v26  ;;  %v3888_v60 = vld [vmem:[%s10075_s1] sm:$0xff]  ;;  %v3889_v61 = vld [vmem:[%s10075_s1 + $0x8] sm:$0xff]  ;;  %v9267_v26 = vld [vmem:[%s10079_s4 + $0x38] sm:$0xff] }
 0xe61   : > { %3878 = vmatpush.msra.mxu0 %v7160_v45  ;;  %v9272_v45 = vld [vmem:[%s10079_s4 + $0x20] sm:$0xff] }
 0xe66   : > { %6710 = vmatmul.msk.f32.gmra.mxu0 %vm2372_vm0, %v9045_v36 }
 0xe6e   : > { %6729 = vmatmul.msk.f32.vlgmr.msra.gmra.mxu0 %vm2372_vm0, %v3855_v39  ;;  %v9278_v39 = vld [vmem:[%s10079_s4 + $0x10] sm:$0xff] }
 0xe76   : > { %6730 = vmatmul.msk.f32.gmra.mxu0 %vm2372_vm0, %v3856_v50 }
 0xedb   : > { %v3668_v53 = vpop.f32.mrf.mxu0 }
 0xedc   : > { %6715 = vmatmul.msk.f32.vlgmr.msrb.gmra.mxu3 %vm2599_vm5, %v3668_v53 }
 0xee3   : > { %v3671_v54 = vpop.f32.mrf.mxu0 }
 0xee4   : > { %6716 = vmatmul.msk.f32.gmra.mxu3 %vm2599_vm5, %v3671_v54 }
 0xeeb   : > { %v3880_v57 = vpop.f32.mrf.mxu0 }
 0xef3   : > { %v3883_v58 = vpop.f32.mrf.mxu0 }
 0xef4   : > { %3915 = vmatpush.msra.mxu3 %v3883_v58  ;;  %4008 = vmatpush.msrb.mxu0 %v3883_v58 }
 0xef6   : > { %3916 = vmatpush.msra.mxu3 %v3880_v57  ;;  %4009 = vmatpush.msrb.mxu0 %v3880_v57 }
 0xef7   : > { %6731 = vmatmul.msk.f32.vlgmr.msra.gmra.mxu3 %vm2372_vm0, %v3888_v60  ;;  %6739 = vmatmul.msk.f32.vlgmr.msrb.gmra.mxu0 %vm2372_vm0, %v3890_v62  ;;  %v9320_v60 = vld [vmem:[%s10063_s18 + $0x60] sm:$0xff]  ;;  %v9328_v62 = vld [vmem:[%s10063_s18 + $0x58] sm:$0xff] }
 0xef8   : > { %6741 = vmatpush.msk.msrb.mxu3 %vm2409_vm1, %v3894_v5  ;;  %v9352_v5 = vld [vmem:[%s10063_s18 + $0x40] sm:$0xff] }
 0xeff   : > { %6732 = vmatmul.msk.f32.gmra.mxu3 %vm2372_vm0, %v3889_v61  ;;  %6740 = vmatmul.msk.f32.gmra.mxu0 %vm2372_vm0, %v3891_v2  ;;  %v9324_v61 = vld [vmem:[%s10063_s18 + $0xe0] sm:$0xff]  ;;  %v9340_v2 = vld [vmem:[%s10063_s18 + $0xd0] sm:$0xff] }
 0xf5f   : > { %v3702_v0 = vpop.f32.mrf.mxu3 }
 0xf60   : > { %v3708_v1 = vmax.f32 %v3702_v0, 0.0  ;;  %v9332_v0 = vld [vmem:[%s10063_s18 + $0xd8] sm:$0xff] }
 0xf62   : > { %6725 = vmatmul.msk.f32.vlgmr.msra.gmra.mxu1 %vm3139_vm6, %v3708_v1  ;;  %v9336_v1 = vld [vmem:[%s10063_s18 + $0x50] sm:$0xff] }
 0xf63   : > { %6744 = vmatpush.msk.msra.mxu1 %vm2541_vm3, %v4053_v7  ;;  %v9360_v7 = vld [vmem:[%s10063_s18 + $0x38] sm:$0xff] }
 0xf67   : > { %v3705_v3 = vpop.f32.mrf.mxu3 }
 0xf68   : > { %v3709_v4 = vmax.f32 %v3705_v3, 0.0  ;;  %v9344_v3 = vld [vmem:[%s10063_s18 + $0x48] sm:$0xff] }
 0xf6a   : > { %6726 = vmatmul.msk.f32.gmra.mxu1 %vm3139_vm6, %v3709_v4  ;;  %v9348_v4 = vld [vmem:[%s10063_s18 + $0xc8] sm:$0xff] }
 0xf72   : > { %6734 = vmatmul.msk.f32.vlgmr.msrb.gmra.mxu1 %vm2402_vm2, %v3880_v57  ;;  %v9308_v57 = vld [vmem:[%s10063_s18 + $0xf0] sm:$0xff] }
 0xf73   : > { %4223 = vmatpush.msrb.mxu1 %v9264_v25 }
 0xf74   : > { %v4011_v6 = vpop.f32.mrf.mxu0 }
 0xf75   : > { %6742 = vmatmul.msk.f32.vlgmr.msrb.gmra.mxu3 %vm2402_vm2, %v4011_v6  ;;  %4224 = vmatpush.msrb.mxu1 %v9272_v45  ;;  %v9356_v6 = vld [vmem:[%s10063_s18 + $0xc0] sm:$0xff] }
 0xf77   : > { %4225 = vmatpush.msrb.mxu1 %v9278_v39 }
 0xf7a   : > { %6735 = vmatmul.msk.f32.gmra.mxu1 %vm2402_vm2, %v3883_v58  ;;  %v3918_v47 = vpop.f32.mrf.mxu3  ;;  %v9312_v58 = vld [vmem:[%s10063_s18 + $0x68] sm:$0xff] }
 0xf7c   : > { %v4014_v10 = vpop.f32.mrf.mxu0 }
 0xf7d   : > { %6743 = vmatmul.msk.f32.gmra.mxu3 %vm2402_vm2, %v4014_v10  ;;  %v9365_v10 = vld [vmem:[%s10063_s18 + $0x30] sm:$0xff] }
 0xf82   : > { %6745 = vmatmul.msk.f32.vlgmr.msra.gmra.mxu1 %vm2534_vm4, %v4051_v11  ;;  %v3921_v48 = vpop.f32.mrf.mxu3  ;;  %v7180_v11 = vld [vmem:[%s10063_s18 + $0xb0] sm:$0xff] }
 0xf8a   : > { %6746 = vmatmul.msk.f32.gmra.mxu1 %vm2534_vm4, %v4052_v44  ;;  %v9380_v44 = vld [vmem:[%s10063_s18 + $0x18] sm:$0xff] }
 0xfdf   : > { %v3742_v8 = vpop.f32.mrf.mxu1 }
 0xfe0   : > { %v3748_v16 = vadd.f32 %v3742_v8, %v3668_v53  ;;  %v9289_v53 = vld [vmem:[#allocation31] sm:$0xf] }
 0xfe1   : > { %v7178_v8 = vld [vmem:[%s10063_s18 + $0xb8] sm:$0xff] }
 0xfe7   : > { %v3745_v14 = vpop.f32.mrf.mxu1 }
 0xfe8   : > { %v3749_v15 = vadd.f32 %v3745_v14, %v3671_v54  ;;  %v9296_v54 = vld [vmem:[%s10063_s18 + $0x78] sm:$0xff]  ;;  %v9370_v14 = vld [vmem:[%s10063_s18 + $0x28] sm:$0xff] }
 0xfea   : > { %3764 = vmatpush.msrb.mxu2 %v3749_v15  ;;  %v7182_v15 = vld [vmem:[%s10063_s18 + $0xa8] sm:$0xff] }
 0xfec   : > { %3765 = vmatpush.msrb.mxu2 %v3748_v16  ;;  %v9375_v16 = vld [vmem:[%s10063_s18 + $0x20] sm:$0xff] }
 0xfed   : > { %6727 = vmatmul.msk.f32.vlgmr.msrb.gmra.mxu2 %vm2372_vm0, %v9040_v35  ;;  %v4112_v35 = vld [vmem:[%s10078_s10] sm:$0xff]  ;;  %s10085_s10 = sld [smem:[#allocation58_spill]] }
 0xfee   : > { %6736 = vmatpush.msk.msra.mxu2 %vm2409_vm1, %v3892_v17  ;;  %v7184_v17 = vld [vmem:[%s10063_s18 + $0xa0] sm:$0xff] }
 0xfef   : > { %v3950_v27 = vpop.f32.mrf.mxu1 }
 0xff0   : > { %4151 = vmatpush.msrb.mxu2 %v4115_v12  ;;  %v9390_v12 = vld [vmem:[%s10063_s18 + $0x8] sm:$0xff] }
 0xff2   : > { %4152 = vmatpush.msrb.mxu2 %v4114_v37  ;;  %v9395_v37 = vld [vmem:[%s10063_s18] sm:$0xff] }
 0xff4   : > { %4153 = vmatpush.msrb.mxu2 %v4113_v29  ;;  %v4117_v29 = vld [vmem:[%s10079_s4] sm:$0xff] }
 0xff5   : > { %6728 = vmatmul.msk.f32.gmra.mxu2 %vm2372_vm0, %v9045_v36  ;;  %4226 = vmatpush.msrb.mxu1 %v4117_v29 }
 0xff6   : > { %4154 = vmatpush.msrb.mxu2 %v4112_v35  ;;  %v4118_v35 = vld [vmem:[%s10079_s4 + $0x8] sm:$0xff]  ;;  %s10082_s4 = sld [smem:[#allocation67_spill]] }
 0xff7   : > { %v3953_v30 = vpop.f32.mrf.mxu1  ;;  %4313 = vmatpush.msra.mxu1 %v9264_v25 }
 0xff8   : > { %v4043_v38 = vpop.f32.mrf.mxu3 }
 0xff9   : > { %4314 = vmatpush.msra.mxu1 %v9272_v45 }
 0xffb   : > { %4315 = vmatpush.msra.mxu1 %v9278_v39 }
 0xffd   : > { %6737 = vmatmul.msk.f32.vlgmr.msra.gmra.mxu2 %vm2402_vm2, %v3918_v47  ;;  %v7186_v47 = vld [vmem:[%s10063_s18 + $0x98] sm:$0xff]  ;;  %4316 = vmatpush.msra.mxu1 %v4117_v29 }
 0xffe   : > { %4243 = vmatpush.msra.mxu2 %v9267_v26 }
 0xfff   : > { %v4080_v28 = vpop.f32.mrf.mxu1 }
0x1000   : > { %v4046_v13 = vpop.f32.mrf.mxu3  ;;  %4244 = vmatpush.msra.mxu2 %v9275_v40 }
0x1002   : > { %4245 = vmatpush.msra.mxu2 %v9281_v46 }
0x1004   : > { %4246 = vmatpush.msra.mxu2 %v4118_v35 }
0x1005   : > { %6738 = vmatmul.msk.f32.gmra.mxu2 %vm2402_vm2, %v3921_v48  ;;  %v9385_v48 = vld [vmem:[%s10063_s18 + $0x10] sm:$0xff] }
0x1007   : > { %v4083_v22 = vpop.f32.mrf.mxu1 }
0x1070   : > { %v9251_v31 = vpop.f32.mrf.mxu2 }
0x1078   : > { %v9253_v36 = vpop.f32.mrf.mxu2 }
0x1080   : > { %v3982_v33 = vpop.f32.mrf.mxu2 }
0x1081   : > { %v3983_v41 = vadd.f32 %v3982_v33, %v3950_v27  ;;  %v7191_v27 = vld [vmem:[%s10063_s18 + $0x88] sm:$0xff] }
0x1082   : > { %v4253_v33 = vld.sshfl [vmem:[#allocation1 + $0x8] sm:$0xff pattern:$0x75316420] }
0x1083   : > { %v4049_v42 = vadd.f32 %v4043_v38, %v3983_v41  ;;  %v4252_v38 = vld.sshfl [vmem:[#allocation1] sm:$0xff pattern:$0x75316420] }
0x1084   : > { %4341 = vst [vmem:[#allocation1] ss:$2 sm:$0xff] %v8861_v63 }
0x1085   : > { %v9255_v43 = vadd.f32 %v4080_v28, %v4049_v42 }
0x1087   : > { %6747 = vmatmul.msk.f32.vlgmr.msrb.gmra.mxu2 %vm2599_vm5, %v9255_v43 }
0x1088   : > { %v3985_v9 = vpop.f32.mrf.mxu2  ;;  %4333 = vmatpush.msrb.mxu2 %v9267_v26 }
0x1089   : > { %v3986_v18 = vadd.f32 %v3985_v9, %v3953_v30  ;;  %v7192_v30 = vld [vmem:[%s10063_s18 + $0x80] sm:$0xff] }
0x108a   : > { %4334 = vmatpush.msrb.mxu2 %v9275_v40 }
0x108b   : > { %v4050_v23 = vadd.f32 %v4046_v13, %v3986_v18  ;;  %v4342_v28 = vld.sshfl [vmem:[#allocation1] sm:$0xff pattern:$0x75316420]  ;;  %v4343_v41 = vld.sshfl [vmem:[#allocation1 + $0x8] sm:$0xff pattern:$0x75316420] }
0x108c   : > { %4335 = vmatpush.msrb.mxu2 %v9281_v46  ;;  %5440 = vst [vmem:[#allocation1] ss:$2 sm:$0xff] %v8861_v63  ;;  %v3775_v46 = vsel %vm2599_vm5, %v9251_v31, 0.0 }
0x108d   : > { %v9259_v24 = vadd.f32 %v4083_v22, %v4050_v23 }
0x108e   : > { %4336 = vmatpush.msrb.mxu2 %v4118_v35 }
0x108f   : > { %6748 = vmatmul.msk.f32.gmra.mxu2 %vm2599_vm5, %v9259_v24 }
0x110a   : > { %v4156_v32 = vpop.f32.mrf.mxu2 }
0x110b   : > { %v4157_v51 = vadd.f32 %v7131_v34, %v4156_v32  ;;  %v3778_v32 = vsel %vm2599_vm5, %v9253_v36, 0.0 }
0x1112   : > { %v4159_v49 = vpop.f32.mrf.mxu2 }
0x1113   : > { %v4160_v50 = vadd.f32 %v7131_v34, %v4159_v49 }
0x1115   : > { %4179 = vmatpush.msra.mxu0 %v4160_v50  ;;  %4202 = vmatpush.msra.mxu3 %v4160_v50 }
0x1117   : > { %4180 = vmatpush.msra.mxu0 %v4157_v51  ;;  %4203 = vmatpush.msra.mxu3 %v4157_v51 }
0x1118   : > { %6749 = vmatmul.msk.f32.vlgmr.msra.gmra.mxu0 %vm2372_vm0, %v9287_v52  ;;  %6750 = vmatmul.msk.f32.vlgmr.msra.gmra.mxu3 %vm2372_vm0, %v9289_v53 }
0x1119   : > { %4258 = vmatpush.msrb.mxu0 %v9296_v54  ;;  %4278 = vmatpush.msrb.mxu3 %v9300_v55 }
0x111b   : > { %4259 = vmatpush.msrb.mxu0 %v9304_v56  ;;  %4279 = vmatpush.msrb.mxu3 %v9308_v57 }
0x111d   : > { %4260 = vmatpush.msrb.mxu0 %v9312_v58  ;;  %4280 = vmatpush.msrb.mxu3 %v9316_v59 }
0x111f   : > { %4261 = vmatpush.msrb.mxu0 %v9320_v60  ;;  %4281 = vmatpush.msrb.mxu3 %v9324_v61 }
0x1121   : > { %4262 = vmatpush.msrb.mxu0 %v9328_v62  ;;  %4282 = vmatpush.msrb.mxu3 %v9332_v0 }
0x1123   : > { %4263 = vmatpush.msrb.mxu0 %v9336_v1  ;;  %4283 = vmatpush.msrb.mxu3 %v9340_v2 }
0x1125   : > { %4264 = vmatpush.msrb.mxu0 %v9344_v3  ;;  %4284 = vmatpush.msrb.mxu3 %v9348_v4 }
0x1127   : > { %4265 = vmatpush.msrb.mxu0 %v9352_v5  ;;  %4285 = vmatpush.msrb.mxu3 %v9356_v6 }
0x1129   : > { %4266 = vmatpush.msrb.mxu0 %v9360_v7  ;;  %4286 = vmatpush.msrb.mxu3 %v7178_v8 }
0x112b   : > { %4267 = vmatpush.msrb.mxu0 %v9365_v10  ;;  %4287 = vmatpush.msrb.mxu3 %v7180_v11 }
0x112d   : > { %4268 = vmatpush.msrb.mxu0 %v9370_v14  ;;  %4288 = vmatpush.msrb.mxu3 %v7182_v15 }
0x112f   : > { %4269 = vmatpush.msrb.mxu0 %v9375_v16  ;;  %4289 = vmatpush.msrb.mxu3 %v7184_v17 }
0x1131   : > { %4270 = vmatpush.msrb.mxu0 %v9380_v44  ;;  %4290 = vmatpush.msrb.mxu3 %v7186_v47 }
0x1133   : > { %4271 = vmatpush.msrb.mxu0 %v9385_v48  ;;  %4291 = vmatpush.msrb.mxu3 %v8960_v19 }
0x1135   : > { %4272 = vmatpush.msrb.mxu0 %v9390_v12  ;;  %4292 = vmatpush.msrb.mxu3 %v8966_v20 }
0x1137   : > { %4273 = vmatpush.msrb.mxu0 %v9395_v37  ;;  %4293 = vmatpush.msrb.mxu3 %v8971_v21  ;;  %v7190_v21 = vld [vmem:[%s10063_s18 + $0x90] sm:$0xff] }
0x1195   : > { %v4182_v19 = vpop.f32.mrf.mxu0 }
0x1196   : > { %6751 = vmatmul.msk.f32.vlgmr.msrb.gmra.mxu1 %vm2599_vm5, %v4182_v19  ;;  %6752 = vmatmul.msk.f32.vlgmr.msra.gmra.mxu2 %vm2599_vm5, %v4182_v19 }
0x1197   : > { %4348 = vmatpush.msrb.mxu1 %v9296_v54  ;;  %4368 = vmatpush.msra.mxu2 %v9300_v55 }
0x1199   : > { %4349 = vmatpush.msrb.mxu1 %v9304_v56  ;;  %4369 = vmatpush.msra.mxu2 %v9308_v57 }
0x119b   : > { %v4205_v20 = vpop.f32.mrf.mxu3  ;;  %4350 = vmatpush.msrb.mxu1 %v9312_v58  ;;  %4370 = vmatpush.msra.mxu2 %v9316_v59 }
0x119d   : > { %4351 = vmatpush.msrb.mxu1 %v9320_v60  ;;  %4371 = vmatpush.msra.mxu2 %v9324_v61  ;;  %v8063_v61 = vmov 32.0  }
0x119e   : > { %6753 = vmatmul.msk.f32.vlgmr.msra.gmra.mxu1 %vm2599_vm5, %v4205_v20  ;;  %6754 = vmatmul.msk.f32.vlgmr.msrb.gmra.mxu2 %vm2599_vm5, %v4205_v20  ;;  %7141 = vrcp.f32 %v8063_v61  ;;  %v7132_v61 = vld [vmem:[#allocation30] ss:$0 sm:$0xff] }
0x119f   : > { %4352 = vmatpush.msrb.mxu1 %v9328_v62  ;;  %4372 = vmatpush.msra.mxu2 %v9332_v0 }
0x11a1   : > { %4353 = vmatpush.msrb.mxu1 %v9336_v1  ;;  %4373 = vmatpush.msra.mxu2 %v9340_v2 }
0x11a3   : > { %4354 = vmatpush.msrb.mxu1 %v9344_v3  ;;  %4374 = vmatpush.msra.mxu2 %v9348_v4  ;;  %v4092_v4 = vld [vmem:[%s10080_s5] sm:$0xff] }
0x11a4   : > { %v7142_v0 = vpop.eup %7141 }
0x11a5   : > { %4355 = vmatpush.msrb.mxu1 %v9352_v5  ;;  %4375 = vmatpush.msra.mxu2 %v9356_v6  ;;  %v3782_v2 = vmul.f32 32.0, %v7142_v0  ;;  %vm3786_vm7 = vweird.f32 %v7142_v0 }
0x11a7   : > { %4356 = vmatpush.msrb.mxu1 %v9360_v7  ;;  %4376 = vmatpush.msra.mxu2 %v7178_v8  ;;  %v3783_v6 = vsub.f32 1.0, %v3782_v2 }
0x11a9   : > { %4357 = vmatpush.msrb.mxu1 %v9365_v10  ;;  %4377 = vmatpush.msra.mxu2 %v7180_v11  ;;  %v3784_v8 = vmul.f32 %v7142_v0, %v3783_v6 }
0x11ab   : > { %4358 = vmatpush.msrb.mxu1 %v9370_v14  ;;  %4378 = vmatpush.msra.mxu2 %v7182_v15  ;;  %v3785_v11 = vadd.f32 %v7142_v0, %v3784_v8 }
0x11ad   : > { %4359 = vmatpush.msrb.mxu1 %v9375_v16  ;;  %4379 = vmatpush.msra.mxu2 %v7184_v17  ;;  %v9450_v15 = vsel %vm3786_vm7, %v7142_v0, %v3785_v11 }
0x11af   : > { %4360 = vmatpush.msrb.mxu1 %v9380_v44  ;;  %4380 = vmatpush.msra.mxu2 %v7186_v47 }
0x11b1   : > { %4361 = vmatpush.msrb.mxu1 %v9385_v48  ;;  %4381 = vmatpush.msra.mxu2 %v7190_v21 }
0x11b3   : > { %4362 = vmatpush.msrb.mxu1 %v9390_v12  ;;  %4382 = vmatpush.msra.mxu2 %v7191_v27 }
0x11b5   : > { %4363 = vmatpush.msrb.mxu1 %v9395_v37  ;;  %4383 = vmatpush.msra.mxu2 %v7192_v30 }
0x1213   : > { %v4228_v42 = vpop.f32.mrf.mxu1 }
0x1214   : > { %v4256_v9 = vmul.f32 %v4252_v38, %v4228_v42 }
0x1216   : > { %4274 = vmatmul.f32.vlgmr.msrb.gmra.mxu0 %v4256_v9 }
0x1219   : > { %v4248_v13 = vpop.f32.mrf.mxu2 }
0x121a   : > { %v4257_v18 = vmul.f32 %v4253_v33, %v4248_v13  ;;  %v4093_v33 = vld [vmem:[%s10080_s5 + $0x8] sm:$0xff]  ;;  %s10083_s5 = sld [smem:[#allocation56_spill]] }
0x121b   : > { %v4318_v22 = vpop.f32.mrf.mxu1 }
0x121c   : > { %v4346_v23 = vmul.f32 %v4342_v28, %v4318_v22  ;;  %4294 = vmatmul.f32.vlgmr.msrb.gmra.mxu3 %v4257_v18  ;;  %v4094_v28 = vld [vmem:[%s10081_s6] sm:$0xff] }
0x121e   : > { %4364 = vmatmul.f32.vlgmr.msrb.gmra.mxu1 %v4346_v23 }
0x1221   : > { %v4338_v25 = vpop.f32.mrf.mxu2 }
0x1222   : > { %v4347_v26 = vmul.f32 %v4343_v41, %v4338_v25 }
0x1224   : > { %4384 = vmatmul.f32.vlgmr.msra.gmra.mxu2 %v4347_v26 }
0x1293   : > { %v4275_v49 = vpop.f32.mrf.mxu0 }
0x129b   : > { %v4365_v45 = vpop.f32.mrf.mxu1 }
0x129f   : > { %v4295_v34 = vpop.f32.mrf.mxu3 }
0x12a0   : > { %v4296_v50 = vadd.f32 %v4295_v34, %v4275_v49 }
0x12a7   : > { %v4385_v40 = vpop.f32.mrf.mxu2 }
0x12a8   : > { %v4386_v39 = vadd.f32 %v4385_v40, %v4365_v45 }
0x12aa   : > { %4389 = vrot.lane.b32.xlu1 %v4386_v39, %s10072_s3  ;;  %4393 = vrot.lane.b32.xlu0 %v4386_v39, %s10073_s7 }
0x12d4   : > { %3776 = vadd.xlane.f32.xlu0 %v3775_v46  ;;  %3779 = vadd.xlane.f32.xlu1 %v3778_v32 }
0x131c   : > { %v4390_v51 = vpop.permute.xlu1 %4389  ;;  %v4394_v55 = vpop.permute.xlu0 %4393 }
0x131d   : > { %v4392_v57 = vsub.f32 %v4296_v50, %v4390_v51  ;;  %v4396_v59 = vadd.f32 %v4394_v55, %v4296_v50 }
0x131f   : > { %4398 = vrot.lane.b32.xlu2 %v4396_v59, %s10072_s3  ;;  %6758 = vmatpush.msk.msra.mxu3 %vm2409_vm1, %v4392_v57 }
0x1320   : > { %6759 = vmatmul.msk.f32.vlgmr.msra.gmra.mxu3 %vm2402_vm2, %v4092_v4  ;;  %v7133_v4 = vld [vmem:[#allocation25] ss:$0 sm:$0xff] }
0x1328   : > { %6760 = vmatmul.msk.f32.gmra.mxu3 %vm2402_vm2, %v4093_v33 }
0x1347   : > { %v3777_v17 = vpop.xlane.xlu0 %3776  ;;  %v3780_v47 = vpop.xlane.xlu1 %3779 }
0x1348   : > { %v3788_v29 = vmul.f32 %v9450_v15, %v3777_v17  ;;  %v3789_v19 = vmul.f32 %v9450_v15, %v3780_v47 }
0x134a   : > { %v3790_v35 = vsub.f32 %v9251_v31, %v3788_v29  ;;  %v3791_v21 = vsub.f32 %v9253_v36, %v3789_v19  ;;  %v4095_v31 = vld [vmem:[%s10081_s6 + $0x8] sm:$0xff]  ;;  %s10084_s6 = sld [smem:[#allocation100_spill]] }
0x134c   : > { %v3792_v20 = vmul.f32 %v3790_v35, %v3790_v35  ;;  %v3793_v30 = vmul.f32 %v3791_v21, %v3791_v21 }
0x134e   : > { %v3794_v27 = vsel %vm2599_vm5, %v3792_v20, 0.0  ;;  %v3797_v38 = vsel %vm2599_vm5, %v3793_v30, 0.0 }
0x134f   : > { %3795 = vadd.xlane.f32.xlu2 %v3794_v27  ;;  %v8064_v27 = vmov 16.0  }
0x1357   : > { %3798 = vadd.xlane.f32.xlu2 %v3797_v38 }
0x1379   : > { %v4399_v41 = vpop.permute.xlu2 %4398 }
0x137a   : > { %6755 = vmatpush.msk.msra.mxu0 %vm2409_vm1, %v4399_v41 }
0x137b   : > { %6756 = vmatmul.msk.f32.vlgmr.msra.gmra.mxu0 %vm2402_vm2, %v4094_v28 }
0x1383   : > { %6757 = vmatmul.msk.f32.gmra.mxu0 %vm2402_vm2, %v4095_v31  ;;  %v4126_v31 = vld [vmem:[%s10082_s4 + $0x8] sm:$0xff] }
0x1384   : > { %4520 = vmatpush.msrb.mxu2 %v4126_v31 }
0x13a3   : > { %v4457_v17 = vpop.f32.mrf.mxu3 }
0x13c2   : > { %v3796_v36 = vpop.xlane.xlu2 %3795 }
0x13c3   : > { %v3800_v42 = vmul.f32 %v3796_v36, %v9450_v15 }
0x13c5   : > { %v3802_v9 = vadd.f32 1e-05, %v3800_v42 }
0x13c7   : > { %7143 = vrsqrt.f32 %v3802_v9  ;;  %vm3810_vm12 = vweird.f32 %v3802_v9 }
0x13ca   : > { %v3799_v13 = vpop.xlane.xlu2 %3798 }
0x13cb   : > { %v3801_v18 = vmul.f32 %v3799_v13, %v9450_v15 }
0x13cd   : > { %v3803_v22 = vadd.f32 1e-05, %v3801_v18  ;;  %v7144_v23 = vpop.eup %7143  ;;  %v4463_v18 = vld [vmem:[%s10084_s6] sm:$0xff] }
0x13ce   : > { %v3805_v25 = vmul.f32 %v7144_v23, %v3802_v9  ;;  %vm3811_vm9 = vweird.f32 %v7144_v23  ;;  %v4670_v9 = vld [vmem:[%s10083_s5 + $0x18] sm:$0xff] }
0x13cf   : > { %7145 = vrsqrt.f32 %v3803_v22  ;;  %vm3820_vm10 = vweird.f32 %v3803_v22  ;;  %vm3812_vm13 = vmor %vm3810_vm12, %vm3811_vm9 }
0x13d0   : > { %v3806_v40 = vmul.f32 %v7144_v23, %v3805_v25  ;;  %7147 = vrcp.f32 %v8064_v27  ;;  %v4669_v25 = vld [vmem:[%s10083_s5 + $0x10] sm:$0xff] }
0x13d2   : > { %v3807_v32 = vmul.f32 0.5, %v3806_v40 }
0x13d4   : > { %v3808_v49 = vsub.f32 1.5, %v3807_v32  ;;  %v4464_v32 = vld [vmem:[%s10084_s6 + $0x8] sm:$0xff] }
0x13d5   : > { %v7146_v26 = vpop.eup %7145 }
0x13d6   : > { %v3815_v45 = vmul.f32 %v7146_v26, %v3803_v22  ;;  %vm3821_vm8 = vweird.f32 %v7146_v26  ;;  %v3809_v51 = vmul.f32 %v7144_v23, %v3808_v49  ;;  %v6767_v22 = vld [vmem:[%s10084_s6 + $0x10] sm:$0xff] }
0x13d7   : > { %vm3822_vm11 = vmor %vm3820_vm10, %vm3821_vm8 }
0x13d8   : > { %v3816_v39 = vmul.f32 %v7146_v26, %v3815_v45  ;;  %v3813_v57 = vsel %vm3812_vm13, %v7144_v23, %v3809_v51  ;;  %v4668_v45 = vld [vmem:[%s10083_s5 + $0x8] sm:$0xff] }
0x13d9   : > { %v3824_v0 = vmul.f32 %v3813_v57, %v3790_v35  ;;  %v4460_v35 = vpop.f32.mrf.mxu3 }
0x13da   : > { %v3817_v46 = vmul.f32 0.5, %v3816_v39  ;;  %v4667_v39 = vld [vmem:[%s10083_s5] sm:$0xff]  ;;  %s10087_s5 = sld [smem:[#allocation55_spill]] }
0x13db   : > { %v3829_v6 = vmul.f32 %v7132_v61, %v3824_v0  ;;  %v4127_v0 = vld [vmem:[%s10082_s4 + $0x10] sm:$0xff] }
0x13dc   : > { %v3818_v34 = vsub.f32 1.5, %v3817_v46 }
0x13dd   : > { %v3834_v11 = vadd.f32 %v7133_v4, %v3829_v6  ;;  %v4631_v6 = vld [vmem:[%s10085_s10 + $0x8] sm:$0xff] }
0x13de   : > { %v3819_v50 = vmul.f32 %v7146_v26, %v3818_v34  ;;  %v6768_v34 = vld [vmem:[%s10084_s6 + $0x18] sm:$0xff] }
0x13df   : > { %v3836_v29 = vsel %vm2599_vm5, %v3834_v11, 0.0 }
0x13e0   : > { %v3823_v55 = vsel %vm3822_vm11, %v7146_v26, %v3819_v50 }
0x13e1   : > { %v3825_v59 = vmul.f32 %v3823_v55, %v3791_v21  ;;  %v7148_v21 = vpop.eup %7147 }
0x13e2   : > { %v3846_v41 = vmul.f32 16.0, %v7148_v21  ;;  %vm3850_vm14 = vweird.f32 %v7148_v21 }
0x13e3   : > { %v3830_v2 = vmul.f32 %v7132_v61, %v3825_v59  ;;  %v4125_v59 = vld [vmem:[%s10082_s4] sm:$0xff]  ;;  %v4128_v61 = vld [vmem:[%s10082_s4 + $0x18] sm:$0xff]  ;;  %s10086_s4 = sld [smem:[#allocation90_spill]] }
0x13e4   : > { %v3847_v13 = vsub.f32 1.0, %v3846_v41  ;;  %4521 = vmatpush.msrb.mxu2 %v4125_v59  ;;  %4586 = vmatpush.msrb.mxu3 %v4128_v61 }
0x13e5   : > { %v3835_v8 = vadd.f32 %v7133_v4, %v3830_v2  ;;  %v4633_v2 = vld [vmem:[%s10085_s10 + $0x18] sm:$0xff]  ;;  %v4632_v4 = vld [vmem:[%s10085_s10 + $0x10] sm:$0xff] }
0x13e6   : > { %v3848_v26 = vmul.f32 %v7148_v21, %v3847_v13  ;;  %4587 = vmatpush.msrb.mxu3 %v4127_v0  ;;  %4656 = vmatpush.msra.mxu2 %v4633_v2  ;;  %v7136_v0 = vld [vmem:[#allocation6] ss:$0 sm:$0xff] }
0x13e7   : > { %v3837_v47 = vsel %vm2599_vm5, %v3835_v8, 0.0 }
0x13e8   : > { %v3838_v19 = vadd.f32 %v3837_v47, %v3836_v29  ;;  %v3849_v46 = vadd.f32 %v7148_v21, %v3848_v26  ;;  %4657 = vmatpush.msra.mxu2 %v4632_v4  ;;  %v4101_v26 = vld [vmem:[%s8401_s19 + $0x8] sm:$0xff] }
0x13ea   : > { %v3839_v30 = vrot.slane %v3838_v19, 4  ;;  %v9484_v50 = vsel %vm3850_vm14, %v7148_v21, %v3849_v46  ;;  %4658 = vmatpush.msra.mxu2 %v4631_v6  ;;  %v4104_v46 = vld [vmem:[%s8396_s27] sm:$0xff] }
0x13ec   : > { %v3840_v38 = vadd.f32 %v3839_v30, %v3838_v19 }
0x13ee   : > { %v3841_v36 = vrot.slane %v3840_v38, 2 }
0x13f0   : > { %v3842_v23 = vadd.f32 %v3841_v36, %v3840_v38 }
0x13f2   : > { %v3843_v40 = vrot.slane %v3842_v23, 1 }
0x13f4   : > { %v3844_v49 = vadd.f32 %v3843_v40, %v3842_v23  ;;  %v9510_v23 = vld [vmem:[%s10086_s4 + $0x8] sm:$0xff] }
0x13f6   : > { %v3852_v51 = vmul.f32 %v9484_v50, %v3844_v49  ;;  %v4106_v49 = vld [vmem:[%s8396_s27 + $0x10] sm:$0xff] }
0x13f8   : > { %v4425_v20 = vpop.f32.mrf.mxu0  ;;  %v3853_v55 = vsub.f32 %v3834_v11, %v3852_v51  ;;  %v3854_v57 = vsub.f32 %v3835_v8, %v3852_v51  ;;  %v4107_v51 = vld [vmem:[%s8396_s27 + $0x18] sm:$0xff] }
0x13f9   : > { %v4458_v42 = vadd.f32 %v4457_v17, %v4425_v20  ;;  %v4630_v17 = vld [vmem:[%s10085_s10] sm:$0xff]  ;;  %v7134_v20 = vld [vmem:[#allocation2] ss:$0 sm:$0xff]  ;;  %s10092_s10 = sld [smem:[#allocation86_spill]] }
0x13fa   : > { %4659 = vmatpush.msra.mxu2 %v4630_v17  ;;  %v4111_v17 = vld [vmem:[%s10087_s5 + $0x18] sm:$0xff] }
0x1400   : > { %v4428_v33 = vpop.f32.mrf.mxu0 }
0x1401   : > { %v4461_v28 = vadd.f32 %v4460_v35, %v4428_v33  ;;  %v7135_v33 = vld [vmem:[#allocation16] ss:$0 sm:$0xff] }
0x1403   : > { %6761 = vmatpush.xpose.msk.msra.mxu1 %vm2599_vm5, %v4461_v28  ;;  %6769 = vmatpush.xpose.msk.msrb.mxu0 %vm2599_vm5, %v4461_v28 }
0x1407   : > { %6762 = vmatpush.xpose.msk.msra.mxu1 %vm2599_vm5, %v4458_v42  ;;  %6770 = vmatpush.xpose.msk.msrb.mxu0 %vm2599_vm5, %v4458_v42 }
0x140a   : > { %6763 = vmatmul.msk.f32.vlgmr.msra.gmra.mxu1 %vm2599_vm5, %v4463_v18  ;;  %6771 = vmatmul.msk.f32.vlgmr.msrb.gmra.mxu0 %vm2599_vm5, %v6767_v22  ;;  %v9505_v22 = vld [vmem:[%s10086_s4] sm:$0xff] }
0x140b   : > { %4693 = vmatpush.msra.mxu0 %v4670_v9 }
0x140d   : > { %4694 = vmatpush.msra.mxu0 %v4669_v25 }
0x140f   : > { %4695 = vmatpush.msra.mxu0 %v4668_v45 }
0x1411   : > { %4696 = vmatpush.msra.mxu0 %v4667_v39  ;;  %v4102_v39 = vld [vmem:[%s8401_s19 + $0x10] sm:$0xff] }
0x1412   : > { %6764 = vmatmul.msk.f32.gmra.mxu1 %vm2599_vm5, %v4464_v32  ;;  %6772 = vmatmul.msk.f32.gmra.mxu0 %vm2599_vm5, %v6768_v34  ;;  %v4103_v32 = vld [vmem:[%s8401_s19 + $0x18] sm:$0xff]  ;;  %v4105_v34 = vld [vmem:[%s8396_s27 + $0x8] sm:$0xff] }
0x141a   : > { %6779 = vmatmul.msk.f32.vlgmr.msra.gmra.mxu0 %vm2599_vm5, %v3853_v55 }
0x1422   : > { %6780 = vmatmul.msk.f32.gmra.mxu0 %vm2599_vm5, %v3854_v57 }
0x1487   : > { %v4494_v11 = vpop.f32.mrf.mxu1  ;;  %v4560_v47 = vpop.f32.mrf.mxu0 }
0x1488   : > { %6765 = vmatmul.msk.f32.vlgmr.msrb.gmra.mxu2 %vm2372_vm0, %v4494_v11  ;;  %6773 = vmatmul.msk.f32.vlgmr.msrb.gmra.mxu3 %vm2372_vm0, %v4560_v47 }
0x148f   : > { %v4497_v8 = vpop.f32.mrf.mxu1  ;;  %v4563_v29 = vpop.f32.mrf.mxu0 }
0x1490   : > { %6766 = vmatmul.msk.f32.gmra.mxu2 %vm2372_vm0, %v4497_v8  ;;  %6774 = vmatmul.msk.f32.gmra.mxu3 %vm2372_vm0, %v4563_v29  ;;  %v4110_v29 = vld [vmem:[%s10087_s5 + $0x10] sm:$0xff] }
0x1497   : > { %v4698_v19 = vpop.f32.mrf.mxu0 }
0x1498   : > { %v4699_v21 = vadd.f32 %v7134_v20, %v4698_v19 }
0x149f   : > { %v4701_v27 = vpop.f32.mrf.mxu0 }
0x14a0   : > { %v4702_v30 = vadd.f32 %v7134_v20, %v4701_v27  ;;  %v4109_v20 = vld [vmem:[%s10087_s5 + $0x8] sm:$0xff] }
0x14a2   : > { %4815 = vmatpush.msrb.mxu2 %v4702_v30 }
0x14a4   : > { %4816 = vmatpush.msrb.mxu2 %v4699_v21 }
0x150b   : > { %v4523_v35 = vpop.f32.mrf.mxu2  ;;  %v4589_v38 = vpop.f32.mrf.mxu3 }
0x150c   : > { %v4532_v28 = vadd.f32 %v7135_v33, %v4523_v35 }
0x150e   : > { %v4595_v42 = vadd.f32 %v4589_v38, %v4532_v28 }
0x1510   : > { %v4597_v18 = vadd.f32 %v4595_v42, %v9255_v43 }
0x1513   : > { %v4526_v41 = vpop.f32.mrf.mxu2  ;;  %v4592_v31 = vpop.f32.mrf.mxu3 }
0x1514   : > { %v4533_v36 = vadd.f32 %v7135_v33, %v4526_v41 }
0x1516   : > { %v4596_v9 = vadd.f32 %v4592_v31, %v4533_v36 }
0x1518   : > { %v4598_v13 = vadd.f32 %v4596_v9, %v9259_v24  ;;  %v4100_v24 = vld [vmem:[%s8401_s19] sm:$0xff] }
0x151a   : > { %4619 = vmatpush.msrb.mxu1 %v4598_v13 }
0x151c   : > { %4620 = vmatpush.msrb.mxu1 %v4597_v18 }
0x151d   : > { %6775 = vmatmul.msk.f32.vlgmr.msrb.gmra.mxu1 %vm2372_vm0, %v9505_v22 }
0x151e   : > { %4770 = vmatpush.msra.mxu1 %v4702_v30  ;;  %v4108_v30 = vld [vmem:[%s10087_s5] sm:$0xff]  ;;  %s10090_s5 = sld [smem:[#allocation59_spill]] }
0x1520   : > { %4771 = vmatpush.msra.mxu1 %v4699_v21 }
0x1525   : > { %6776 = vmatmul.msk.f32.gmra.mxu1 %vm2372_vm0, %v9510_v23 }
0x152d   : > { %6783 = vmatmul.msk.f32.vlgmr.msra.gmra.mxu1 %vm2372_vm0, %v4100_v24  ;;  %v8066_v24 = vmov 2475754826  }
0x1535   : > { %6784 = vmatmul.msk.f32.gmra.mxu1 %vm2372_vm0, %v4101_v26 }
0x153d   : > { %6785 = vmatmul.msk.f32.gmra.mxu1 %vm2372_vm0, %v4102_v39 }
0x1545   : > { %6786 = vmatmul.msk.f32.gmra.mxu1 %vm2372_vm0, %v4103_v32 }
0x159a   : > { %v9516_v43 = vpop.f32.mrf.mxu1 }
0x159b   : > { %v9519_v25 = vsub.f32 %v4597_v18, %v9516_v43 }
0x159d   : > { %6777 = vmatmul.msk.f32.vlgmr.msra.gmra.mxu2 %vm2599_vm5, %v9519_v25 }
0x15a2   : > { %v9525_v45 = vpop.f32.mrf.mxu1 }
0x15a3   : > { %v9528_v40 = vsub.f32 %v4598_v13, %v9525_v45  ;;  %v8065_v13 = vmov 683565275  }
0x15a5   : > { %6778 = vmatmul.msk.f32.gmra.mxu2 %vm2599_vm5, %v9528_v40 }
0x15aa   : > { %v4773_v55 = vpop.f32.mrf.mxu1 }
0x15ad   : > { %6787 = vmatmul.msk.f32.vlgmr.msrb.gmra.mxu2 %vm2372_vm0, %v4104_v46  ;;  %v8067_v46 = vmov 2131351028  }
0x15b2   : > { %v4776_v57 = vpop.f32.mrf.mxu1 }
0x15b3   : > { %v4786_v27 = vmul.f32 %v4776_v57, %v4109_v20  ;;  %v8069_v57 = vmov 920167782  }
0x15b5   : > { %6788 = vmatmul.msk.f32.gmra.mxu2 %vm2372_vm0, %v4105_v34 }
0x15ba   : > { %v4779_v61 = vpop.f32.mrf.mxu1 }
0x15bb   : > { %v4787_v19 = vmul.f32 %v4779_v61, %v4110_v29 }
0x15bd   : > { %6789 = vmatmul.msk.f32.gmra.mxu2 %vm2372_vm0, %v4106_v49  ;;  %v8068_v49 = vmov 2102212464  }
0x15c2   : > { %v4782_v11 = vpop.f32.mrf.mxu1 }
0x15c3   : > { %v4788_v47 = vmul.f32 %v4782_v11, %v4111_v17 }
0x15c5   : > { %6790 = vmatmul.msk.f32.gmra.mxu2 %vm2372_vm0, %v4107_v51  ;;  %6791 = vmatpush.xpose.msk.msrb.mxu0 %vm2599_vm5, %v4788_v47 }
0x15c6   : > { %5361 = vmatpush.msra.mxu2 %v4788_v47 }
0x15c8   : > { %5362 = vmatpush.msra.mxu2 %v4787_v19 }
0x15c9   : > { %6792 = vmatpush.xpose.msk.msrb.mxu0 %vm2599_vm5, %v4787_v19 }
0x15ca   : > { %5363 = vmatpush.msra.mxu2 %v4786_v27 }
0x15cd   : > { %6793 = vmatpush.xpose.msk.msrb.mxu0 %vm2599_vm5, %v4786_v27 }
0x1620   : > { %v4661_v59 = vpop.f32.mrf.mxu2 }
0x1621   : > { %v4662_v6 = vadd.f32 %v7136_v0, %v4661_v59 }
0x1628   : > { %v4664_v2 = vpop.f32.mrf.mxu2 }
0x1629   : > { %v4665_v4 = vadd.f32 %v7136_v0, %v4664_v2  ;;  %v8070_v0 = vmov 1326507024  }
0x162b   : > { %4718 = vmatpush.msra.mxu3 %v4665_v4 }
0x162d   : > { %4719 = vmatpush.msra.mxu3 %v4662_v6 }
0x162e   : > { %6781 = vmatmul.msk.f32.vlgmr.msra.gmra.mxu3 %vm2372_vm0, %v9287_v52  ;;  %v4785_v52 = vmul.f32 %v4773_v55, %v4108_v30 }
0x162f   : > { %4738 = vmatpush.msrb.mxu3 %v4665_v4 }
0x1630   : > { %v4818_v8 = vpop.f32.mrf.mxu2  ;;  %5364 = vmatpush.msra.mxu2 %v4785_v52  ;;  %6794 = vmatpush.xpose.msk.msrb.mxu0 %vm2599_vm5, %v4785_v52 }
0x1631   : > { %4739 = vmatpush.msrb.mxu3 %v4662_v6 }
0x1632   : > { %5447 = vmatpush.msrb.mxu2 %v9296_v54 }
0x1634   : > { %5448 = vmatpush.msrb.mxu2 %v9304_v56  ;;  %6801 = vmatpush.xpose.msk.msra.mxu0 %vm2599_vm5, %v4788_v47 }
0x1636   : > { %6782 = vmatmul.msk.f32.vlgmr.msrb.gmra.mxu3 %vm2372_vm0, %v9289_v53  ;;  %5449 = vmatpush.msrb.mxu2 %v9312_v58 }
0x1638   : > { %v4821_v21 = vpop.f32.mrf.mxu2  ;;  %5450 = vmatpush.msrb.mxu2 %v9320_v60  ;;  %6802 = vmatpush.xpose.msk.msra.mxu0 %vm2599_vm5, %v4787_v19  ;;  %v4830_v60 = vmul.f32 %v4818_v8, %v4108_v30 }
0x1639   : > { %v4831_v58 = vmul.f32 %v4821_v21, %v4109_v20 }
0x163a   : > { %5451 = vmatpush.msrb.mxu2 %v9328_v62 }
0x163c   : > { %5452 = vmatpush.msrb.mxu2 %v9336_v1  ;;  %6803 = vmatpush.xpose.msk.msra.mxu0 %vm2599_vm5, %v4786_v27 }
0x163e   : > { %5453 = vmatpush.msrb.mxu2 %v9344_v3 }
0x1640   : > { %v4824_v35 = vpop.f32.mrf.mxu2  ;;  %5454 = vmatpush.msrb.mxu2 %v9352_v5  ;;  %6804 = vmatpush.xpose.msk.msra.mxu0 %vm2599_vm5, %v4785_v52 }
0x1641   : > { %v4832_v56 = vmul.f32 %v4824_v35, %v4110_v29 }
0x1642   : > { %5455 = vmatpush.msrb.mxu2 %v9360_v7 }
0x1644   : > { %5456 = vmatpush.msrb.mxu2 %v9365_v10 }
0x1646   : > { %5457 = vmatpush.msrb.mxu2 %v9370_v14 }
0x1648   : > { %v4827_v53 = vpop.f32.mrf.mxu2  ;;  %5458 = vmatpush.msrb.mxu2 %v9375_v16 }
0x1649   : > { %v4833_v54 = vmul.f32 %v4827_v53, %v4111_v17 }
0x164a   : > { %5459 = vmatpush.msrb.mxu2 %v9380_v44 }
0x164b   : > { %6796 = vmatpush.xpose.msk.msra.mxu3 %vm2599_vm5, %v4833_v54  ;;  %5340 = vmatpush.msrb.mxu1 %v4833_v54 }
0x164c   : > { %5460 = vmatpush.msrb.mxu2 %v9385_v48 }
0x164d   : > { %5341 = vmatpush.msrb.mxu1 %v4832_v56 }
0x164e   : > { %5461 = vmatpush.msrb.mxu2 %v9390_v12 }
0x164f   : > { %6797 = vmatpush.xpose.msk.msra.mxu3 %vm2599_vm5, %v4832_v56  ;;  %5342 = vmatpush.msrb.mxu1 %v4831_v58 }
0x1650   : > { %5462 = vmatpush.msrb.mxu2 %v9395_v37 }
0x1651   : > { %5343 = vmatpush.msrb.mxu1 %v4830_v60 }
0x1653   : > { %6798 = vmatpush.xpose.msk.msra.mxu3 %vm2599_vm5, %v4831_v58 }
0x1657   : > { %6799 = vmatpush.xpose.msk.msra.mxu3 %vm2599_vm5, %v4830_v60 }
0x165b   : > { %6806 = vmatpush.xpose.msk.msrb.mxu3 %vm2599_vm5, %v4833_v54 }
0x165f   : > { %6807 = vmatpush.xpose.msk.msrb.mxu3 %vm2599_vm5, %v4832_v56 }
0x1663   : > { %6808 = vmatpush.xpose.msk.msrb.mxu3 %vm2599_vm5, %v4831_v58 }
0x1667   : > { %6809 = vmatpush.xpose.msk.msrb.mxu3 %vm2599_vm5, %v4830_v60 }
0x16b1   : > { %v4721_v62 = vpop.f32.mrf.mxu3 }
0x16b2   : > { %6795 = vmatmul.msk.f32.vlgmr.msrb.gmra.mxu0 %vm2599_vm5, %v4721_v62 }
0x16b3   : > { %5317 = vmatpush.msrb.mxu0 %v4788_v47 }
0x16b5   : > { %5318 = vmatpush.msrb.mxu0 %v4787_v19 }
0x16b7   : > { %5319 = vmatpush.msrb.mxu0 %v4786_v27 }
0x16b9   : > { %5320 = vmatpush.msrb.mxu0 %v4785_v52  ;;  %v4741_v1 = vpop.f32.mrf.mxu3 }
0x16ba   : > { %6800 = vmatmul.msk.f32.vlgmr.msra.gmra.mxu3 %vm2599_vm5, %v4741_v1  ;;  %6805 = vmatmul.msk.f32.vlgmr.msra.gmra.mxu0 %vm2599_vm5, %v4741_v1 }
0x16bb   : > { %5381 = vmatpush.msra.mxu0 %v4833_v54 }
0x16bd   : > { %5382 = vmatpush.msra.mxu0 %v4832_v56 }
0x16bf   : > { %5383 = vmatpush.msra.mxu0 %v4831_v58 }
0x16c1   : > { %5384 = vmatpush.msra.mxu0 %v4830_v60 }
0x16c2   : > { %6810 = vmatmul.msk.f32.vlgmr.msrb.gmra.mxu3 %vm2599_vm5, %v4721_v62 }
0x172f   : > { %v9588_v3 = vpop.f32.mrf.mxu0 }
0x1737   : > { %v4922_v10 = vpop.f32.mrf.mxu0 }
0x173d   : > { %v9590_v5 = vpop.f32.mrf.mxu3 }
0x173e   : > { %v4904_v7 = vsub.f32 %v9588_v3, %v9590_v5 }
0x1745   : > { %v4942_v14 = vpop.f32.mrf.mxu3 }
0x1746   : > { %v4943_v16 = vadd.f32 %v4942_v14, %v4922_v10 }
0x1748   : > { %v9594_v44 = vmul.f32 2.0, %v4943_v16 }
0x174a   : > { %v4977_v48 = vand.u32 2139095040, %v9594_v44  ;;  %v4974_v38 = vand.u32 2147483647, %v9594_v44 }
0x174c   : > { %v4978_v12 = vshrl.u32 %v4977_v48, 23  ;;  %v4981_v28 = vand.u32 8388607, %v4974_v38 }
0x174e   : > { %v6811_v37 = vadd.s32 4294967169, %v4978_v12  ;;  %v4982_v42 = vor.u32 8388608, %v4981_v28 }
0x1750   : > { %v4984_v33 = vadd.s32 1, %v6811_v37  ;;  %v9616_v19 = vshll.u32 %v4982_v42, 8 }
0x1752   : > { %vm4985_vm15 = vcmp.gt.s32.totalorder %v4984_v33, 0  ;;  %v5023_v53 = vand.u32 65535, %v9616_v19  ;;  %v5024_v54 = vshrl.u32 %v9616_v19, 16 }
0x1753   : > { %v4986_v41 = vsel %vm4985_vm15, %v4984_v33, 0 }
0x1754   : > { %v4988_v31 = vand.u32 31, %v4986_v41  ;;  %v9602_v9 = vshrl.u32 %v4986_v41, 5  ;;  %v8071_v41 = vmov 0  }
0x1756   : > { %v9600_v36 = vsub.s32 32, %v4988_v31  ;;  %v4991_v18 = vshll.u32 %v8065_v13, %v4988_v31  ;;  %v4994_v26 = vshll.u32 %v8066_v24, %v4988_v31  ;;  %v4997_v34 = vshll.u32 %v8067_v46, %v4988_v31 }
0x1757   : > { %v5000_v55 = vshll.u32 %v8068_v49, %v4988_v31  ;;  %v5003_v61 = vshll.u32 %v8069_v57, %v4988_v31  ;;  %vm5006_vm3 = vcmp.lt.s32.totalorder %v9602_v9, 1  ;;  %vm5009_vm4 = vcmp.lt.s32.totalorder %v9602_v9, 4 }
0x1758   : > { %v4992_v39 = vshrl.u32 %v8066_v24, %v9600_v36  ;;  %v4995_v32 = vshrl.u32 %v8067_v46, %v9600_v36  ;;  %v4998_v51 = vshrl.u32 %v8068_v49, %v9600_v36  ;;  %v5001_v59 = vshrl.u32 %v8069_v57, %v9600_v36 }
0x1759   : > { %v5004_v2 = vshrl.u32 %v8070_v0, %v9600_v36  ;;  %vm5008_vm7 = vcmp.lt.s32.totalorder %v9602_v9, 3  ;;  %vm5007_vm8 = vcmp.lt.s32.totalorder %v9602_v9, 2 }
0x175a   : > { %v4993_v4 = vor.u32 %v4992_v39, %v4991_v18  ;;  %v4996_v6 = vor.u32 %v4995_v32, %v4994_v26  ;;  %v4999_v17 = vor.u32 %v4998_v51, %v4997_v34  ;;  %v5002_v11 = vor.u32 %v5001_v59, %v5000_v55 }
0x175b   : > { %v5005_v47 = vor.u32 %v5004_v2, %v5003_v61  ;;  %v9637_v55 = vmul.f32 2.0, %v4904_v7  ;;  %v4990_v61 = vshrl.u32 %v8065_v13, %v9600_v36 }
0x175c   : > { %v5014_v8 = vsel %vm5006_vm3, %v4993_v4, %v4996_v6  ;;  %v5018_v29 = vsel %vm5006_vm3, %v4996_v6, %v4999_v17  ;;  %v5015_v20 = vsel %vm5009_vm4, %v5002_v11, 920167782  ;;  %v5011_v57 = vsel %vm5009_vm4, %v4999_v17, 2102212464 }
0x175d   : > { %v5019_v27 = vsel %vm5009_vm4, %v5005_v47, 1326507024  ;;  %v5016_v30 = vsel %vm5008_vm7, %v4999_v17, %v5015_v20  ;;  %v5012_v3 = vsel %vm5008_vm7, %v4996_v6, %v5011_v57  ;;  %v4947_v17 = vand.u32 2147483647, %v9637_v55 }
0x175e   : > { %v5020_v52 = vsel %vm5008_vm7, %v5002_v11, %v5019_v27  ;;  %v5017_v21 = vsel %vm5007_vm8, %v5014_v8, %v5016_v30  ;;  %vm9657_vm4 = vcmp.le.f32.partialorder %v4974_v38, 0.7853982 }
0x175f   : > { %v5021_v35 = vsel %vm5007_vm8, %v5018_v29, %v5020_v52  ;;  %v5047_v60 = vand.u32 65535, %v5017_v21  ;;  %v5048_v62 = vshrl.u32 %v5017_v21, 16  ;;  %v5010_v29 = vsel %vm5006_vm3, %v4990_v61, %v4993_v4 }
0x1760   : > { %v5025_v56 = vand.u32 65535, %v5021_v35  ;;  %v5026_v58 = vshrl.u32 %v5021_v35, 16  ;;  %v5013_v36 = vsel %vm5007_vm8, %v5010_v29, %v5012_v3  ;;  %v4948_v52 = vsub.f32 0.0, %v4947_v17 }
0x1761   : > { %v5050_v48 = vmul.u32 %v5048_v62, %v5023_v53  ;;  %v5051_v12 = vmul.u32 %v5047_v60, %v5024_v54  ;;  %v5049_v42 = vmul.u32 %v5047_v60, %v5023_v53  ;;  %v5052_v26 = vmul.u32 %v5048_v62, %v5024_v54 }
0x1762   : > { %v5028_v1 = vmul.u32 %v5026_v58, %v5023_v53  ;;  %v5029_v10 = vmul.u32 %v5025_v56, %v5024_v54  ;;  %v5027_v14 = vmul.u32 %v5025_v56, %v5023_v53  ;;  %v5030_v37 = vmul.u32 %v5026_v58, %v5024_v54 }
0x1763   : > { %v5053_v18 = vshll.u32 %v5050_v48, 16  ;;  %v5055_v46 = vshll.u32 %v5051_v12, 16  ;;  %v5054_v47 = vshrl.u32 %v5050_v48, 16  ;;  %v5056_v7 = vshrl.u32 %v5051_v12, 16 }
0x1764   : > { %v5031_v16 = vshll.u32 %v5028_v1, 16  ;;  %v5033_v33 = vshll.u32 %v5029_v10, 16  ;;  %v5032_v34 = vshrl.u32 %v5028_v1, 16  ;;  %v5034_v0 = vshrl.u32 %v5029_v10, 16 }
0x1765   : > { %vm5057_vm11 = vc.u32 %v5049_v42, %v5053_v18  ;;  %v5059_v32 = vadd.s32 %v5053_v18, %v5049_v42  ;;  %v5067_v21 = vmul.u32 %v9616_v19, %v5013_v36  ;;  %v4949_v53 = vmul.f32 1.442695, %v4948_v52 }
0x1766   : > { %vm5035_vm9 = vc.u32 %v5027_v14, %v5031_v16  ;;  %v5037_v28 = vadd.s32 %v5031_v16, %v5027_v14  ;;  %v5058_v51 = vsel %vm5057_vm11, 1, %v8071_v41  ;;  %vm4976_vm3 = vcmp.lt.s32.totalorder %v9594_v44, 0 }
0x1767   : > { %v5036_v31 = vsel %vm5035_vm9, 1, %v8071_v41  ;;  %v5060_v59 = vadd.s32 %v5058_v51, %v5052_v26  ;;  %vm5061_vm12 = vc.u32 %v5059_v32, %v5055_v46  ;;  %v5063_v27 = vadd.s32 %v5059_v32, %v5055_v46 }
0x1768   : > { %v5038_v24 = vadd.s32 %v5036_v31, %v5030_v37  ;;  %vm5039_vm10 = vc.u32 %v5037_v28, %v5033_v33  ;;  %v5062_v11 = vsel %vm5061_vm12, 1, %v8071_v41  ;;  %7149 = vpow2.f32 %v4949_v53 }
0x1769   : > { %v5040_v39 = vsel %vm5039_vm10, 1, %v8071_v41  ;;  %v5064_v8 = vadd.s32 %v5062_v11, %v5060_v59 }
0x176a   : > { %v5042_v49 = vadd.s32 %v5040_v39, %v5038_v24 }
0x176b   : > { %v5065_v20 = vadd.s32 %v5064_v8, %v5054_v47 }
0x176c   : > { %v5043_v2 = vadd.s32 %v5042_v49, %v5032_v34 }
0x176d   : > { %v5066_v13 = vadd.s32 %v5065_v20, %v5056_v7 }
0x176e   : > { %v5044_v5 = vadd.s32 %v5043_v2, %v5034_v0  ;;  %v7150_v62 = vpop.eup %7149 }
0x176f   : > { %v5070_v30 = vadd.s32 1, %v5066_v13  ;;  %v9651_v10 = vmul.f32 %v7150_v62, %v7150_v62 }
0x1770   : > { %vm5069_vm13 = vc.u32 %v5044_v5, %v5063_v27  ;;  %v5068_v48 = vadd.s32 %v5063_v27, %v5044_v5 }
0x1771   : > { %v5071_v35 = vsel %vm5069_vm13, %v5070_v30, %v5066_v13  ;;  %v4952_v19 = vadd.f32 1.0, %v9651_v10 }
0x1772   : > { %v5072_v4 = vadd.s32 %v5071_v35, %v5067_v21 }
0x1773   : > { %7151 = vrcp.f32 %v4952_v19  ;;  %v4968_v27 = vand.u32 2147483648, %v4952_v19  ;;  %vm4962_vm8 = vweird.f32 %v4952_v19  ;;  %v4966_v52 = vand.u32 2147483647, %v4952_v19 }
0x1774   : > { %v5073_v54 = vadd.s32 536870912, %v5072_v4 }
0x1775   : > { %vm4967_vm10 = vcmp.eq.f32.partialorder %v4966_v52, 8.507059e+37  ;;  %v9712_v52 = vld [vmem:[%s10063_s18 + $0xb0] sm:$0xff] }
0x1776   : > { %v5074_v6 = vshrl.u32 %v5073_v54, 30  ;;  %v4969_v54 = vor.u32 1.1754944e-38, %v4968_v27  ;;  %v7198_v27 = vld [vmem:[%s10063_s18 + $0xd0] sm:$0xff] }
0x1778   : > { %v5075_v56 = vshll.u32 %v5074_v6, 30  ;;  %v5098_v11 = vsub.s32 4, %v5074_v6 }
0x1779   : > { %v7152_v39 = vpop.eup %7151 }
0x177a   : > { %v5076_v58 = vsub.s32 %v5072_v4, %v5075_v56  ;;  %v4958_v34 = vmul.f32 %v7152_v39, %v4952_v19  ;;  %v5099_v7 = vsel %vm4976_vm3, %v5098_v11, %v5074_v6  ;;  %vm4963_vm7 = vweird.f32 %v7152_v39 }
0x177b   : > { %v5101_v36 = vsel %vm9657_vm4, 0, %v5099_v7  ;;  %vm4964_vm9 = vmor %vm4962_vm8, %vm4963_vm7  ;;  %vm4953_vm7 = vcmp.ge.f32.partialorder %v9637_v55, 0.0  ;;  %v7194_v7 = vld [vmem:[%s10063_s18 + $0xf0] sm:$0xff] }
0x177c   : > { %vm5077_vm14 = vcmp.lt.s32.totalorder %v5076_v58, 0  ;;  %v5078_v60 = vsub.s32 0, %v5076_v58  ;;  %v4959_v61 = vsub.f32 1.0, %v4958_v34  ;;  %v5118_v53 = vand.u32 3, %v5101_v36 }
0x177e   : > { %v5079_v1 = vsel %vm5077_vm14, %v5078_v60, %v5076_v58  ;;  %v4960_v29 = vmul.f32 %v7152_v39, %v4959_v61  ;;  %vm5120_vm11 = vcmp.eq.s32.totalorder %v5118_v53, 0  ;;  %vm5123_vm12 = vcmp.eq.s32.totalorder %v5118_v53, 2 }
0x177f   : > { %v5080_v9 = vclz %v5079_v1  ;;  %v4972_v1 = vmul.f32 2.0, %v7150_v62  ;;  %vm5119_vm13 = vcmp.lt.s32.totalorder %v5118_v53, 2  ;;  %vm5117_vm14 = vweird.f32 %v9594_v44  ;;  %v9728_v53 = vld [vmem:[%s10063_s18 + $0x90] sm:$0xff] }
0x1780   : > { %v4961_v17 = vadd.f32 %v7152_v39, %v4960_v29 }
0x1781   : > { %v6812_v14 = vadd.s32 4294967294, %v5080_v9 }
0x1782   : > { %v4965_v4 = vsel %vm4964_vm9, %v7152_v39, %v4961_v17  ;;  %v7197_v17 = vld [vmem:[%s10063_s18 + $0xd8] sm:$0xff] }
0x1783   : > { %vm6813_vm15 = vcmp.lt.s32.totalorder %v6812_v14, 0 }
0x1784   : > { %v5083_v16 = vsel %vm6813_vm15, 0, %v6812_v14 }
0x1785   : > { %v5084_v12 = vsub.s32 32, %v5083_v16  ;;  %v5088_v37 = vsub.s32 4294967266, %v5083_v16  ;;  %v5085_v33 = vshll.u32 %v5076_v58, %v5083_v16  ;;  %v4970_v58 = vsel %vm4967_vm10, %v4969_v54, %v4965_v4  ;;  %v9724_v4 = vld [vmem:[%s10063_s18 + $0x98] sm:$0xff]  ;;  %v9732_v54 = vld [vmem:[%s10063_s18 + $0x88] sm:$0xff] }
0x1786   : > { %v4973_v16 = vmul.f32 %v4972_v1, %v4970_v58  ;;  %v5390_v1 = vld [vmem:[%s10090_s5 + $0x8] sm:$0xff] }
0x1787   : > { %v5086_v28 = vshrl.u32 %v5068_v48, %v5084_v12  ;;  %v5089_v41 = vadd.s32 127, %v5088_v37  ;;  %v9670_v12 = vld [vmem:[%s10090_s5 + $0x30] sm:$0xff]  ;;  %v9673_v37 = vld [vmem:[%s10090_s5 + $0x38] sm:$0xff] }
0x1788   : > { %5412 = vmatpush.msra.mxu3 %v9670_v12  ;;  %5432 = vmatpush.msra.mxu1 %v9673_v37 }
0x1789   : > { %v5087_v31 = vor.u32 %v5086_v28, %v5085_v33  ;;  %v5090_v42 = vshll.u32 %v5089_v41, 23  ;;  %v9676_v33 = vld [vmem:[%s10090_s5 + $0x20] sm:$0xff]  ;;  %v9681_v28 = vld [vmem:[%s10090_s5 + $0x28] sm:$0xff]  ;;  %v5289_v41 = vadd.s32 3, %v5101_v36 }
0x178a   : > { %5413 = vmatpush.msra.mxu3 %v9676_v33  ;;  %5433 = vmatpush.msra.mxu1 %v9681_v28  ;;  %v9700_v36 = vld [vmem:[%s10063_s18 + $0xc8] sm:$0xff] }
0x178b   : > { %v5091_v18 = vor.u32 4788187, %v5090_v42  ;;  %v5094_v26 = vcvt.s32.f32 %v5087_v31  ;;  %v5290_v42 = vand.u32 3, %v5289_v41  ;;  %v7213_v41 = vld [vmem:[%s10063_s18 + $0x58] sm:$0xff] }
0x178d   : > { %v5092_v24 = vand.u32 2147483647, %v5091_v18  ;;  %vm5292_vm15 = vcmp.eq.s32.totalorder %v5290_v42, 0 }
0x178f   : > { %v5095_v46 = vmul.f32 %v5094_v26, %v5092_v24 }
0x1791   : > { %v5096_v32 = vxor.u32 2147483648, %v5095_v46 }
0x1793   : > { %v5097_v51 = vsel %vm4976_vm3, %v5096_v32, %v5095_v46  ;;  %vm5295_vm3 = vcmp.eq.s32.totalorder %v5290_v42, 2  ;;  %v4955_v46 = vsub.f32 1.0, %v9651_v10 }
0x1794   : > { %v5100_v57 = vsel %vm9657_vm4, %v9594_v44, %v5097_v51  ;;  %vm5291_vm4 = vcmp.lt.s32.totalorder %v5290_v42, 2  ;;  %v7193_v44 = vld [vmem:[%s10063_s18 + $0xf8] sm:$0xff]  ;;  %v7215_v42 = vld [vmem:[%s10063_s18 + $0x48] sm:$0xff] }
0x1795   : > { %v5102_v59 = vmul.f32 %v5100_v57, %v5100_v57 }
0x1797   : > { %v5103_v0 = vmul.f32 -0.001358992, %v5102_v59  ;;  %v5110_v2 = vmul.f32 -0.00019511016, %v5102_v59 }
0x1799   : > { %v5104_v47 = vadd.f32 0.041655596, %v5103_v0  ;;  %v5111_v8 = vadd.f32 0.008332121, %v5110_v2 }
0x179b   : > { %v5105_v3 = vmul.f32 %v5104_v47, %v5102_v59  ;;  %v5112_v5 = vmul.f32 %v5111_v8, %v5102_v59 }
0x179d   : > { %v5106_v38 = vadd.f32 -0.4999988, %v5105_v3  ;;  %v5113_v20 = vadd.f32 -0.16666654, %v5112_v5 }
0x179f   : > { %v5107_v13 = vmul.f32 %v5106_v38, %v5102_v59  ;;  %v5114_v30 = vmul.f32 %v5113_v20, %v5102_v59  ;;  %v8072_v59 = vmov -1.0   ;;  %v7195_v38 = vld [vmem:[%s10063_s18 + $0xe8] sm:$0xff]  ;;  %v7196_v20 = vld [vmem:[%s10063_s18 + $0xe0] sm:$0xff] }
0x17a0   : > { %v4954_v61 = vsel %vm4953_vm7, 1.0, %v8072_v59  ;;  %v5441_v59 = vld.sshfl [vmem:[#allocation1] sm:$0xff pattern:$0x75316420] }
0x17a1   : > { %v5108_v21 = vadd.f32 1.0, %v5107_v13  ;;  %v5115_v35 = vadd.f32 1.0, %v5114_v30  ;;  %v4956_v2 = vmul.f32 %v4955_v46, %v4954_v61  ;;  %v9704_v13 = vld [vmem:[%s10063_s18 + $0xc0] sm:$0xff]  ;;  %v9708_v30 = vld [vmem:[%s10063_s18 + $0xb8] sm:$0xff] }
0x17a2   : > { %v7220_v46 = vld [vmem:[%s10063_s18 + $0x20] sm:$0xff] }
0x17a3   : > { %v5116_v6 = vmul.f32 %v5115_v35, %v5100_v57  ;;  %v5124_v56 = vxor.u32 2147483648, %v5108_v21  ;;  %v4971_v10 = vmul.f32 %v4970_v58, %v4956_v2  ;;  %v9720_v35 = vld [vmem:[%s10063_s18 + $0xa0] sm:$0xff]  ;;  %v5392_v58 = vld [vmem:[%s10090_s5 + $0x18] sm:$0xff] }
0x17a4   : > { %5434 = vmatpush.msra.mxu1 %v5392_v58 }
0x17a5   : > { %v5121_v60 = vxor.u32 2147483648, %v5116_v6  ;;  %v5125_v14 = vsel %vm5123_vm12, %v5124_v56, %v5116_v6  ;;  %v5297_v39 = vsel %vm5295_vm3, %v5124_v56, %v5116_v6  ;;  %v9736_v6 = vld [vmem:[%s10063_s18 + $0x80] sm:$0xff]  ;;  %v5391_v56 = vld [vmem:[%s10090_s5 + $0x10] sm:$0xff] }
0x17a6   : > { %5414 = vmatpush.msra.mxu3 %v5391_v56  ;;  %5435 = vmatpush.msra.mxu1 %v5390_v1 }
0x17a7   : > { %v5122_v9 = vsel %vm5120_vm11, %v5108_v21, %v5121_v60  ;;  %v5294_v24 = vsel %vm5292_vm15, %v5108_v21, %v5121_v60  ;;  %v9716_v21 = vld [vmem:[%s10063_s18 + $0xa8] sm:$0xff]  ;;  %v5389_v60 = vld [vmem:[%s10090_s5] sm:$0xff]  ;;  %s10091_s5 = sld [smem:[#allocation89_spill]] }
0x17a8   : > { %v5126_v19 = vsel %vm5119_vm13, %v5122_v9, %v5125_v14  ;;  %v5298_v34 = vsel %vm5291_vm4, %v5294_v24, %v5297_v39  ;;  %5415 = vmatpush.msra.mxu3 %v5389_v60  ;;  %v7217_v24 = vld [vmem:[%s10063_s18 + $0x38] sm:$0xff]  ;;  %v7219_v39 = vld [vmem:[%s10063_s18 + $0x28] sm:$0xff] }
0x17a9   : > { %v5127_v48 = vsel %vm5117_vm14, nan, %v5126_v19  ;;  %v5299_v0 = vsel %vm5117_vm14, nan, %v5298_v34  ;;  %v7209_v19 = vld [vmem:[%s10063_s18 + $0x78] sm:$0xff]  ;;  %v7222_v34 = vld [vmem:[%s10063_s18 + $0x10] sm:$0xff] }
0x17aa   : > { %v5128_v62 = vmul.f32 %v5127_v48, %v4973_v16  ;;  %v5300_v47 = vmul.f32 %v5299_v0, %v4973_v16  ;;  %5502 = vmatpush.msrb.mxu3 %v9670_v12  ;;  %v7210_v48 = vld [vmem:[%s10063_s18 + $0x70] sm:$0xff] }
0x17ac   : > { %v5129_v31 = vadd.f32 1.0, %v5128_v62  ;;  %5503 = vmatpush.msrb.mxu3 %v9676_v33  ;;  %v7211_v33 = vld [vmem:[%s10063_s18 + $0x68] sm:$0xff] }
0x17ae   : > { %7153 = vrcp.f32 %v5129_v31  ;;  %v5141_v49 = vand.u32 2147483648, %v5129_v31  ;;  %v5139_v57 = vand.u32 2147483647, %v5129_v31  ;;  %vm5135_vm9 = vweird.f32 %v5129_v31  ;;  %5504 = vmatpush.msrb.mxu3 %v5391_v56 }
0x17b0   : > { %v5142_v55 = vor.u32 1.1754944e-38, %v5141_v49  ;;  %vm5140_vm11 = vcmp.eq.f32.partialorder %v5139_v57, 8.507059e+37  ;;  %5505 = vmatpush.msrb.mxu3 %v5389_v60  ;;  %v7223_v49 = vld [vmem:[%s10063_s18 + $0x8] sm:$0xff] }
0x17b1   : > { %v5442_v57 = vld.sshfl [vmem:[#allocation1 + $0x8] sm:$0xff pattern:$0x75316420] }
0x17b2   : > { %5530 = vst [vmem:[#allocation1] ss:$2 sm:$0xff] %v8861_v63 }
0x17b4   : > { %v7154_v18 = vpop.eup %7153 }
0x17b5   : > { %v5131_v26 = vmul.f32 %v7154_v18, %v5129_v31  ;;  %vm5136_vm8 = vweird.f32 %v7154_v18  ;;  %v7214_v31 = vld [vmem:[%s10063_s18 + $0x50] sm:$0xff] }
0x17b6   : > { %vm5137_vm10 = vmor %vm5135_vm9, %vm5136_vm8 }
0x17b7   : > { %v5132_v32 = vsub.f32 1.0, %v5131_v26  ;;  %v7218_v26 = vld [vmem:[%s10063_s18 + $0x30] sm:$0xff] }
0x17b9   : > { %v5133_v51 = vmul.f32 %v7154_v18, %v5132_v32  ;;  %v7221_v32 = vld [vmem:[%s10063_s18 + $0x18] sm:$0xff] }
0x17bb   : > { %v5134_v11 = vadd.f32 %v7154_v18, %v5133_v51  ;;  %v7224_v51 = vld [vmem:[%s10063_s18] sm:$0xff] }
0x17bd   : > { %v5138_v8 = vsel %vm5137_vm10, %v7154_v18, %v5134_v11  ;;  %v7216_v18 = vld [vmem:[%s10063_s18 + $0x40] sm:$0xff]  ;;  %v5532_v11 = vld.sshfl [vmem:[#allocation1 + $0x8] sm:$0xff pattern:$0x75316420] }
0x17be   : > { %v5143_v29 = vsel %vm5140_vm11, %v5142_v55, %v5138_v8  ;;  %v5531_v8 = vld.sshfl [vmem:[#allocation1] sm:$0xff pattern:$0x75316420] }
0x17bf   : > { %v5144_v3 = vmul.f32 %v5143_v29, %v4971_v10  ;;  %v5301_v5 = vmul.f32 %v5300_v47, %v5143_v29 }
0x17c1   : > { %6817 = vmatmul.msk.f32.vlgmr.msrb.gmra.mxu0 %vm2599_vm5, %v5144_v3  ;;  %6818 = vmatmul.msk.f32.vlgmr.msrb.gmra.mxu1 %vm2599_vm5, %v5301_v5 }
0x17c2   : > { %6819 = vmatmul.msk.f32.vlgmr.msra.gmra.mxu2 %vm2599_vm5, %v5301_v5  ;;  %5467 = vmatpush.msrb.mxu0 %v7193_v44 }
0x17c3   : > { %5522 = vmatpush.msrb.mxu1 %v9673_v37 }
0x17c4   : > { %5468 = vmatpush.msrb.mxu0 %v7194_v7 }
0x17c5   : > { %5523 = vmatpush.msrb.mxu1 %v9681_v28  ;;  %v7212_v28 = vld [vmem:[%s10063_s18 + $0x60] sm:$0xff] }
0x17c6   : > { %5469 = vmatpush.msrb.mxu0 %v7195_v38 }
0x17c7   : > { %5524 = vmatpush.msrb.mxu1 %v5392_v58 }
0x17c8   : > { %5470 = vmatpush.msrb.mxu0 %v7196_v20 }
0x17c9   : > { %6820 = vmatmul.msk.f32.vlgmr.msra.gmra.mxu0 %vm2599_vm5, %v5144_v3  ;;  %5525 = vmatpush.msrb.mxu1 %v5390_v1 }
0x17ca   : > { %5471 = vmatpush.msrb.mxu0 %v7197_v17 }
0x17cc   : > { %5472 = vmatpush.msrb.mxu0 %v7198_v27 }
0x17ce   : > { %5473 = vmatpush.msrb.mxu0 %v9700_v36 }
0x17d0   : > { %5474 = vmatpush.msrb.mxu0 %v9704_v13 }
0x17d2   : > { %5475 = vmatpush.msrb.mxu0 %v9708_v30 }
0x17d4   : > { %5476 = vmatpush.msrb.mxu0 %v9712_v52 }
0x17d6   : > { %5477 = vmatpush.msrb.mxu0 %v9716_v21 }
0x17d8   : > { %5478 = vmatpush.msrb.mxu0 %v9720_v35 }
0x17da   : > { %5479 = vmatpush.msrb.mxu0 %v9724_v4 }
0x17dc   : > { %5480 = vmatpush.msrb.mxu0 %v9728_v53 }
0x17de   : > { %5481 = vmatpush.msrb.mxu0 %v9732_v54 }
0x17e0   : > { %5482 = vmatpush.msrb.mxu0 %v9736_v6 }
0x183e   : > { %v5322_v9 = vpop.f32.mrf.mxu0  ;;  %v5345_v14 = vpop.f32.mrf.mxu1 }
0x183f   : > { %v5348_v16 = vsub.f32 %v5322_v9, %v5345_v14  ;;  %v7225_v9 = vld [vmem:[%s10084_s6] sm:$0xff]  ;;  %v7226_v14 = vld [vmem:[%s10084_s6 + $0x10] sm:$0xff] }
0x1841   : > { %6821 = vmatmul.msk.f32.vlgmr.msra.gmra.mxu3 %vm2599_vm5, %v5348_v16  ;;  %6822 = vmatmul.msk.f32.vlgmr.msra.gmra.mxu1 %vm2599_vm5, %v5348_v16  ;;  %v7227_v16 = vld [vmem:[%s10084_s6 + $0x8] sm:$0xff] }
0x1842   : > { %5557 = vmatpush.msra.mxu1 %v7193_v44  ;;  %5537 = vmatpush.msra.mxu3 %v7209_v19  ;;  %v7228_v19 = vld [vmem:[%s10084_s6 + $0x18] sm:$0xff] }
0x1844   : > { %5558 = vmatpush.msra.mxu1 %v7194_v7  ;;  %5538 = vmatpush.msra.mxu3 %v7210_v48  ;;  %v5652_v48 = vld [vmem:[%s10093_s11] sm:$0xff] }
0x1845   : > { %v5366_v12 = vpop.f32.mrf.mxu2 }
0x1846   : > { %v5386_v37 = vpop.f32.mrf.mxu0  ;;  %5559 = vmatpush.msra.mxu1 %v7195_v38  ;;  %5539 = vmatpush.msra.mxu3 %v7211_v33 }
0x1847   : > { %v5387_v62 = vadd.f32 %v5386_v37, %v5366_v12  ;;  %v5655_v12 = vld [vmem:[%s10093_s11 + $0x18] sm:$0xff]  ;;  %v5654_v37 = vld [vmem:[%s10093_s11 + $0x10] sm:$0xff] }
0x1848   : > { %5560 = vmatpush.msra.mxu1 %v7196_v20  ;;  %5540 = vmatpush.msra.mxu3 %v7212_v28 }
0x1849   : > { %6823 = vmatmul.msk.f32.vlgmr.msrb.gmra.mxu3 %vm2599_vm5, %v5387_v62  ;;  %6824 = vmatmul.msk.f32.vlgmr.msrb.gmra.mxu1 %vm2599_vm5, %v5387_v62 }
0x184a   : > { %5561 = vmatpush.msra.mxu1 %v7197_v17  ;;  %5541 = vmatpush.msra.mxu3 %v7213_v41 }
0x184c   : > { %5562 = vmatpush.msra.mxu1 %v7198_v27  ;;  %5542 = vmatpush.msra.mxu3 %v7214_v31 }
0x184e   : > { %5563 = vmatpush.msra.mxu1 %v9700_v36  ;;  %5543 = vmatpush.msra.mxu3 %v7215_v42 }
0x1850   : > { %5564 = vmatpush.msra.mxu1 %v9704_v13  ;;  %5544 = vmatpush.msra.mxu3 %v7216_v18 }
0x1852   : > { %5565 = vmatpush.msra.mxu1 %v9708_v30  ;;  %5545 = vmatpush.msra.mxu3 %v7217_v24  ;;  %v4096_v30 = vld [vmem:[%s10091_s5] sm:$0xff] }
0x1854   : > { %5566 = vmatpush.msra.mxu1 %v9712_v52  ;;  %5546 = vmatpush.msra.mxu3 %v7218_v26  ;;  %v4097_v52 = vld [vmem:[%s10091_s5 + $0x8] sm:$0xff]  ;;  %s10096_s5 = sld [smem:[#allocation103_spill]] }
0x1855   : > { %v7137_v26 = vld [vmem:[#allocation4] ss:$0 sm:$0xff] }
0x1856   : > { %5567 = vmatpush.msra.mxu1 %v9716_v21  ;;  %5547 = vmatpush.msra.mxu3 %v7219_v39  ;;  %v4098_v21 = vld [vmem:[%s10092_s10] sm:$0xff] }
0x1858   : > { %5568 = vmatpush.msra.mxu1 %v9720_v35  ;;  %5548 = vmatpush.msra.mxu3 %v7220_v46 }
0x185a   : > { %5569 = vmatpush.msra.mxu1 %v9724_v4  ;;  %5549 = vmatpush.msra.mxu3 %v7221_v32  ;;  %v4099_v4 = vld [vmem:[%s10092_s10 + $0x8] sm:$0xff] }
0x185c   : > { %5570 = vmatpush.msra.mxu1 %v9728_v53  ;;  %5550 = vmatpush.msra.mxu3 %v7222_v34  ;;  %v5653_v53 = vld [vmem:[%s10093_s11 + $0x8] sm:$0xff] }
0x185e   : > { %5571 = vmatpush.msra.mxu1 %v9732_v54  ;;  %5551 = vmatpush.msra.mxu3 %v7223_v49 }
0x1860   : > { %5572 = vmatpush.msra.mxu1 %v9736_v6  ;;  %5552 = vmatpush.msra.mxu3 %v7224_v51 }
0x1862   : > { %5706 = vmatpush.msrb.mxu1 %v5653_v53  ;;  %v7232_v53 = vld [vmem:[%s8752_s2] sm:$0xff] }
0x1864   : > { %5707 = vmatpush.msrb.mxu1 %v5652_v48  ;;  %v7235_v48 = vld [vmem:[%s10075_s1 + $0x8] sm:$0xff] }
0x18be   : > { %v5437_v61 = vpop.f32.mrf.mxu1 }
0x18bf   : > { %v5446_v0 = vmul.f32 %v5442_v57, %v5437_v61 }
0x18c1   : > { %5483 = vmatmul.f32.vlgmr.msrb.gmra.mxu0 %v5446_v0 }
0x18c4   : > { %v5417_v2 = vpop.f32.mrf.mxu3 }
0x18c5   : > { %v5445_v55 = vmul.f32 %v5441_v59, %v5417_v2 }
0x18c6   : > { %v5527_v10 = vpop.f32.mrf.mxu1 }
0x18c7   : > { %v5536_v47 = vmul.f32 %v5532_v11, %v5527_v10  ;;  %5463 = vmatmul.f32.vlgmr.msrb.gmra.mxu2 %v5445_v55 }
0x18c9   : > { %5573 = vmatmul.f32.vlgmr.msra.gmra.mxu1 %v5536_v47 }
0x18cc   : > { %v5507_v29 = vpop.f32.mrf.mxu3 }
0x18cd   : > { %v5535_v3 = vmul.f32 %v5531_v8, %v5507_v29 }
0x18cf   : > { %5553 = vmatmul.f32.vlgmr.msra.gmra.mxu3 %v5535_v3 }
0x193e   : > { %v5484_v38 = vpop.f32.mrf.mxu0 }
0x1946   : > { %v5574_v5 = vpop.f32.mrf.mxu1 }
0x194a   : > { %v5464_v63 = vpop.f32.mrf.mxu2 }
0x194b   : > { %v5485_v20 = vadd.f32 %v5484_v38, %v5464_v63  ;;  %v5911_v38 = vld [vmem:[%s10096_s5 + $0x18] sm:$0xff] }
0x1952   : > { %v5554_v44 = vpop.f32.mrf.mxu3 }
0x1953   : > { %v5575_v7 = vadd.f32 %v5574_v5, %v5554_v44 }
0x1955   : > { %5578 = vrot.lane.b32.xlu2 %v5575_v7, %s10072_s3  ;;  %5582 = vrot.lane.b32.xlu0 %v5575_v7, %s10073_s7  ;;  %s10094_s7 = sld [smem:[#allocation60_spill]] }
0x195b   : > { %v5804_v31 = vld [vmem:[%s10094_s7 + $0x18] sm:$0xff]  ;;  %v5803_v42 = vld [vmem:[%s10094_s7 + $0x10] sm:$0xff]  ;;  %v5802_v61 = vld [vmem:[%s10094_s7 + $0x8] sm:$0xff] }
0x195c   : > { %5823 = vmatpush.msra.mxu1 %v5804_v31  ;;  %v5801_v0 = vld [vmem:[%s10094_s7] sm:$0xff] }
0x195e   : > { %5824 = vmatpush.msra.mxu1 %v5803_v42 }
0x1960   : > { %5825 = vmatpush.msra.mxu1 %v5802_v61 }
0x1962   : > { %5826 = vmatpush.msra.mxu1 %v5801_v0 }
0x19af   : > { %v5579_v17 = vpop.permute.xlu2 %5578 }
0x19b0   : > { %v5581_v27 = vsub.f32 %v5485_v20, %v5579_v17 }
0x19b2   : > { %6828 = vmatpush.msk.msra.mxu0 %vm2409_vm1, %v5581_v27 }
0x19b3   : > { %6829 = vmatmul.msk.f32.vlgmr.msra.gmra.mxu0 %vm2402_vm2, %v4096_v30  ;;  %v7229_v30 = vld [vmem:[%s10086_s4] sm:$0xff] }
0x19b4   : > { %5763 = vmatpush.msrb.mxu0 %v5655_v12  ;;  %v7236_v12 = vld [vmem:[%s10076_s9 + $0x8] sm:$0xff] }
0x19b6   : > { %5764 = vmatpush.msrb.mxu0 %v5654_v37 }
0x19bb   : > { %6830 = vmatmul.msk.f32.gmra.mxu0 %vm2402_vm2, %v4097_v52  ;;  %v7230_v52 = vld [vmem:[%s10086_s4 + $0x8] sm:$0xff] }
0x19c7   : > { %v5583_v36 = vpop.permute.xlu0 %5582 }
0x19c8   : > { %v5585_v13 = vadd.f32 %v5583_v36, %v5485_v20  ;;  %v5910_v20 = vld [vmem:[%s10096_s5 + $0x10] sm:$0xff] }
0x19ca   : > { %5587 = vrot.lane.b32.xlu1 %v5585_v13, %s10072_s3  ;;  %s10095_s3 = sld [smem:[#allocation61_spill]] }
0x19d0   : > { %v5843_v2 = vld [vmem:[%s10095_s3 + $0x38] sm:$0xff]  ;;  %v5842_v11 = vld [vmem:[%s10095_s3 + $0x30] sm:$0xff]  ;;  %v5837_v29 = vld [vmem:[%s10095_s3 + $0x8] sm:$0xff] }
0x19d1   : > { %v5839_v55 = vld [vmem:[%s10095_s3 + $0x18] sm:$0xff]  ;;  %v5838_v10 = vld [vmem:[%s10095_s3 + $0x10] sm:$0xff]  ;;  %v5836_v3 = vld [vmem:[%s10095_s3] sm:$0xff] }
0x1a30   : > { %v5646_v54 = vpop.f32.mrf.mxu0 }
0x1a38   : > { %v5649_v56 = vpop.f32.mrf.mxu0 }
0x1a3c   : > { %v5588_v35 = vpop.permute.xlu1 %5587 }
0x1a3d   : > { %6825 = vmatpush.msk.msra.mxu2 %vm2409_vm1, %v5588_v35  ;;  %v5908_v35 = vld [vmem:[%s10096_s5] sm:$0xff] }
0x1a3e   : > { %6826 = vmatmul.msk.f32.vlgmr.msra.gmra.mxu2 %vm2402_vm2, %v4098_v21  ;;  %v5909_v21 = vld [vmem:[%s10096_s5 + $0x8] sm:$0xff] }
0x1a46   : > { %6827 = vmatmul.msk.f32.gmra.mxu2 %vm2402_vm2, %v4099_v4  ;;  %v7231_v4 = vld [vmem:[%s8752_s2 + $0x8] sm:$0xff]  ;;  %s10097_s2 = sld [smem:[#allocation105_spill]] }
0x1a4c   : > { %v5907_v37 = vld [vmem:[%s10097_s2 + $0x18] sm:$0xff]  ;;  %v5904_v31 = vld [vmem:[%s10097_s2] sm:$0xff] }
0x1ac1   : > { %v5614_v6 = vpop.f32.mrf.mxu2 }
0x1ac2   : > { %v5647_v1 = vadd.f32 %v5646_v54, %v5614_v6 }
0x1ac9   : > { %v5617_v58 = vpop.f32.mrf.mxu2 }
0x1aca   : > { %v5650_v60 = vadd.f32 %v5649_v56, %v5617_v58 }
0x1acc   : > { %6831 = vmatpush.xpose.msk.msrb.mxu3 %vm2599_vm5, %v5650_v60  ;;  %6837 = vmatpush.xpose.msk.msrb.mxu2 %vm2599_vm5, %v5650_v60 }
0x1ad0   : > { %6832 = vmatpush.xpose.msk.msrb.mxu3 %vm2599_vm5, %v5647_v1  ;;  %6838 = vmatpush.xpose.msk.msrb.mxu2 %vm2599_vm5, %v5647_v1 }
0x1ad3   : > { %6833 = vmatmul.msk.f32.vlgmr.msrb.gmra.mxu3 %vm2599_vm5, %v7225_v9  ;;  %6839 = vmatmul.msk.f32.vlgmr.msrb.gmra.mxu2 %vm2599_vm5, %v7226_v14 }
0x1ad4   : > { %5858 = vmatpush.msra.mxu2 %v5843_v2 }
0x1ad6   : > { %5859 = vmatpush.msra.mxu2 %v5842_v11 }
0x1adb   : > { %6834 = vmatmul.msk.f32.gmra.mxu3 %vm2599_vm5, %v7227_v16  ;;  %6840 = vmatmul.msk.f32.gmra.mxu2 %vm2599_vm5, %v7228_v19  ;;  %v7233_v19 = vld [vmem:[%s10075_s1] sm:$0xff]  ;;  %s10099_s1 = sld [smem:[#allocation93_spill]] }
0x1b56   : > { %v5680_v33 = vpop.f32.mrf.mxu3  ;;  %v5737_v62 = vpop.f32.mrf.mxu2 }
0x1b57   : > { %6835 = vmatmul.msk.f32.vlgmr.msrb.gmra.mxu1 %vm2372_vm0, %v5680_v33  ;;  %6841 = vmatmul.msk.f32.vlgmr.msrb.gmra.mxu0 %vm2372_vm0, %v5737_v62  ;;  %v5906_v33 = vld [vmem:[%s10097_s2 + $0x10] sm:$0xff] }
0x1b58   : > { %5957 = vmatpush.msrb.mxu1 %v5911_v38 }
0x1b5a   : > { %5958 = vmatpush.msrb.mxu1 %v5910_v20  ;;  %v6146_v20 = vld [vmem:[%s10099_s1 + $0x18] sm:$0xff] }
0x1b5c   : > { %5959 = vmatpush.msrb.mxu1 %v5909_v21  ;;  %v6143_v21 = vld [vmem:[%s10099_s1] sm:$0xff] }
0x1b5e   : > { %v5683_v28 = vpop.f32.mrf.mxu3  ;;  %v5740_v41 = vpop.f32.mrf.mxu2  ;;  %5960 = vmatpush.msrb.mxu1 %v5908_v35 }
0x1b5f   : > { %6836 = vmatmul.msk.f32.gmra.mxu1 %vm2372_vm0, %v5683_v28  ;;  %6842 = vmatmul.msk.f32.gmra.mxu0 %vm2372_vm0, %v5740_v41  ;;  %v5905_v41 = vld [vmem:[%s10097_s2 + $0x8] sm:$0xff] }
0x1bd4   : > { %v5709_v18 = vpop.f32.mrf.mxu1  ;;  %v5766_v24 = vpop.f32.mrf.mxu0 }
0x1bd5   : > { %v5718_v39 = vadd.f32 %v7137_v26, %v5709_v18 }
0x1bd7   : > { %v5772_v49 = vadd.f32 %v5766_v24, %v5718_v39 }
0x1bd9   : > { %v5774_v59 = vadd.f32 %v5772_v49, %v9519_v25  ;;  %v5840_v25 = vld [vmem:[%s10095_s3 + $0x20] sm:$0xff] }
0x1bdc   : > { %v5712_v46 = vpop.f32.mrf.mxu1  ;;  %v5769_v32 = vpop.f32.mrf.mxu0 }
0x1bdd   : > { %v5719_v34 = vadd.f32 %v7137_v26, %v5712_v46  ;;  %v3886_v46 = vld [vmem:[%s8406_s12] sm:$0xff] }
0x1bdf   : > { %v5773_v51 = vadd.f32 %v5769_v32, %v5719_v34 }
0x1be1   : > { %v5775_v57 = vadd.f32 %v5773_v51, %v9528_v40  ;;  %v5841_v40 = vld [vmem:[%s10095_s3 + $0x28] sm:$0xff]  ;;  %s10098_s3 = sld [smem:[#allocation104_spill]] }
0x1be2   : > { %5860 = vmatpush.msra.mxu2 %v5841_v40 }
0x1be3   : > { %5790 = vmatpush.msra.mxu3 %v5775_v57 }
0x1be4   : > { %5861 = vmatpush.msra.mxu2 %v5840_v25 }
0x1be5   : > { %5791 = vmatpush.msra.mxu3 %v5774_v59 }
0x1be6   : > { %6843 = vmatmul.msk.f32.vlgmr.msra.gmra.mxu3 %vm2372_vm0, %v9505_v22  ;;  %5862 = vmatpush.msra.mxu2 %v5839_v55 }
0x1be7   : > { %v5915_v62 = vld [vmem:[%s10098_s3 + $0x18] sm:$0xff]  ;;  %v5914_v28 = vld [vmem:[%s10098_s3 + $0x10] sm:$0xff]  ;;  %v5913_v42 = vld [vmem:[%s10098_s3 + $0x8] sm:$0xff] }
0x1be8   : > { %5863 = vmatpush.msra.mxu2 %v5838_v10  ;;  %v5912_v18 = vld [vmem:[%s10098_s3] sm:$0xff] }
0x1bea   : > { %5864 = vmatpush.msra.mxu2 %v5837_v29 }
0x1bec   : > { %5865 = vmatpush.msra.mxu2 %v5836_v3 }
0x1bee   : > { %6844 = vmatmul.msk.f32.gmra.mxu3 %vm2372_vm0, %v9510_v23  ;;  %5985 = vmatpush.msrb.mxu2 %v5907_v37 }
0x1bf0   : > { %5986 = vmatpush.msrb.mxu2 %v5906_v33 }
0x1bf2   : > { %5987 = vmatpush.msrb.mxu2 %v5905_v41 }
0x1bf4   : > { %5988 = vmatpush.msrb.mxu2 %v5904_v31 }
0x1c69   : > { %v5793_v22 = vpop.f32.mrf.mxu3 }
0x1c6a   : > { %v5799_v23 = vsub.f32 %v5774_v59, %v5793_v22  ;;  %v5900_v54 = vadd.f32 %v5793_v22, %v9516_v43  ;;  %v3887_v59 = vld [vmem:[%s8406_s12 + $0x8] sm:$0xff] }
0x1c6c   : > { %6845 = vmatmul.msk.f32.vlgmr.msra.gmra.mxu1 %vm2599_vm5, %v5799_v23 }
0x1c6d   : > { %6067 = vmatpush.msra.mxu1 %v7231_v4 }
0x1c6f   : > { %6068 = vmatpush.msra.mxu1 %v7232_v53  ;;  %v7138_v53 = vld [vmem:[#allocation9] ss:$0 sm:$0xff] }
0x1c71   : > { %v5796_v47 = vpop.f32.mrf.mxu3 }
0x1c72   : > { %v5800_v8 = vsub.f32 %v5775_v57, %v5796_v47  ;;  %v5901_v1 = vadd.f32 %v5796_v47, %v9525_v45  ;;  %v7234_v45 = vld [vmem:[%s10076_s9] sm:$0xff] }
0x1c74   : > { %6846 = vmatmul.msk.f32.gmra.mxu1 %vm2599_vm5, %v5800_v8 }
0x1ce9   : > { %v5828_v5 = vpop.f32.mrf.mxu1 }
0x1cea   : > { %v5834_v44 = vmax.f32 %v5828_v5, 0.0 }
0x1cec   : > { %6847 = vmatmul.msk.f32.vlgmr.msra.gmra.mxu2 %vm3139_vm6, %v5834_v44 }
0x1ced   : > { %6169 = vmatpush.msra.mxu2 %v6146_v20 }
0x1cf1   : > { %v5831_v7 = vpop.f32.mrf.mxu1 }
0x1cf2   : > { %v5835_v63 = vmax.f32 %v5831_v7, 0.0 }
0x1cf4   : > { %6848 = vmatmul.msk.f32.gmra.mxu2 %vm3139_vm6, %v5835_v63 }
0x1d6f   : > { %v5867_v17 = vpop.f32.mrf.mxu2 }
0x1d70   : > { %v5873_v13 = vadd.f32 %v5867_v17, %v5799_v23  ;;  %v6145_v17 = vld [vmem:[%s10099_s1 + $0x10] sm:$0xff] }
0x1d71   : > { %6170 = vmatpush.msra.mxu2 %v6145_v17 }
0x1d77   : > { %v5870_v27 = vpop.f32.mrf.mxu2 }
0x1d78   : > { %v5874_v36 = vadd.f32 %v5870_v27, %v5800_v8 }
0x1d7a   : > { %5889 = vmatpush.msra.mxu0 %v5874_v36 }
0x1d7c   : > { %5890 = vmatpush.msra.mxu0 %v5873_v13 }
0x1d7d   : > { %6849 = vmatmul.msk.f32.vlgmr.msra.gmra.mxu0 %vm2372_vm0, %v7229_v30 }
0x1d85   : > { %6850 = vmatmul.msk.f32.gmra.mxu0 %vm2372_vm0, %v7230_v52 }
0x1dfa   : > { %v5892_v6 = vpop.f32.mrf.mxu0 }
0x1dfb   : > { %v5898_v56 = vsub.f32 %v5873_v13, %v5892_v6  ;;  %v5902_v58 = vadd.f32 %v5900_v54, %v5892_v6 }
0x1dfd   : > { %6853 = vmatmul.msk.f32.vlgmr.msrb.gmra.mxu1 %vm2599_vm5, %v5902_v58  ;;  %v6077_v60 = vsel %vm2599_vm5, %v5898_v56, 0.0 }
0x1dfe   : > { %6078 = vadd.xlane.f32.xlu0 %v6077_v60 }
0x1e02   : > { %v5895_v9 = vpop.f32.mrf.mxu0 }
0x1e03   : > { %v5899_v14 = vsub.f32 %v5874_v36, %v5895_v9  ;;  %v5903_v16 = vadd.f32 %v5901_v1, %v5895_v9  ;;  %v6144_v36 = vld [vmem:[%s10099_s1 + $0x8] sm:$0xff]  ;;  %s6614_s1 = sshll.u32 %s10101_s0, 3 }
0x1e04   : > { %6171 = vmatpush.msra.mxu2 %v6144_v36  ;;  %s2329_s2 = scalar_lea.vmem %s8411_s8, %s6614_s1 }
0x1e05   : > { %5930 = vmatpush.msrb.mxu3 %v5903_v16  ;;  %6854 = vmatmul.msk.f32.gmra.mxu1 %vm2599_vm5, %v5903_v16  ;;  %v6080_v43 = vsel %vm2599_vm5, %v5899_v14, 0.0 }
0x1e06   : > { %6009 = vmatpush.msrb.mxu0 %v5903_v16  ;;  %6081 = vadd.xlane.f32.xlu1 %v6080_v43 }
0x1e07   : > { %5931 = vmatpush.msrb.mxu3 %v5902_v58  ;;  %6172 = vmatpush.msra.mxu2 %v6143_v21 }
0x1e08   : > { %6010 = vmatpush.msrb.mxu0 %v5902_v58  ;;  %6851 = vmatmul.msk.f32.vlgmr.msrb.gmra.mxu3 %vm2372_vm0, %v7233_v19  ;;  %v7139_v58 = vld [vmem:[#allocation7] ss:$0 sm:$0xff] }
0x1e09   : > { %6857 = vmatmul.msk.f32.vlgmr.msrb.gmra.mxu0 %vm2372_vm0, %v7234_v45  ;;  %6036 = vmatpush.msra.mxu3 %v5915_v62 }
0x1e0b   : > { %6037 = vmatpush.msra.mxu3 %v5914_v28 }
0x1e0d   : > { %6038 = vmatpush.msra.mxu3 %v5913_v42  ;;  %6861 = vmatmul.msk.f32.vlgmr.msra.gmra.mxu1 %vm2372_vm0, %v3886_v46 }
0x1e0f   : > { %6039 = vmatpush.msra.mxu3 %v5912_v18 }
0x1e10   : > { %6852 = vmatmul.msk.f32.gmra.mxu3 %vm2372_vm0, %v7235_v48 }
0x1e11   : > { %6858 = vmatmul.msk.f32.gmra.mxu0 %vm2372_vm0, %v7236_v12 }
0x1e15   : > { %6862 = vmatmul.msk.f32.gmra.mxu1 %vm2372_vm0, %v3887_v59 }
0x1e71   : > { %v6079_v24 = vpop.xlane.xlu0 %6078 }
0x1e72   : > { %v6083_v26 = vmul.f32 %v6079_v24, %v9450_v15 }
0x1e74   : > { %v6085_v39 = vsub.f32 %v5898_v56, %v6083_v26 }
0x1e76   : > { %v6087_v32 = vmul.f32 %v6085_v39, %v6085_v39 }
0x1e78   : > { %v6089_v34 = vsel %vm2599_vm5, %v6087_v32, 0.0 }
0x1e79   : > { %6090 = vadd.xlane.f32.xlu2 %v6089_v34  ;;  %v6082_v49 = vpop.xlane.xlu1 %6081 }
0x1e7a   : > { %v6084_v51 = vmul.f32 %v6082_v49, %v9450_v15  ;;  %v5962_v57 = vpop.f32.mrf.mxu1 }
0x1e7c   : > { %v6086_v61 = vsub.f32 %v5899_v14, %v6084_v51  ;;  %v7140_v51 = vld [vmem:[#allocation37] ss:$0 sm:$0xff] }
0x1e7e   : > { %v6088_v0 = vmul.f32 %v6086_v61, %v6086_v61 }
0x1e80   : > { %v6092_v2 = vsel %vm2599_vm5, %v6088_v0, 0.0 }
0x1e81   : > { %6093 = vadd.xlane.f32.xlu0 %v6092_v2 }
0x1e82   : > { %v9877_v10 = vpop.f32.mrf.mxu1 }
0x1e86   : > { %v6012_v11 = vpop.f32.mrf.mxu0 }
0x1e87   : > { %6859 = vmatmul.msk.f32.vlgmr.msra.gmra.mxu3 %vm2599_vm5, %v6012_v11 }
0x1e8a   : > { %v6070_v8 = vpop.f32.mrf.mxu1 }
0x1e8b   : > { %v5933_v40 = vpop.f32.mrf.mxu3 }
0x1e8c   : > { %6855 = vmatmul.msk.f32.vlgmr.msrb.gmra.mxu2 %vm2599_vm5, %v5933_v40 }
0x1e8e   : > { %v6015_v25 = vpop.f32.mrf.mxu0 }
0x1e8f   : > { %6860 = vmatmul.msk.f32.gmra.mxu3 %vm2599_vm5, %v6015_v25 }
0x1e92   : > { %v6072_v57 = vpop.f32.mrf.mxu1 }
0x1e93   : > { %v5936_v55 = vpop.f32.mrf.mxu3 }
0x1e94   : > { %6856 = vmatmul.msk.f32.gmra.mxu2 %vm2599_vm5, %v5936_v55 }
0x1eec   : > { %v6091_v22 = vpop.xlane.xlu2 %6090 }
0x1eed   : > { %v6095_v23 = vmul.f32 %v6091_v22, %v9450_v15 }
0x1eef   : > { %v6097_v47 = vadd.f32 1e-05, %v6095_v23 }
0x1ef1   : > { %7155 = vrsqrt.f32 %v6097_v47  ;;  %vm6105_vm1 = vweird.f32 %v6097_v47 }
0x1ef4   : > { %v6094_v29 = vpop.xlane.xlu0 %6093 }
0x1ef5   : > { %v6096_v3 = vmul.f32 %v6094_v29, %v9450_v15 }
0x1ef7   : > { %v7156_v5 = vpop.eup %7155  ;;  %v6098_v44 = vadd.f32 1e-05, %v6096_v3 }
0x1ef8   : > { %v6100_v7 = vmul.f32 %v7156_v5, %v6097_v47  ;;  %vm6106_vm0 = vweird.f32 %v7156_v5 }
0x1ef9   : > { %7157 = vrsqrt.f32 %v6098_v44  ;;  %vm6107_vm6 = vmor %vm6105_vm1, %vm6106_vm0  ;;  %vm6115_vm13 = vweird.f32 %v6098_v44 }
0x1efa   : > { %v6101_v63 = vmul.f32 %v7156_v5, %v6100_v7 }
0x1efc   : > { %v6102_v38 = vmul.f32 0.5, %v6101_v63 }
0x1efe   : > { %v6103_v27 = vsub.f32 1.5, %v6102_v38 }
0x1eff   : > { %v7158_v13 = vpop.eup %7157 }
0x1f00   : > { %v6104_v30 = vmul.f32 %v7156_v5, %v6103_v27  ;;  %v6110_v52 = vmul.f32 %v7158_v13, %v6098_v44  ;;  %vm6116_vm12 = vweird.f32 %v7158_v13 }
0x1f01   : > { %vm6117_vm14 = vmor %vm6115_vm13, %vm6116_vm12 }
0x1f02   : > { %v6108_v15 = vsel %vm6107_vm6, %v7156_v5, %v6104_v30  ;;  %v6111_v35 = vmul.f32 %v7158_v13, %v6110_v52 }
0x1f03   : > { %v6119_v54 = vmul.f32 %v6108_v15, %v6085_v39 }
0x1f04   : > { %v6112_v4 = vmul.f32 0.5, %v6111_v35 }
0x1f05   : > { %v6124_v60 = vmul.f32 %v7138_v53, %v6119_v54 }
0x1f06   : > { %v6113_v6 = vsub.f32 1.5, %v6112_v4 }
0x1f07   : > { %v6129_v16 = vadd.f32 %v7139_v58, %v6124_v60 }
0x1f08   : > { %v6114_v56 = vmul.f32 %v7158_v13, %v6113_v6 }
0x1f09   : > { %v6131_v48 = vsel %vm2599_vm5, %v6129_v16, 0.0 }
0x1f0a   : > { %v6118_v1 = vsel %vm6117_vm14, %v7158_v13, %v6114_v56  ;;  %v6041_v9 = vpop.f32.mrf.mxu3 }
0x1f0b   : > { %v6120_v14 = vmul.f32 %v6118_v1, %v6086_v61 }
0x1f0d   : > { %v6125_v43 = vmul.f32 %v7138_v53, %v6120_v14 }
0x1f0f   : > { %v6130_v19 = vadd.f32 %v7139_v58, %v6125_v43  ;;  %v5990_v45 = vpop.f32.mrf.mxu2 }
0x1f11   : > { %v6132_v12 = vsel %vm2599_vm5, %v6130_v19, 0.0 }
0x1f12   : > { %v6133_v37 = vadd.f32 %v6132_v12, %v6131_v48  ;;  %v6043_v34 = vpop.f32.mrf.mxu3 }
0x1f14   : > { %v6134_v33 = vrot.slane %v6133_v37, 4 }
0x1f16   : > { %v6135_v62 = vadd.f32 %v6134_v33, %v6133_v37 }
0x1f17   : > { %v5992_v39 = vpop.f32.mrf.mxu2 }
0x1f18   : > { %v6136_v28 = vrot.slane %v6135_v62, 2  ;;  %v5993_v32 = vadd.f32 %v5992_v39, %v9877_v10 }
0x1f1a   : > { %v6137_v41 = vadd.f32 %v6136_v28, %v6135_v62  ;;  %v6046_v49 = vadd.f32 %v6043_v34, %v5993_v32 }
0x1f1c   : > { %v6138_v31 = vrot.slane %v6137_v41, 1  ;;  %v6073_v61 = vadd.f32 %v6072_v57, %v6046_v49 }
0x1f1e   : > { %v6139_v42 = vadd.f32 %v6138_v31, %v6137_v41 }
0x1f20   : > { %v6140_v18 = vmul.f32 %v6139_v42, %v9484_v50 }
0x1f22   : > { %v6141_v24 = vsub.f32 %v6129_v16, %v6140_v18  ;;  %v6142_v26 = vsub.f32 %v6130_v19, %v6140_v18 }
0x1f24   : > { %6863 = vmatmul.msk.f32.vlgmr.msra.gmra.mxu2 %vm2599_vm5, %v6141_v24 }
0x1f2c   : > { %6864 = vmatmul.msk.f32.gmra.mxu2 %vm2599_vm5, %v6142_v26 }
0x1fa7   : > { %v6174_v46 = vpop.f32.mrf.mxu2 }
0x1faf   : > { %v6176_v59 = vpop.f32.mrf.mxu2 }
0x1fb0   : > { %v6177_v0 = vadd.f32 %v7140_v51, %v6176_v59 }
0x1fb2   : > { %v6179_v50 = vadd.f32 %v6177_v0, %v6073_v61 }
0x1fb4   : > { %6180 = vst.msk [vmem:[%s2329_s2] sm:$0xff] %vm2402_vm2, %v6179_v50 }
0x1fb5 PF: > { %s156_s15 = sadd.s32 1, %s7967_s15  }
0x1fb6   : > { %p153_p3 = scmp.ge.s32.totalorder %s156_s15, 4  }
0x1fb8   :  { %155 = sbr.rel (!%p153_p3) target bundleno = 140 (0x8c), region = 492 }
0x1fbd   :  { %6200 = vsyncpa [#allocation3], 1 }
0x1fbe   :  { %6202 = vsyncpa [#allocation3 + $0x1], 1 }
0x1fbf   :  { %6203 = vsyncpa [#allocation5], 1 }
0x1fc0   :  { %6204 = vsyncpa [#allocation8], 1 }
0x1fc1   :  { %6205 = vsyncpa [#allocation11], 1 }
0x1fc2   :  { %6206 = vsyncpa [#allocation14], 1 }
0x1fc3   :  { %6207 = vsyncpa [#allocation17], 1 }
0x1fc4   :  { %6208 = vsyncpa [#allocation20], 1 }
0x1fc5   :  { %6209 = vsyncpa [#allocation23], 1 }
0x1fc6   :  { %6210 = vsyncpa [#allocation26], 1 }
0x1fc7   :  { %6211 = vsyncpa [#allocation29], 1 }
0x1fc8   :  { %6212 = vsyncpa [#allocation32], 1 }
0x1fc9   :  { %6213 = vsyncpa [#allocation35], 1 }
0x1fca   :  { %6214 = vsyncpa [#allocation38], 1 }

</bundles_post_ra>
